<compile_context>
chip_gen: v7x
topology: tpu7x:2x2x1
jax: 0.10.0
libtpu: 0.0.40
codegen_flags: <defaults>
</compile_context>

<pallas_src>
import functools

import jax
import jax.numpy as jnp
from jax.experimental import pallas as pl
from jax.experimental.pallas import tpu as pltpu


def _elu(x):
    # exp only on the non-positive branch so the discarded lane never overflows.
    return jnp.where(x > 0, x, jnp.exp(jnp.minimum(x, 0.0)) - 1.0)


def _masked_softmax(mask, scores):
    """softmax_j over edges j->i of leaky_relu(scores), rows = destinations."""
    s = jnp.where(scores > 0, scores, 0.2 * scores)     # leaky_relu(slope=0.2)
    s = jnp.where(mask, s, jnp.float32(-1e30))          # mask non-edges
    m = jnp.max(s, axis=-1, keepdims=True)              # >=1 edge/row (self-loops)
    e = jnp.exp(s - m)                                  # masked entries underflow to 0
    denom = jnp.sum(e, axis=-1, keepdims=True)
    return e * pl.reciprocal(denom, approx=True)        # EUP reciprocal, not VPU divide


def _gat_fused_kernel(x_ref, mask_ref, w1_ref, b1_ref, w2_ref, b2_ref,
                      fc1w_ref, fc1b_ref, fc2w_ref, fc2b_ref,
                      out_ref, h1_ref, flat_ref,
                      *, n_nodes, b_blk, heads1, c1, heads2, c2):
    x = x_ref[...]                                      # (BN, Fin) bf16
    mask = mask_ref[...].astype(jnp.float32) > 0.0      # (BN, BN) block-diag bool

    # ---- conv1: projection + folded attention vectors, one MXU pass --------
    d1 = heads1 * c1
    p1 = jnp.dot(x, w1_ref[...], preferred_element_type=jnp.float32)  # (BN, d1+2H1)
    feat1 = p1[:, :d1].astype(jnp.bfloat16)
    asrc1_t = p1[:, d1:d1 + heads1].T                   # (H1, BN): one hoisted transpose
    adst1 = p1[:, d1 + heads1:d1 + 2 * heads1]          # (BN, H1)
    for h in range(heads1):                             # static unroll; concat via slices
        attn = _masked_softmax(mask, adst1[:, h:h + 1] + asrc1_t[h:h + 1, :])
        h1_ref[:, h * c1:(h + 1) * c1] = jnp.dot(
            attn.astype(jnp.bfloat16), feat1[:, h * c1:(h + 1) * c1],
            preferred_element_type=jnp.float32)
    h1 = _elu(h1_ref[...] + b1_ref[...])                # bias + fused F.elu (f32)
    # TODO(synk): dropout(p=0.6) between conv1 and conv2 is identity in eval mode.
    h1 = h1.astype(jnp.bfloat16)

    # ---- conv2 (concat=False -> head average) -------------------------------
    d2 = heads2 * c2
    p2 = jnp.dot(h1, w2_ref[...], preferred_element_type=jnp.float32)  # (BN, d2+2H2)
    feat2 = p2[:, :d2].astype(jnp.bfloat16)
    asrc2_t = p2[:, d2:d2 + heads2].T                   # (H2, BN)
    adst2 = p2[:, d2 + heads2:d2 + 2 * heads2]
    acc = None
    for h in range(heads2):
        attn = _masked_softmax(mask, adst2[:, h:h + 1] + asrc2_t[h:h + 1, :])
        ho = jnp.dot(attn.astype(jnp.bfloat16), feat2[:, h * c2:(h + 1) * c2],
                     preferred_element_type=jnp.float32)
        acc = ho if acc is None else acc + ho
    h2 = acc * (1.0 / float(heads2)) + b2_ref[...]      # (BN, c2) f32

    # ---- flatten: node-major rows -> (B_blk, N*c2) via contiguous block copies
    for n in range(n_nodes):
        flat_ref[:, n * c2:(n + 1) * c2] = h2[n * b_blk:(n + 1) * b_blk, :]
    flat = flat_ref[...].astype(jnp.bfloat16)           # (B_blk, N*c2)

    # ---- MLP head: fc1(+folded BatchNorm) -> ELU -> fc2, all 128-lane dense --
    z = jnp.dot(flat, fc1w_ref[...], preferred_element_type=jnp.float32) + fc1b_ref[...]
    z = _elu(z)
    # TODO(synk): dropout(p=args.dropout_ratio) before fc2 is identity in eval mode.
    out_ref[...] = (jnp.dot(z.astype(jnp.bfloat16), fc2w_ref[...],
                            preferred_element_type=jnp.float32)
                    + fc2b_ref[...]).astype(out_ref.dtype)


def _fold_attention_weights(w, att_src, att_dst, heads, out_ch):
    """x @ [W | W.a_src | W.a_dst] yields feat, alpha_src, alpha_dst in one matmul."""
    w_r = w.reshape(w.shape[0], heads, out_ch)
    w_asrc = jnp.einsum('fhc,hc->fh', w_r, att_src)     # (Fin, heads)
    w_adst = jnp.einsum('fhc,hc->fh', w_r, att_dst)     # (Fin, heads)
    return jnp.concatenate([w, w_asrc, w_adst], axis=1)


def gat_forward(x, adj, params, *, numROI, hid, in_head, out_head, block_graphs=8):
    B, N, Fin = x.shape
    assert N == numROI
    c1, c2 = hid, hid * in_head
    d1 = in_head * c1
    n_logits = params["fc2_w"].shape[1]
    PAD = 128                                           # lane-dense MLP head / logits

    # --- batch tiling: B_blk graphs per grid step, node-major stacking -------
    Bk = block_graphs
    Bp = ((B + Bk - 1) // Bk) * Bk
    if Bp != B:                                         # pad batch with isolated graphs
        x = jnp.concatenate([x, jnp.zeros((Bp - B, N, Fin), x.dtype)], axis=0)
        pad_adj = jnp.broadcast_to(jnp.eye(N, dtype=adj.dtype), (Bp - B, N, N))
        adj = jnp.concatenate([adj, pad_adj], axis=0)
    T = Bp // Bk
    BN = Bk * N

    # guarantee self-loops (PyG GATConv add_self_loops) -> every softmax row non-empty
    adj = jnp.maximum(adj, jnp.eye(N, dtype=adj.dtype)[None])

    # node-major stacked features: row n*Bk + b  <-  (graph b, node n)
    x_s = (x.reshape(T, Bk, N, Fin).transpose(0, 2, 1, 3)
             .reshape(T * BN, Fin).astype(jnp.bfloat16))

    # block-diagonal edge mask in the same node-major ordering, shipped as int8
    adj_t = adj.reshape(T, Bk, N, N).transpose(0, 2, 1, 3)           # (T, N, Bk, N)
    eye_b = jnp.eye(Bk, dtype=jnp.float32)
    mask = (adj_t.astype(jnp.float32)[:, :, :, :, None]
            * eye_b[None, None, :, None, :])                         # (T, N, Bk, N, Bk)
    mask = (mask.reshape(T * BN, BN) > 0).astype(jnp.int8)

    # --- weights: fold attention vectors, fold BatchNorm, pad head to 128 lanes
    w1_aug = _fold_attention_weights(params["w1"], params["asrc1"],
                                     params["adst1"], in_head, c1).astype(jnp.bfloat16)
    w2_aug = _fold_attention_weights(params["w2"], params["asrc2"],
                                     params["adst2"], out_head, c2).astype(jnp.bfloat16)
    fc1_w = params["fc1_w"] * params["bn_scale"]                     # fold BN (eval)
    fc1_b = params["fc1_b"] * params["bn_scale"] + params["bn_shift"]
    fc1_w_p = (jnp.zeros((N * c2, PAD), jnp.float32)
               .at[:, :numROI].set(fc1_w).astype(jnp.bfloat16))
    fc1_b_p = jnp.zeros((1, PAD), jnp.float32).at[:, :numROI].set(fc1_b)
    fc2_w_p = (jnp.zeros((PAD, PAD), jnp.float32)
               .at[:numROI, :n_logits].set(params["fc2_w"]).astype(jnp.bfloat16))
    fc2_b_p = jnp.zeros((1, PAD), jnp.float32).at[:, :n_logits].set(params["fc2_b"])

    kernel = functools.partial(_gat_fused_kernel, n_nodes=N, b_blk=Bk,
                               heads1=in_head, c1=c1, heads2=out_head, c2=c2)

    def _const(arr):                                    # full-array resident block
        return pl.BlockSpec(arr.shape, lambda t: (0, 0))

    out = pl.pallas_call(
        kernel,
        out_shape=jax.ShapeDtypeStruct((T * Bk, PAD), jnp.float32),
        grid=(T,),
        in_specs=[
            pl.BlockSpec((BN, Fin), lambda t: (t, 0)),
            pl.BlockSpec((BN, BN), lambda t: (t, 0)),
            _const(w1_aug), _const(params["bias1"]),
            _const(w2_aug), _const(params["bias2"]),
            _const(fc1_w_p), _const(fc1_b_p),
            _const(fc2_w_p), _const(fc2_b_p),
        ],
        out_specs=pl.BlockSpec((Bk, PAD), lambda t: (t, 0)),
        scratch_shapes=[pltpu.VMEM((BN, d1), jnp.float32),      # h1 concat buffer
                        pltpu.VMEM((Bk, N * c2), jnp.float32)], # flattened conv2 output
        compiler_params=pltpu.CompilerParams(
            dimension_semantics=("parallel",)),
    )(x_s, mask, w1_aug, params["bias1"], w2_aug, params["bias2"],
      fc1_w_p, fc1_b_p, fc2_w_p, fc2_b_p)
    return out[:B, :n_logits]


if __name__ == "__main__":
    # small deterministic shapes: args.numROI=16, hid=8, in_head=4, out_head=1
    # batch of 16 graphs -> 2 grid tiles of 8 graphs (128 stacked node rows each)
    B, numROI, hid, in_head, out_head = 16, 16, 8, 4, 1
    F2 = hid * in_head

    key = jax.random.PRNGKey(0)
    ks = jax.random.split(key, 16)

    # node features: each node carries a numROI-dim feature row
    x = jax.random.normal(ks[0], (B, numROI, numROI), dtype=jnp.float32)

    # deterministic per-graph symmetric adjacency + self-loops
    probs = jax.random.uniform(ks[1], (B, numROI, numROI))
    adj = ((probs + jnp.swapaxes(probs, 1, 2)) > 1.0).astype(jnp.float32)
    adj = jnp.maximum(adj, jnp.eye(numROI, dtype=jnp.float32)[None])

    params = dict(
        # conv1: GATConv(numROI -> hid, heads=in_head, concat=True)
        w1=0.1 * jax.random.normal(ks[2], (numROI, in_head * hid), jnp.float32),
        asrc1=0.1 * jax.random.normal(ks[3], (in_head, hid), jnp.float32),
        adst1=0.1 * jax.random.normal(ks[4], (in_head, hid), jnp.float32),
        bias1=0.1 * jax.random.normal(ks[5], (1, in_head * hid), jnp.float32),
        # conv2: GATConv(hid*in_head -> hid*in_head, heads=out_head, concat=False)
        w2=0.1 * jax.random.normal(ks[6], (F2, out_head * F2), jnp.float32),
        asrc2=0.1 * jax.random.normal(ks[7], (out_head, F2), jnp.float32),
        adst2=0.1 * jax.random.normal(ks[8], (out_head, F2), jnp.float32),
        bias2=0.1 * jax.random.normal(ks[9], (1, F2), jnp.float32),
        # fc1 / fc2
        fc1_w=0.05 * jax.random.normal(ks[10], (numROI * F2, numROI), jnp.float32),
        fc1_b=0.05 * jax.random.normal(ks[11], (1, numROI), jnp.float32),
        fc2_w=0.05 * jax.random.normal(ks[12], (numROI, 2), jnp.float32),
        fc2_b=0.05 * jax.random.normal(ks[13], (1, 2), jnp.float32),
    )
    # BatchNorm1d(numROI), eval mode: gamma=1, beta=0, running_mean=0, running_var=1
    eps = 1e-5
    gamma = jnp.ones((1, numROI), jnp.float32)
    beta = jnp.zeros((1, numROI), jnp.float32)
    running_mean = jnp.zeros((1, numROI), jnp.float32)
    running_var = jnp.ones((1, numROI), jnp.float32)
    params["bn_scale"] = gamma / jnp.sqrt(running_var + eps)
    params["bn_shift"] = beta - running_mean * params["bn_scale"]

    logits = gat_forward(x, adj, params, numROI=numROI, hid=hid,
                         in_head=in_head, out_head=out_head, block_graphs=8)
    logits = jax.block_until_ready(logits)
    assert logits.shape == (B, 2) and logits.dtype == jnp.float32
    assert bool(jnp.all(jnp.isfinite(logits)))
    print("KERNEL_OK")
</pallas_src>

<mosaic_0001>
module attributes {stable_mosaic.version = 11 : i64} {
  func.func @_gat_fused_kernel(%arg0: i32, %arg1: memref<128x16xbf16, #tpu.memory_space<vmem>>, %arg2: memref<128x128xi8, #tpu.memory_space<vmem>>, %arg3: memref<16x40xbf16, #tpu.memory_space<vmem>>, %arg4: memref<1x32xf32, #tpu.memory_space<vmem>>, %arg5: memref<32x34xbf16, #tpu.memory_space<vmem>>, %arg6: memref<1x32xf32, #tpu.memory_space<vmem>>, %arg7: memref<512x128xbf16, #tpu.memory_space<vmem>>, %arg8: memref<1x128xf32, #tpu.memory_space<vmem>>, %arg9: memref<128x128xbf16, #tpu.memory_space<vmem>>, %arg10: memref<1x128xf32, #tpu.memory_space<vmem>>, %arg11: memref<8x128xf32, #tpu.memory_space<vmem>>, %arg12: memref<128x32xf32, #tpu.memory_space<vmem>>, %arg13: memref<8x512xf32, #tpu.memory_space<vmem>>) attributes {dimension_semantics = [#tpu.dimension_semantics<parallel>], iteration_bounds = array<i64: 2>, scalar_prefetch = 0 : i64, scratch_operands = 2 : i64, tpu.core_type = #tpu.core_type<tc>, window_params = [{transform_indices = @transform_0, window_bounds = array<i64: 128, 16>}, {transform_indices = @transform_1, window_bounds = array<i64: 128, 128>}, {pipeline_mode = #tpu.pipeline_mode<synchronous>, transform_indices = @transform_2, window_bounds = array<i64: 16, 40>}, {pipeline_mode = #tpu.pipeline_mode<synchronous>, transform_indices = @transform_3, window_bounds = array<i64: 1, 32>}, {pipeline_mode = #tpu.pipeline_mode<synchronous>, transform_indices = @transform_4, window_bounds = array<i64: 32, 34>}, {pipeline_mode = #tpu.pipeline_mode<synchronous>, transform_indices = @transform_5, window_bounds = array<i64: 1, 32>}, {pipeline_mode = #tpu.pipeline_mode<synchronous>, transform_indices = @transform_6, window_bounds = array<i64: 512, 128>}, {pipeline_mode = #tpu.pipeline_mode<synchronous>, transform_indices = @transform_7, window_bounds = array<i64: 1, 128>}, {pipeline_mode = #tpu.pipeline_mode<synchronous>, transform_indices = @transform_8, window_bounds = array<i64: 128, 128>}, {pipeline_mode = #tpu.pipeline_mode<synchronous>, transform_indices = @transform_9, window_bounds = array<i64: 1, 128>}, {transform_indices = @transform_10, window_bounds = array<i64: 8, 128>}]} {
    %c0 = arith.constant 0 : index
    %c0_0 = arith.constant 0 : index
    %0 = vector.load %arg1[%c0, %c0_0] : memref<128x16xbf16, #tpu.memory_space<vmem>>, vector<128x16xbf16>
    %c0_1 = arith.constant 0 : index
    %c0_2 = arith.constant 0 : index
    %1 = vector.load %arg2[%c0_1, %c0_2] : memref<128x128xi8, #tpu.memory_space<vmem>>, vector<128x128xi8>
    %2 = arith.sitofp %1 : vector<128x128xi8> to vector<128x128xf32>
    %cst = arith.constant 0.000000e+00 : f32
    %3 = vector.broadcast %cst : f32 to vector<128x128xf32>
    %4 = arith.cmpf ogt, %2, %3 : vector<128x128xf32>
    %c0_3 = arith.constant 0 : index
    %c0_4 = arith.constant 0 : index
    %5 = vector.load %arg3[%c0_3, %c0_4] : memref<16x40xbf16, #tpu.memory_space<vmem>>, vector<16x40xbf16>
    %cst_5 = arith.constant dense<0.000000e+00> : vector<128x40xf32>
    %6 = tpu.matmul %0, %5, %cst_5 {dimension_numbers = #tpu.dot_dimension_numbers<[1], [0], [0], [1], [0, 0, 1, 1], [], []>} : vector<128x16xbf16>, vector<16x40xbf16>, vector<128x40xf32> -> vector<128x40xf32>
    %7 = vector.extract_strided_slice %6 {offsets = [0, 0], sizes = [128, 32], strides = [1, 1]} : vector<128x40xf32> to vector<128x32xf32>
    %8 = arith.truncf %7 : vector<128x32xf32> to vector<128x32xbf16>
    %9 = vector.extract_strided_slice %6 {offsets = [0, 32], sizes = [128, 4], strides = [1, 1]} : vector<128x40xf32> to vector<128x4xf32>
    %10 = tpu.transpose %9, [1, 0] : vector<128x4xf32> -> vector<4x128xf32>
    %11 = vector.extract_strided_slice %6 {offsets = [0, 36], sizes = [128, 4], strides = [1, 1]} : vector<128x40xf32> to vector<128x4xf32>
    %12 = vector.extract_strided_slice %11 {offsets = [0, 0], sizes = [128, 1], strides = [1, 1]} : vector<128x4xf32> to vector<128x1xf32>
    %13 = vector.extract_strided_slice %10 {offsets = [0, 0], sizes = [1, 128], strides = [1, 1]} : vector<4x128xf32> to vector<1x128xf32>
    %14 = vector.broadcast %12 : vector<128x1xf32> to vector<128x128xf32>
    %15 = vector.broadcast %13 : vector<1x128xf32> to vector<128x128xf32>
    %16 = arith.addf %14, %15 : vector<128x128xf32>
    %cst_6 = arith.constant 0.000000e+00 : f32
    %17 = vector.broadcast %cst_6 : f32 to vector<128x128xf32>
    %18 = arith.cmpf ogt, %16, %17 : vector<128x128xf32>
    %cst_7 = arith.constant 2.000000e-01 : f32
    %19 = vector.broadcast %cst_7 : f32 to vector<128x128xf32>
    %20 = arith.mulf %19, %16 : vector<128x128xf32>
    %21 = arith.select %18, %16, %20 : vector<128x128xi1>, vector<128x128xf32>
    %cst_8 = arith.constant -1.000000e+30 : f32
    %22 = vector.broadcast %cst_8 : f32 to vector<128x128xf32>
    %23 = arith.select %4, %21, %22 : vector<128x128xi1>, vector<128x128xf32>
    %cst_9 = arith.constant dense<0xFF800000> : vector<128xf32>
    %24 = vector.multi_reduction <maximumf>, %23, %cst_9 [1] : vector<128x128xf32> to vector<128xf32>
    %25 = vector.shape_cast %24 : vector<128xf32> to vector<128x1xf32>
    %26 = vector.broadcast %25 : vector<128x1xf32> to vector<128x128xf32>
    %27 = arith.subf %23, %26 : vector<128x128xf32>
    %28 = math.exp %27 : vector<128x128xf32>
    %cst_10 = arith.constant dense<0.000000e+00> : vector<128xf32>
    %29 = vector.multi_reduction <add>, %28, %cst_10 [1] : vector<128x128xf32> to vector<128xf32>
    %30 = vector.shape_cast %29 : vector<128xf32> to vector<128x1xf32>
    %31 = tpu.reciprocal %30 {approx = true} : vector<128x1xf32> -> vector<128x1xf32>
    %32 = vector.broadcast %31 : vector<128x1xf32> to vector<128x128xf32>
    %33 = arith.mulf %28, %32 : vector<128x128xf32>
    %34 = arith.truncf %33 : vector<128x128xf32> to vector<128x128xbf16>
    %35 = vector.extract_strided_slice %8 {offsets = [0, 0], sizes = [128, 8], strides = [1, 1]} : vector<128x32xbf16> to vector<128x8xbf16>
    %cst_11 = arith.constant dense<0.000000e+00> : vector<128x8xf32>
    %36 = tpu.matmul %34, %35, %cst_11 {dimension_numbers = #tpu.dot_dimension_numbers<[1], [0], [0], [1], [0, 0, 1, 1], [], []>} : vector<128x128xbf16>, vector<128x8xbf16>, vector<128x8xf32> -> vector<128x8xf32>
    %c0_12 = arith.constant 0 : index
    %c0_13 = arith.constant 0 : index
    %37 = vector.load %arg12[%c0_12, %c0_13] : memref<128x32xf32, #tpu.memory_space<vmem>>, vector<128x8xf32>
    tpu.vector_store %arg12[%c0_12, %c0_13], %36 {strides = array<i32>} : memref<128x32xf32, #tpu.memory_space<vmem>>, vector<128x8xf32>,
    %38 = vector.extract_strided_slice %11 {offsets = [0, 1], sizes = [128, 1], strides = [1, 1]} : vector<128x4xf32> to vector<128x1xf32>
    %39 = vector.extract_strided_slice %10 {offsets = [1, 0], sizes = [1, 128], strides = [1, 1]} : vector<4x128xf32> to vector<1x128xf32>
    %40 = vector.broadcast %38 : vector<128x1xf32> to vector<128x128xf32>
    %41 = vector.broadcast %39 : vector<1x128xf32> to vector<128x128xf32>
    %42 = arith.addf %40, %41 : vector<128x128xf32>
    %cst_14 = arith.constant 0.000000e+00 : f32
    %43 = vector.broadcast %cst_14 : f32 to vector<128x128xf32>
    %44 = arith.cmpf ogt, %42, %43 : vector<128x128xf32>
    %cst_15 = arith.constant 2.000000e-01 : f32
    %45 = vector.broadcast %cst_15 : f32 to vector<128x128xf32>
    %46 = arith.mulf %45, %42 : vector<128x128xf32>
    %47 = arith.select %44, %42, %46 : vector<128x128xi1>, vector<128x128xf32>
    %cst_16 = arith.constant -1.000000e+30 : f32
    %48 = vector.broadcast %cst_16 : f32 to vector<128x128xf32>
    %49 = arith.select %4, %47, %48 : vector<128x128xi1>, vector<128x128xf32>
    %cst_17 = arith.constant dense<0xFF800000> : vector<128xf32>
    %50 = vector.multi_reduction <maximumf>, %49, %cst_17 [1] : vector<128x128xf32> to vector<128xf32>
    %51 = vector.shape_cast %50 : vector<128xf32> to vector<128x1xf32>
    %52 = vector.broadcast %51 : vector<128x1xf32> to vector<128x128xf32>
    %53 = arith.subf %49, %52 : vector<128x128xf32>
    %54 = math.exp %53 : vector<128x128xf32>
    %cst_18 = arith.constant dense<0.000000e+00> : vector<128xf32>
    %55 = vector.multi_reduction <add>, %54, %cst_18 [1] : vector<128x128xf32> to vector<128xf32>
    %56 = vector.shape_cast %55 : vector<128xf32> to vector<128x1xf32>
    %57 = tpu.reciprocal %56 {approx = true} : vector<128x1xf32> -> vector<128x1xf32>
    %58 = vector.broadcast %57 : vector<128x1xf32> to vector<128x128xf32>
    %59 = arith.mulf %54, %58 : vector<128x128xf32>
    %60 = arith.truncf %59 : vector<128x128xf32> to vector<128x128xbf16>
    %61 = vector.extract_strided_slice %8 {offsets = [0, 8], sizes = [128, 8], strides = [1, 1]} : vector<128x32xbf16> to vector<128x8xbf16>
    %cst_19 = arith.constant dense<0.000000e+00> : vector<128x8xf32>
    %62 = tpu.matmul %60, %61, %cst_19 {dimension_numbers = #tpu.dot_dimension_numbers<[1], [0], [0], [1], [0, 0, 1, 1], [], []>} : vector<128x128xbf16>, vector<128x8xbf16>, vector<128x8xf32> -> vector<128x8xf32>
    %c0_20 = arith.constant 0 : index
    %c8 = arith.constant 8 : index
    %63 = vector.load %arg12[%c0_20, %c8] : memref<128x32xf32, #tpu.memory_space<vmem>>, vector<128x8xf32>
    tpu.vector_store %arg12[%c0_20, %c8], %62 {strides = array<i32>} : memref<128x32xf32, #tpu.memory_space<vmem>>, vector<128x8xf32>,
    %64 = vector.extract_strided_slice %11 {offsets = [0, 2], sizes = [128, 1], strides = [1, 1]} : vector<128x4xf32> to vector<128x1xf32>
    %65 = vector.extract_strided_slice %10 {offsets = [2, 0], sizes = [1, 128], strides = [1, 1]} : vector<4x128xf32> to vector<1x128xf32>
    %66 = vector.broadcast %64 : vector<128x1xf32> to vector<128x128xf32>
    %67 = vector.broadcast %65 : vector<1x128xf32> to vector<128x128xf32>
    %68 = arith.addf %66, %67 : vector<128x128xf32>
    %cst_21 = arith.constant 0.000000e+00 : f32
    %69 = vector.broadcast %cst_21 : f32 to vector<128x128xf32>
    %70 = arith.cmpf ogt, %68, %69 : vector<128x128xf32>
    %cst_22 = arith.constant 2.000000e-01 : f32
    %71 = vector.broadcast %cst_22 : f32 to vector<128x128xf32>
    %72 = arith.mulf %71, %68 : vector<128x128xf32>
    %73 = arith.select %70, %68, %72 : vector<128x128xi1>, vector<128x128xf32>
    %cst_23 = arith.constant -1.000000e+30 : f32
    %74 = vector.broadcast %cst_23 : f32 to vector<128x128xf32>
    %75 = arith.select %4, %73, %74 : vector<128x128xi1>, vector<128x128xf32>
    %cst_24 = arith.constant dense<0xFF800000> : vector<128xf32>
    %76 = vector.multi_reduction <maximumf>, %75, %cst_24 [1] : vector<128x128xf32> to vector<128xf32>
    %77 = vector.shape_cast %76 : vector<128xf32> to vector<128x1xf32>
    %78 = vector.broadcast %77 : vector<128x1xf32> to vector<128x128xf32>
    %79 = arith.subf %75, %78 : vector<128x128xf32>
    %80 = math.exp %79 : vector<128x128xf32>
    %cst_25 = arith.constant dense<0.000000e+00> : vector<128xf32>
    %81 = vector.multi_reduction <add>, %80, %cst_25 [1] : vector<128x128xf32> to vector<128xf32>
    %82 = vector.shape_cast %81 : vector<128xf32> to vector<128x1xf32>
    %83 = tpu.reciprocal %82 {approx = true} : vector<128x1xf32> -> vector<128x1xf32>
    %84 = vector.broadcast %83 : vector<128x1xf32> to vector<128x128xf32>
    %85 = arith.mulf %80, %84 : vector<128x128xf32>
    %86 = arith.truncf %85 : vector<128x128xf32> to vector<128x128xbf16>
    %87 = vector.extract_strided_slice %8 {offsets = [0, 16], sizes = [128, 8], strides = [1, 1]} : vector<128x32xbf16> to vector<128x8xbf16>
    %cst_26 = arith.constant dense<0.000000e+00> : vector<128x8xf32>
    %88 = tpu.matmul %86, %87, %cst_26 {dimension_numbers = #tpu.dot_dimension_numbers<[1], [0], [0], [1], [0, 0, 1, 1], [], []>} : vector<128x128xbf16>, vector<128x8xbf16>, vector<128x8xf32> -> vector<128x8xf32>
    %c0_27 = arith.constant 0 : index
    %c16 = arith.constant 16 : index
    %89 = vector.load %arg12[%c0_27, %c16] : memref<128x32xf32, #tpu.memory_space<vmem>>, vector<128x8xf32>
    tpu.vector_store %arg12[%c0_27, %c16], %88 {strides = array<i32>} : memref<128x32xf32, #tpu.memory_space<vmem>>, vector<128x8xf32>,
    %90 = vector.extract_strided_slice %11 {offsets = [0, 3], sizes = [128, 1], strides = [1, 1]} : vector<128x4xf32> to vector<128x1xf32>
    %91 = vector.extract_strided_slice %10 {offsets = [3, 0], sizes = [1, 128], strides = [1, 1]} : vector<4x128xf32> to vector<1x128xf32>
    %92 = vector.broadcast %90 : vector<128x1xf32> to vector<128x128xf32>
    %93 = vector.broadcast %91 : vector<1x128xf32> to vector<128x128xf32>
    %94 = arith.addf %92, %93 : vector<128x128xf32>
    %cst_28 = arith.constant 0.000000e+00 : f32
    %95 = vector.broadcast %cst_28 : f32 to vector<128x128xf32>
    %96 = arith.cmpf ogt, %94, %95 : vector<128x128xf32>
    %cst_29 = arith.constant 2.000000e-01 : f32
    %97 = vector.broadcast %cst_29 : f32 to vector<128x128xf32>
    %98 = arith.mulf %97, %94 : vector<128x128xf32>
    %99 = arith.select %96, %94, %98 : vector<128x128xi1>, vector<128x128xf32>
    %cst_30 = arith.constant -1.000000e+30 : f32
    %100 = vector.broadcast %cst_30 : f32 to vector<128x128xf32>
    %101 = arith.select %4, %99, %100 : vector<128x128xi1>, vector<128x128xf32>
    %cst_31 = arith.constant dense<0xFF800000> : vector<128xf32>
    %102 = vector.multi_reduction <maximumf>, %101, %cst_31 [1] : vector<128x128xf32> to vector<128xf32>
    %103 = vector.shape_cast %102 : vector<128xf32> to vector<128x1xf32>
    %104 = vector.broadcast %103 : vector<128x1xf32> to vector<128x128xf32>
    %105 = arith.subf %101, %104 : vector<128x128xf32>
    %106 = math.exp %105 : vector<128x128xf32>
    %cst_32 = arith.constant dense<0.000000e+00> : vector<128xf32>
    %107 = vector.multi_reduction <add>, %106, %cst_32 [1] : vector<128x128xf32> to vector<128xf32>
    %108 = vector.shape_cast %107 : vector<128xf32> to vector<128x1xf32>
    %109 = tpu.reciprocal %108 {approx = true} : vector<128x1xf32> -> vector<128x1xf32>
    %110 = vector.broadcast %109 : vector<128x1xf32> to vector<128x128xf32>
    %111 = arith.mulf %106, %110 : vector<128x128xf32>
    %112 = arith.truncf %111 : vector<128x128xf32> to vector<128x128xbf16>
    %113 = vector.extract_strided_slice %8 {offsets = [0, 24], sizes = [128, 8], strides = [1, 1]} : vector<128x32xbf16> to vector<128x8xbf16>
    %cst_33 = arith.constant dense<0.000000e+00> : vector<128x8xf32>
    %114 = tpu.matmul %112, %113, %cst_33 {dimension_numbers = #tpu.dot_dimension_numbers<[1], [0], [0], [1], [0, 0, 1, 1], [], []>} : vector<128x128xbf16>, vector<128x8xbf16>, vector<128x8xf32> -> vector<128x8xf32>
    %c0_34 = arith.constant 0 : index
    %c24 = arith.constant 24 : index
    %115 = vector.load %arg12[%c0_34, %c24] : memref<128x32xf32, #tpu.memory_space<vmem>>, vector<128x8xf32>
    tpu.vector_store %arg12[%c0_34, %c24], %114 {strides = array<i32>} : memref<128x32xf32, #tpu.memory_space<vmem>>, vector<128x8xf32>,
    %c0_35 = arith.constant 0 : index
    %c0_36 = arith.constant 0 : index
    %116 = vector.load %arg12[%c0_35, %c0_36] : memref<128x32xf32, #tpu.memory_space<vmem>>, vector<128x32xf32>
    %c0_37 = arith.constant 0 : index
    %c0_38 = arith.constant 0 : index
    %117 = vector.load %arg4[%c0_37, %c0_38] : memref<1x32xf32, #tpu.memory_space<vmem>>, vector<1x32xf32>
    %118 = vector.broadcast %117 : vector<1x32xf32> to vector<128x32xf32>
    %119 = arith.addf %116, %118 : vector<128x32xf32>
    %cst_39 = arith.constant 0.000000e+00 : f32
    %120 = vector.broadcast %cst_39 : f32 to vector<128x32xf32>
    %121 = arith.cmpf ogt, %119, %120 : vector<128x32xf32>
    %cst_40 = arith.constant 0.000000e+00 : f32
    %122 = vector.broadcast %cst_40 : f32 to vector<128x32xf32>
    %123 = arith.minimumf %119, %122 : vector<128x32xf32>
    %124 = math.exp %123 : vector<128x32xf32>
    %cst_41 = arith.constant 1.000000e+00 : f32
    %125 = vector.broadcast %cst_41 : f32 to vector<128x32xf32>
    %126 = arith.subf %124, %125 : vector<128x32xf32>
    %127 = arith.select %121, %119, %126 : vector<128x32xi1>, vector<128x32xf32>
    %128 = arith.truncf %127 : vector<128x32xf32> to vector<128x32xbf16>
    %c0_42 = arith.constant 0 : index
    %c0_43 = arith.constant 0 : index
    %129 = vector.load %arg5[%c0_42, %c0_43] : memref<32x34xbf16, #tpu.memory_space<vmem>>, vector<32x34xbf16>
    %cst_44 = arith.constant dense<0.000000e+00> : vector<128x34xf32>
    %130 = tpu.matmul %128, %129, %cst_44 {dimension_numbers = #tpu.dot_dimension_numbers<[1], [0], [0], [1], [0, 0, 1, 1], [], []>} : vector<128x32xbf16>, vector<32x34xbf16>, vector<128x34xf32> -> vector<128x34xf32>
    %131 = vector.extract_strided_slice %130 {offsets = [0, 0], sizes = [128, 32], strides = [1, 1]} : vector<128x34xf32> to vector<128x32xf32>
    %132 = arith.truncf %131 : vector<128x32xf32> to vector<128x32xbf16>
    %133 = vector.extract_strided_slice %130 {offsets = [0, 32], sizes = [128, 1], strides = [1, 1]} : vector<128x34xf32> to vector<128x1xf32>
    %134 = tpu.transpose %133, [1, 0] : vector<128x1xf32> -> vector<1x128xf32>
    %135 = vector.extract_strided_slice %130 {offsets = [0, 33], sizes = [128, 1], strides = [1, 1]} : vector<128x34xf32> to vector<128x1xf32>
    %136 = vector.broadcast %135 : vector<128x1xf32> to vector<128x128xf32>
    %137 = vector.broadcast %134 : vector<1x128xf32> to vector<128x128xf32>
    %138 = arith.addf %136, %137 : vector<128x128xf32>
    %cst_45 = arith.constant 0.000000e+00 : f32
    %139 = vector.broadcast %cst_45 : f32 to vector<128x128xf32>
    %140 = arith.cmpf ogt, %138, %139 : vector<128x128xf32>
    %cst_46 = arith.constant 2.000000e-01 : f32
    %141 = vector.broadcast %cst_46 : f32 to vector<128x128xf32>
    %142 = arith.mulf %141, %138 : vector<128x128xf32>
    %143 = arith.select %140, %138, %142 : vector<128x128xi1>, vector<128x128xf32>
    %cst_47 = arith.constant -1.000000e+30 : f32
    %144 = vector.broadcast %cst_47 : f32 to vector<128x128xf32>
    %145 = arith.select %4, %143, %144 : vector<128x128xi1>, vector<128x128xf32>
    %cst_48 = arith.constant dense<0xFF800000> : vector<128xf32>
    %146 = vector.multi_reduction <maximumf>, %145, %cst_48 [1] : vector<128x128xf32> to vector<128xf32>
    %147 = vector.shape_cast %146 : vector<128xf32> to vector<128x1xf32>
    %148 = vector.broadcast %147 : vector<128x1xf32> to vector<128x128xf32>
    %149 = arith.subf %145, %148 : vector<128x128xf32>
    %150 = math.exp %149 : vector<128x128xf32>
    %cst_49 = arith.constant dense<0.000000e+00> : vector<128xf32>
    %151 = vector.multi_reduction <add>, %150, %cst_49 [1] : vector<128x128xf32> to vector<128xf32>
    %152 = vector.shape_cast %151 : vector<128xf32> to vector<128x1xf32>
    %153 = tpu.reciprocal %152 {approx = true} : vector<128x1xf32> -> vector<128x1xf32>
    %154 = vector.broadcast %153 : vector<128x1xf32> to vector<128x128xf32>
    %155 = arith.mulf %150, %154 : vector<128x128xf32>
    %156 = arith.truncf %155 : vector<128x128xf32> to vector<128x128xbf16>
    %cst_50 = arith.constant dense<0.000000e+00> : vector<128x32xf32>
    %157 = tpu.matmul %156, %132, %cst_50 {dimension_numbers = #tpu.dot_dimension_numbers<[1], [0], [0], [1], [0, 0, 1, 1], [], []>} : vector<128x128xbf16>, vector<128x32xbf16>, vector<128x32xf32> -> vector<128x32xf32>
    %cst_51 = arith.constant 1.000000e+00 : f32
    %158 = vector.broadcast %cst_51 : f32 to vector<128x32xf32>
    %159 = arith.mulf %157, %158 : vector<128x32xf32>
    %c0_52 = arith.constant 0 : index
    %c0_53 = arith.constant 0 : index
    %160 = vector.load %arg6[%c0_52, %c0_53] : memref<1x32xf32, #tpu.memory_space<vmem>>, vector<1x32xf32>
    %161 = vector.broadcast %160 : vector<1x32xf32> to vector<128x32xf32>
    %162 = arith.addf %159, %161 : vector<128x32xf32>
    %163 = vector.extract_strided_slice %162 {offsets = [0, 0], sizes = [8, 32], strides = [1, 1]} : vector<128x32xf32> to vector<8x32xf32>
    %c0_54 = arith.constant 0 : index
    %c0_55 = arith.constant 0 : index
    %164 = vector.load %arg13[%c0_54, %c0_55] : memref<8x512xf32, #tpu.memory_space<vmem>>, vector<8x32xf32>
    tpu.vector_store %arg13[%c0_54, %c0_55], %163 {strides = array<i32>} : memref<8x512xf32, #tpu.memory_space<vmem>>, vector<8x32xf32>,
    %165 = vector.extract_strided_slice %162 {offsets = [8, 0], sizes = [8, 32], strides = [1, 1]} : vector<128x32xf32> to vector<8x32xf32>
    %c0_56 = arith.constant 0 : index
    %c32 = arith.constant 32 : index
    %166 = vector.load %arg13[%c0_56, %c32] : memref<8x512xf32, #tpu.memory_space<vmem>>, vector<8x32xf32>
    tpu.vector_store %arg13[%c0_56, %c32], %165 {strides = array<i32>} : memref<8x512xf32, #tpu.memory_space<vmem>>, vector<8x32xf32>,
    %167 = vector.extract_strided_slice %162 {offsets = [16, 0], sizes = [8, 32], strides = [1, 1]} : vector<128x32xf32> to vector<8x32xf32>
    %c0_57 = arith.constant 0 : index
    %c64 = arith.constant 64 : index
    %168 = vector.load %arg13[%c0_57, %c64] : memref<8x512xf32, #tpu.memory_space<vmem>>, vector<8x32xf32>
    tpu.vector_store %arg13[%c0_57, %c64], %167 {strides = array<i32>} : memref<8x512xf32, #tpu.memory_space<vmem>>, vector<8x32xf32>,
    %169 = vector.extract_strided_slice %162 {offsets = [24, 0], sizes = [8, 32], strides = [1, 1]} : vector<128x32xf32> to vector<8x32xf32>
    %c0_58 = arith.constant 0 : index
    %c96 = arith.constant 96 : index
    %170 = vector.load %arg13[%c0_58, %c96] : memref<8x512xf32, #tpu.memory_space<vmem>>, vector<8x32xf32>
    tpu.vector_store %arg13[%c0_58, %c96], %169 {strides = array<i32>} : memref<8x512xf32, #tpu.memory_space<vmem>>, vector<8x32xf32>,
    %171 = vector.extract_strided_slice %162 {offsets = [32, 0], sizes = [8, 32], strides = [1, 1]} : vector<128x32xf32> to vector<8x32xf32>
    %c0_59 = arith.constant 0 : index
    %c128 = arith.constant 128 : index
    %172 = vector.load %arg13[%c0_59, %c128] : memref<8x512xf32, #tpu.memory_space<vmem>>, vector<8x32xf32>
    tpu.vector_store %arg13[%c0_59, %c128], %171 {strides = array<i32>} : memref<8x512xf32, #tpu.memory_space<vmem>>, vector<8x32xf32>,
    %173 = vector.extract_strided_slice %162 {offsets = [40, 0], sizes = [8, 32], strides = [1, 1]} : vector<128x32xf32> to vector<8x32xf32>
    %c0_60 = arith.constant 0 : index
    %c160 = arith.constant 160 : index
    %174 = vector.load %arg13[%c0_60, %c160] : memref<8x512xf32, #tpu.memory_space<vmem>>, vector<8x32xf32>
    tpu.vector_store %arg13[%c0_60, %c160], %173 {strides = array<i32>} : memref<8x512xf32, #tpu.memory_space<vmem>>, vector<8x32xf32>,
    %175 = vector.extract_strided_slice %162 {offsets = [48, 0], sizes = [8, 32], strides = [1, 1]} : vector<128x32xf32> to vector<8x32xf32>
    %c0_61 = arith.constant 0 : index
    %c192 = arith.constant 192 : index
    %176 = vector.load %arg13[%c0_61, %c192] : memref<8x512xf32, #tpu.memory_space<vmem>>, vector<8x32xf32>
    tpu.vector_store %arg13[%c0_61, %c192], %175 {strides = array<i32>} : memref<8x512xf32, #tpu.memory_space<vmem>>, vector<8x32xf32>,
    %177 = vector.extract_strided_slice %162 {offsets = [56, 0], sizes = [8, 32], strides = [1, 1]} : vector<128x32xf32> to vector<8x32xf32>
    %c0_62 = arith.constant 0 : index
    %c224 = arith.constant 224 : index
    %178 = vector.load %arg13[%c0_62, %c224] : memref<8x512xf32, #tpu.memory_space<vmem>>, vector<8x32xf32>
    tpu.vector_store %arg13[%c0_62, %c224], %177 {strides = array<i32>} : memref<8x512xf32, #tpu.memory_space<vmem>>, vector<8x32xf32>,
    %179 = vector.extract_strided_slice %162 {offsets = [64, 0], sizes = [8, 32], strides = [1, 1]} : vector<128x32xf32> to vector<8x32xf32>
    %c0_63 = arith.constant 0 : index
    %c256 = arith.constant 256 : index
    %180 = vector.load %arg13[%c0_63, %c256] : memref<8x512xf32, #tpu.memory_space<vmem>>, vector<8x32xf32>
    tpu.vector_store %arg13[%c0_63, %c256], %179 {strides = array<i32>} : memref<8x512xf32, #tpu.memory_space<vmem>>, vector<8x32xf32>,
    %181 = vector.extract_strided_slice %162 {offsets = [72, 0], sizes = [8, 32], strides = [1, 1]} : vector<128x32xf32> to vector<8x32xf32>
    %c0_64 = arith.constant 0 : index
    %c288 = arith.constant 288 : index
    %182 = vector.load %arg13[%c0_64, %c288] : memref<8x512xf32, #tpu.memory_space<vmem>>, vector<8x32xf32>
    tpu.vector_store %arg13[%c0_64, %c288], %181 {strides = array<i32>} : memref<8x512xf32, #tpu.memory_space<vmem>>, vector<8x32xf32>,
    %183 = vector.extract_strided_slice %162 {offsets = [80, 0], sizes = [8, 32], strides = [1, 1]} : vector<128x32xf32> to vector<8x32xf32>
    %c0_65 = arith.constant 0 : index
    %c320 = arith.constant 320 : index
    %184 = vector.load %arg13[%c0_65, %c320] : memref<8x512xf32, #tpu.memory_space<vmem>>, vector<8x32xf32>
    tpu.vector_store %arg13[%c0_65, %c320], %183 {strides = array<i32>} : memref<8x512xf32, #tpu.memory_space<vmem>>, vector<8x32xf32>,
    %185 = vector.extract_strided_slice %162 {offsets = [88, 0], sizes = [8, 32], strides = [1, 1]} : vector<128x32xf32> to vector<8x32xf32>
    %c0_66 = arith.constant 0 : index
    %c352 = arith.constant 352 : index
    %186 = vector.load %arg13[%c0_66, %c352] : memref<8x512xf32, #tpu.memory_space<vmem>>, vector<8x32xf32>
    tpu.vector_store %arg13[%c0_66, %c352], %185 {strides = array<i32>} : memref<8x512xf32, #tpu.memory_space<vmem>>, vector<8x32xf32>,
    %187 = vector.extract_strided_slice %162 {offsets = [96, 0], sizes = [8, 32], strides = [1, 1]} : vector<128x32xf32> to vector<8x32xf32>
    %c0_67 = arith.constant 0 : index
    %c384 = arith.constant 384 : index
    %188 = vector.load %arg13[%c0_67, %c384] : memref<8x512xf32, #tpu.memory_space<vmem>>, vector<8x32xf32>
    tpu.vector_store %arg13[%c0_67, %c384], %187 {strides = array<i32>} : memref<8x512xf32, #tpu.memory_space<vmem>>, vector<8x32xf32>,
    %189 = vector.extract_strided_slice %162 {offsets = [104, 0], sizes = [8, 32], strides = [1, 1]} : vector<128x32xf32> to vector<8x32xf32>
    %c0_68 = arith.constant 0 : index
    %c416 = arith.constant 416 : index
    %190 = vector.load %arg13[%c0_68, %c416] : memref<8x512xf32, #tpu.memory_space<vmem>>, vector<8x32xf32>
    tpu.vector_store %arg13[%c0_68, %c416], %189 {strides = array<i32>} : memref<8x512xf32, #tpu.memory_space<vmem>>, vector<8x32xf32>,
    %191 = vector.extract_strided_slice %162 {offsets = [112, 0], sizes = [8, 32], strides = [1, 1]} : vector<128x32xf32> to vector<8x32xf32>
    %c0_69 = arith.constant 0 : index
    %c448 = arith.constant 448 : index
    %192 = vector.load %arg13[%c0_69, %c448] : memref<8x512xf32, #tpu.memory_space<vmem>>, vector<8x32xf32>
    tpu.vector_store %arg13[%c0_69, %c448], %191 {strides = array<i32>} : memref<8x512xf32, #tpu.memory_space<vmem>>, vector<8x32xf32>,
    %193 = vector.extract_strided_slice %162 {offsets = [120, 0], sizes = [8, 32], strides = [1, 1]} : vector<128x32xf32> to vector<8x32xf32>
    %c0_70 = arith.constant 0 : index
    %c480 = arith.constant 480 : index
    %194 = vector.load %arg13[%c0_70, %c480] : memref<8x512xf32, #tpu.memory_space<vmem>>, vector<8x32xf32>
    tpu.vector_store %arg13[%c0_70, %c480], %193 {strides = array<i32>} : memref<8x512xf32, #tpu.memory_space<vmem>>, vector<8x32xf32>,
    %c0_71 = arith.constant 0 : index
    %c0_72 = arith.constant 0 : index
    %195 = vector.load %arg13[%c0_71, %c0_72] : memref<8x512xf32, #tpu.memory_space<vmem>>, vector<8x512xf32>
    %196 = arith.truncf %195 : vector<8x512xf32> to vector<8x512xbf16>
    %c0_73 = arith.constant 0 : index
    %c0_74 = arith.constant 0 : index
    %197 = vector.load %arg7[%c0_73, %c0_74] : memref<512x128xbf16, #tpu.memory_space<vmem>>, vector<512x128xbf16>
    %cst_75 = arith.constant dense<0.000000e+00> : vector<8x128xf32>
    %198 = tpu.matmul %196, %197, %cst_75 {dimension_numbers = #tpu.dot_dimension_numbers<[1], [0], [0], [1], [0, 0, 1, 1], [], []>} : vector<8x512xbf16>, vector<512x128xbf16>, vector<8x128xf32> -> vector<8x128xf32>
    %c0_76 = arith.constant 0 : index
    %c0_77 = arith.constant 0 : index
    %199 = vector.load %arg8[%c0_76, %c0_77] : memref<1x128xf32, #tpu.memory_space<vmem>>, vector<1x128xf32>
    %200 = vector.broadcast %199 : vector<1x128xf32> to vector<8x128xf32>
    %201 = arith.addf %198, %200 : vector<8x128xf32>
    %cst_78 = arith.constant 0.000000e+00 : f32
    %202 = vector.broadcast %cst_78 : f32 to vector<8x128xf32>
    %203 = arith.cmpf ogt, %201, %202 : vector<8x128xf32>
    %cst_79 = arith.constant 0.000000e+00 : f32
    %204 = vector.broadcast %cst_79 : f32 to vector<8x128xf32>
    %205 = arith.minimumf %201, %204 : vector<8x128xf32>
    %206 = math.exp %205 : vector<8x128xf32>
    %cst_80 = arith.constant 1.000000e+00 : f32
    %207 = vector.broadcast %cst_80 : f32 to vector<8x128xf32>
    %208 = arith.subf %206, %207 : vector<8x128xf32>
    %209 = arith.select %203, %201, %208 : vector<8x128xi1>, vector<8x128xf32>
    %210 = arith.truncf %209 : vector<8x128xf32> to vector<8x128xbf16>
    %c0_81 = arith.constant 0 : index
    %c0_82 = arith.constant 0 : index
    %211 = vector.load %arg9[%c0_81, %c0_82] : memref<128x128xbf16, #tpu.memory_space<vmem>>, vector<128x128xbf16>
    %cst_83 = arith.constant dense<0.000000e+00> : vector<8x128xf32>
    %212 = tpu.matmul %210, %211, %cst_83 {dimension_numbers = #tpu.dot_dimension_numbers<[1], [0], [0], [1], [0, 0, 1, 1], [], []>} : vector<8x128xbf16>, vector<128x128xbf16>, vector<8x128xf32> -> vector<8x128xf32>
    %c0_84 = arith.constant 0 : index
    %c0_85 = arith.constant 0 : index
    %213 = vector.load %arg10[%c0_84, %c0_85] : memref<1x128xf32, #tpu.memory_space<vmem>>, vector<1x128xf32>
    %214 = vector.broadcast %213 : vector<1x128xf32> to vector<8x128xf32>
    %215 = arith.addf %212, %214 : vector<8x128xf32>
    %c0_86 = arith.constant 0 : index
    %c0_87 = arith.constant 0 : index
    %216 = vector.load %arg11[%c0_86, %c0_87] : memref<8x128xf32, #tpu.memory_space<vmem>>, vector<8x128xf32>
    tpu.vector_store %arg11[%c0_86, %c0_87], %215 {strides = array<i32>} : memref<8x128xf32, #tpu.memory_space<vmem>>, vector<8x128xf32>,
    return
  }
  func.func @transform_0(%arg0: i32) -> (i32, i32) {
    %c0_i32 = arith.constant 0 : i32
    %c0_i32_0 = arith.constant 0 : i32
    return %arg0, %c0_i32 : i32, i32
  }
  func.func @transform_1(%arg0: i32) -> (i32, i32) {
    %c0_i32 = arith.constant 0 : i32
    %c0_i32_0 = arith.constant 0 : i32
    return %arg0, %c0_i32 : i32, i32
  }
  func.func @transform_2(%arg0: i32) -> (i32, i32) {
    %c0_i32 = arith.constant 0 : i32
    %c0_i32_0 = arith.constant 0 : i32
    %c0_i32_1 = arith.constant 0 : i32
    return %c0_i32, %c0_i32_0 : i32, i32
  }
  func.func @transform_3(%arg0: i32) -> (i32, i32) {
    %c0_i32 = arith.constant 0 : i32
    %c0_i32_0 = arith.constant 0 : i32
    %c0_i32_1 = arith.constant 0 : i32
    return %c0_i32, %c0_i32_0 : i32, i32
  }
  func.func @transform_4(%arg0: i32) -> (i32, i32) {
    %c0_i32 = arith.constant 0 : i32
    %c0_i32_0 = arith.constant 0 : i32
    %c0_i32_1 = arith.constant 0 : i32
    return %c0_i32, %c0_i32_0 : i32, i32
  }
  func.func @transform_5(%arg0: i32) -> (i32, i32) {
    %c0_i32 = arith.constant 0 : i32
    %c0_i32_0 = arith.constant 0 : i32
    %c0_i32_1 = arith.constant 0 : i32
    return %c0_i32, %c0_i32_0 : i32, i32
  }
  func.func @transform_6(%arg0: i32) -> (i32, i32) {
    %c0_i32 = arith.constant 0 : i32
    %c0_i32_0 = arith.constant 0 : i32
    %c0_i32_1 = arith.constant 0 : i32
    return %c0_i32, %c0_i32_0 : i32, i32
  }
  func.func @transform_7(%arg0: i32) -> (i32, i32) {
    %c0_i32 = arith.constant 0 : i32
    %c0_i32_0 = arith.constant 0 : i32
    %c0_i32_1 = arith.constant 0 : i32
    return %c0_i32, %c0_i32_0 : i32, i32
  }
  func.func @transform_8(%arg0: i32) -> (i32, i32) {
    %c0_i32 = arith.constant 0 : i32
    %c0_i32_0 = arith.constant 0 : i32
    %c0_i32_1 = arith.constant 0 : i32
    return %c0_i32, %c0_i32_0 : i32, i32
  }
  func.func @transform_9(%arg0: i32) -> (i32, i32) {
    %c0_i32 = arith.constant 0 : i32
    %c0_i32_0 = arith.constant 0 : i32
    %c0_i32_1 = arith.constant 0 : i32
    return %c0_i32, %c0_i32_0 : i32, i32
  }
  func.func @transform_10(%arg0: i32) -> (i32, i32) {
    %c0_i32 = arith.constant 0 : i32
    %c0_i32_0 = arith.constant 0 : i32
    return %arg0, %c0_i32 : i32, i32
  }
}

</mosaic_0001>

<bundles_post_ra>
// kernel: tpu_custom_call.1
= control target key start
LH: loop header
LB: loop body
LE: loop exit
PB: predicated region body
PF: predicated region fallthrough
CT: control target
= control target key end

     0   :  { %15 = vsyncpa [#allocation5], 0  ;;  %s7459_s0 = inlined_call_operand.vmem [shape: bf16[256,16], index: 0, kind: input, shape index: {}]   ;;  %s7460_s1 = inlined_call_operand.vmem [shape: s8[256,128], index: 1, kind: input, shape index: {}]   ;;  %s7461_s2 = inlined_call_operand.hbm [shape: bf16[16,40], index: 2, kind: input, shape index: {}]   ;;  %s7462_s3 = inlined_call_operand.vmem [shape: f32[1,32], index: 3, kind: input, shape index: {}]   ;;  %s7463_s4 = inlined_call_operand.vmem [shape: bf16[32,34], index: 4, kind: input, shape index: {}]   ;;  %s7464_s5 = inlined_call_operand.vmem [shape: f32[1,32], index: 5, kind: input, shape index: {}]   ;;  %s7465_s6 = inlined_call_operand.hbm [shape: bf16[512,128], index: 6, kind: input, shape index: {}]   ;;  %s7466_s7 = inlined_call_operand.vmem [shape: f32[1,128], index: 7, kind: input, shape index: {}]   ;;  %s7467_s8 = inlined_call_operand.vmem [shape: bf16[128,128], index: 8, kind: input, shape index: {}]   ;;  %s7468_s9 = inlined_call_operand.vmem [shape: f32[1,128], index: 9, kind: input, shape index: {}]   ;;  %s7469_s10 = inlined_call_operand.hbm [shape: f32[16,128], index: 10, kind: output, shape index: {}]  }
   0x1   :  { %16 = vsyncpa [#allocation8], 0 }
   0x2   :  { %17 = vsyncpa [#allocation6], 0 }
   0x3   :  { %19 = vsyncpa [#allocation6 + $0x1], 0  ;;  %s5340_s13 = smov 0   ;;  %s5342_s14 = smov 0  }
   0x4   :  { %s5344_s15 = smov 0   ;;  %s5346_s16 = smov 0  }
   0x5 LB: > { %7558 = sst [smem:[#allocation13_spill]] %s5258_s15  ;;  %s5361_s17 = sadd.s32 4294967295, %s5262_s16   ;;  %s5262_s16 = sphi %s5346_s16, %s7777_s16   ;;  %s5258_s15 = sphi %s5344_s15, %s7779_s15   ;;  %s5254_s14 = sphi %s5342_s14, %s7781_s14   ;;  %s5250_s13 = sphi %s5340_s13, %s7780_s13  }
   0x6   : > { %s4116_s18 = sadd.s32 4294967294, %s5262_s16   ;;  %s5365_s19 = sadd.s32 1, %s5262_s16  }
   0x7   : > { %7559 = sst [smem:[#allocation14_spill]] %s5365_s19  ;;  %s252_s20 = sadd.s32 1, %s5258_s15 }
   0x8   : > { %s249_s21 = ssub.s32 %s5262_s16, %s5365_s19  ;;  %p262_p0 = scmp.ne.s32.totalorder %s5258_s15, %s5254_s14 }
   0x9   : > { %p250_p1 = scmp.eq.s32.totalorder %s249_s21, 0  ;;  %p263_p2 = scmp.eq.s32.totalorder %s5361_s17, 1 }
   0xa   : > { %p268_p3 = scmp.ne.s32.totalorder %s5254_s14, %s5250_s13  ;;  %p269_p4 = scmp.eq.s32.totalorder %s4116_s18, 1 }
   0xb   : > { %s5376_s22 = scalar_select %p250_p1, %s5258_s15, %s252_s20  }
   0xc   : > { %p5378_p5 = por %p263_p2, %p262_p0  ;;  %p5382_p6 = por %p269_p4, %p268_p3 }
   0xd   : > { %7560 = sst [smem:[#allocation15_spill]] %s5376_s22  ;;  %p4117_p7 = scmp.ge.s32.totalorder %s5262_s16, 1 }
   0xe   : > { %s7561_s23 = scalar_select %p5378_p5, 1, 0 }
   0xf   : > { %s7562_s24 = scalar_select %p5382_p6, 1, 0 }
  0x10   : > { %p276_p8 = scmp.lt.s32.totalorder %s5262_s16, 3  ;;  %p7470_p9 = scmp.eq.s32.totalorder %s5361_s17, 0 }
  0x11   : > { %7563 = sst [smem:[#allocation16_spill]] %s7562_s24  ;;  %s5264_s26 = smov [#allocation4]  }
  0x12   : > { %p5389_p10 = pnand %p4117_p7, %p276_p8  ;;  %s288_s27 = sshll.u32 %s5264_s26, 4  ;;  %s289_s27 = int_to_ptr.vmem [resolvable:$true] %s288_s27 }
  0x13   : > { %s5265_s29 = smov [#allocation7]   ;;  %s5136_s18 = scalar_lea.hbm %s7461_s2, 128 }
  0x14   : > { %s7564_s25 = scalar_select %p5389_p10, 1, 0 }
  0x15   : > { %p4601_p11 = pneg %p5389_p10  ;;  %s310_s30 = sshll.u32 %s5265_s29, 4  ;;  %s5401_s30 = int_to_ptr.vmem [resolvable:$true] %s310_s30 }
  0x16   : > { %p5137_p13 = scmp.ne.s32.totalorder %s7461_s2, %s5136_s18  ;;  %p5143_p3 = scmp.lt.u32.totalorder %s5136_s18, %s7461_s2 }
  0x17   : > { %p5397_p12 = pnand %p7470_p9, %p4601_p11 }
  0x19   : > { %p5138_p0 = pneg %p5397_p12 }
  0x1b   : > { %p5139_p1 = pnand %p5138_p0, %p5137_p13 }
  0x1d   : > { %p5140_p2 = pneg %p5139_p1 }
  0x1f   : > { %p5145_p4 = pnand %p5143_p3, %p5140_p2 }
  0x21   : > { %5148 = shalt.err (!%p5145_p4)
}
  0x22   : > { %s5149_s29 = scalar_lea.vmem %s289_s27, 128  ;;  %p5157_p9 = scmp.lt.s32.totalorder %s289_s27, %s289_s27 }
  0x23   : > { %p5150_p7 = scmp.ne.s32.totalorder %s289_s27, %s5149_s29  ;;  %p5158_p6 = scmp.lt.s32.totalorder %s5149_s29, %s5149_s29 }
  0x25   : > { %p5152_p8 = pnand %p5150_p7, %p5138_p0  ;;  %p5159_p5 = por %p5158_p6, %p5157_p9 }
  0x27   : > { %p5153_p11 = pneg %p5152_p8 }
  0x29   : > { %p5160_p10 = pnand %p5159_p5, %p5153_p11 }
  0x2b   : > { %5163 = shalt.err (!%p5160_p10)
}
  0x2c   : > { %s5266_s11 = smov 64   ;;  %s5267_s12 = smov 4  }
  0x2d   : > { %4604 = dma.hbm_to_vmem [thread:$0]  (!%p5397_p12), %s7461_s2, 128, %s289_s27, [#allocation5], %s5266_s11, %s5266_s11, %s5267_s12  }
  0x2e   : > { %s5164_s26 = scalar_lea.hbm %s7465_s6, 4096 }
  0x2f   : > { %p5165_p13 = scmp.ne.s32.totalorder %s7465_s6, %s5164_s26  ;;  %p5171_p9 = scmp.lt.u32.totalorder %s5164_s26, %s7465_s6 }
  0x31   : > { %p5167_p5 = pnand %p5165_p13, %p5138_p0 }
  0x33   : > { %p5168_p6 = pneg %p5167_p5 }
  0x35   : > { %p5173_p10 = pnand %p5171_p9, %p5168_p6 }
  0x37   : > { %5176 = shalt.err (!%p5173_p10)
}
  0x38   : > { %s5177_s27 = scalar_lea.vmem %s5401_s30, 4096  ;;  %p5185_p4 = scmp.lt.s32.totalorder %s5401_s30, %s5401_s30 }
  0x39   : > { %p5178_p1 = scmp.ne.s32.totalorder %s5401_s30, %s5177_s27  ;;  %p5186_p7 = scmp.lt.s32.totalorder %s5177_s27, %s5177_s27 }
  0x3b   : > { %p5180_p2 = pnand %p5178_p1, %p5138_p0  ;;  %p5187_p8 = por %p5186_p7, %p5185_p4 }
  0x3d   : > { %p5181_p3 = pneg %p5180_p2 }
  0x3f   : > { %p5188_p11 = pnand %p5187_p8, %p5181_p3 }
  0x41   : > { %5191 = shalt.err (!%p5188_p11)
}
  0x42   : > { %4607 = dma.hbm_to_vmem [thread:$0]  (!%p5397_p12), %s7465_s6, 4096, %s5401_s30, [#allocation8], %s5266_s11, %s5266_s11, %s5267_s12  }
  0x43   : > { %p7566_p13 = scmp.ne.s32.totalorder %s7564_s25, 0 }
  0x45   : > { %353 = sbr.rel (%p7566_p13) target bundleno = 3443 (0xd73), region = 60 }
  0x4c   : > { %p7567_p5 = scmp.eq.s32.totalorder %s5361_s17, 0 }
  0x4e   : > { %5237 = dma.done.wait (%p7567_p5), [#allocation5], 128   ;;  %p7568_p0 = pmov %p7567_p5 }
  0x50   : > { %5239 = vsyncadd (%p7568_p0), [#allocation5], 4294967168  ;;  %p7569_p6 = pmov %p7568_p0 }
  0x51   : > { %p7570_p9 = pmov %p7568_p0 }
  0x52   : > { %5241 = dma.done.wait (%p7569_p6), [#allocation8], 4096  }
  0x53   : > { %5243 = vsyncadd (%p7570_p9), [#allocation8], 4294963200  ;;  %s4125_s24 = sshll.u32 %s5361_s17, 4  ;;  %v4731_v0 = vld [vmem:[#allocation4] sm:$0xff]   ;;  %vm529_vm0 = vcmask 130048   ;;  %v5268_v9 = vmov 36  }
  0x54   : > { %p401_p10 = scmp.lt.s32.totalorder %s4125_s24, 31  ;;  %4373 = vmatprep.subr.bf16.mxu0 %v4731_v0  ;;  %4669 = vset.pattern.permute.xlu1 %v5268_v9  ;;  %s5269_s12 = smov 96   ;;  %v5270_v17 = vmov 37   ;;  %v5271_v23 = vmov 38   ;;  %v5272_v27 = vmov 39  }
  0x55   : > { %4374 = vmatpush3.bf16.msra.mxu0 %v4731_v0  ;;  %4673 = vset.pattern.permute.xlu0 %v5268_v9  ;;  %s5273_s22 = smov 120   ;;  %s4127_s18 = sshll.u32 %s5361_s17, 2 }
  0x56   : > { %s7783_s24 = smov (!%p401_p10, %s4125_s24), 31  ;;  %p407_p12 = scmp.lt.s32.totalorder %s4127_s18, 7 }
  0x57   : > { %s4126_s28 = sshll.u32 %s7783_s24, 2  ;;  %s5274_s27 = smov 112  }
  0x58   : > { %s404_s11 = scalar_lea.vmem %s7459_s0, %s4126_s28  ;;  %s7785_s18 = smov (!%p407_p12, %s4127_s18), 7 }
  0x59   : > { %v4732_v1 = vld [vmem:[%s404_s11] sm:$0xff]   ;;  %v4733_v2 = vld [vmem:[%s404_s11 + $0x8] sm:$0xff]   ;;  %v4734_v3 = vld [vmem:[%s404_s11 + $0x10] sm:$0xff]   ;;  %s4128_s20 = sshll.u32 %s7785_s18, 3  ;;  %s5275_s15 = smov 104  }
  0x5a   : > { %4375 = vmatprep.mubr.msk.bf16.mxu0 %vm529_vm0, %v4732_v1  ;;  %v4735_v4 = vld [vmem:[%s404_s11 + $0x18] sm:$0xff]   ;;  %v4736_v5 = vld [vmem:[%s404_s11 + $0x20] sm:$0xff]   ;;  %v4737_v6 = vld [vmem:[%s404_s11 + $0x28] sm:$0xff]   ;;  %s5849_s29 = scalar_lea.vmem %s7460_s1, %s4128_s20  ;;  %s5276_s19 = smov 8  }
  0x5b   : > { %4376 = vmatmul.mubr.msk.bf16.vlgmr.msra.gmra.mrb[0].mxu0 %vm529_vm0, %v4733_v2  ;;  %v4738_v7 = vld [vmem:[%s404_s11 + $0x30] sm:$0xff]   ;;  %v4739_v8 = vld [vmem:[%s404_s11 + $0x38] sm:$0xff]   ;;  %s5277_s24 = smov 16   ;;  %s5278_s28 = smov 24  }
  0x5c   : > { %4379 = vmatprep.mubr.msk.bf16.mxu0 %vm529_vm0, %v4734_v3  ;;  %s4218_s11 = sshll.u32 %s5361_s17, 7  ;;  %p7774_p2 = scmp.ne.s32.totalorder %s7561_s23, 0 }
  0x5d   : > { %s7417_s26 = scalar_lea.hbm %s7469_s10, %s4218_s11 }
  0x63   : > { %4380 = vmatmul.mubr.msk.bf16.gmra.mrb[4].mxu0 %vm529_vm0, %v4735_v4 }
  0x64   : > { %4383 = vmatprep.mubr.msk.bf16.mxu0 %vm529_vm0, %v4736_v5 }
  0x6b   : > { %4384 = vmatmul.mubr.msk.bf16.gmra.mrb[8].mxu0 %vm529_vm0, %v4737_v6 }
  0x6c   : > { %4387 = vmatprep.mubr.msk.bf16.mxu0 %vm529_vm0, %v4738_v7 }
  0x73   : > { %4388 = vmatmul.mubr.msk.bf16.gmra.mrb[12].mxu0 %vm529_vm0, %v4739_v8 }
 0x12e   : > { %v4377_v10 = vpop.f32.mrb[0].mxu0 }
 0x12f   : > { %679 = vrot.lane.b32.xlu1 %v4377_v10, %s5269_s12  ;;  %v5475_v11 = vpop.f32.mrb[1].mxu0 }
 0x130   : > { %675 = vrot.lane.b32.xlu0 %v5475_v11, %s5269_s12  ;;  %v5479_v12 = vpop.f32.mrb[2].mxu0 }
 0x131   : > { %v5482_v13 = vpack.c.bf16 %v5479_v12, %v4377_v10  ;;  %v5484_v14 = vpop.f32.mrb[3].mxu0 }
 0x132   : > { %v5488_v15 = vpack.c.bf16 %v5484_v14, %v5475_v11 }
 0x133   : > { %7571 = vst [vmem:[#allocation17_spill] sm:$0xff] %v5482_v13  ;;  %764 = vperm.xlu1 %4669, %v4377_v10  }
 0x134   : > { %7572 = vst [vmem:[#allocation18_spill] sm:$0xff] %v5488_v15  ;;  %756 = vperm.xlu0 %4673, %v5475_v11   ;;  %4391 = vmatprep.subr.bf16.mxu1 %v5488_v15 }
 0x135   : > { %4392 = vmatpush3.bf16.msra.mxu1 %v5488_v15 }
 0x136   : > { %4393 = vmatprep.subr.bf16.mxu1 %v5482_v13  ;;  %v5494_v16 = vpop.f32.mrb[4].mxu0 }
 0x137   : > { %4670 = vset.pattern.permute.xlu1 %v5270_v17  ;;  %v5497_v18 = vpop.f32.mrb[5].mxu0 }
 0x138   : > { %1178 = vperm.xlu1 %4670, %v4377_v10   ;;  %768 = vperm.xlu0 %4673, %v5479_v12   ;;  %v5500_v19 = vpop.f32.mrb[6].mxu0 }
 0x139   : > { %4394 = vmatpush3.bf16.msra.mxu1 %v5482_v13  ;;  %v5505_v20 = vpack.c.bf16 %v5500_v19, %v5494_v16  ;;  %v5507_v21 = vpop.f32.mrb[7].mxu0 }
 0x13a   : > { %v5511_v22 = vpack.c.bf16 %v5507_v21, %v5497_v18 }
 0x13b   : > { %7573 = vst [vmem:[#allocation19_spill] sm:$0xff] %v5505_v20 }
 0x13c   : > { %7574 = vst [vmem:[#allocation20_spill] sm:$0xff] %v5511_v22  ;;  %4671 = vset.pattern.permute.xlu1 %v5271_v23  ;;  %677 = vrot.lane.b32.xlu0 %v5484_v14, %s5269_s12 }
 0x13d   : > { %1688 = vperm.xlu1 %4671, %v4377_v10   ;;  %4681 = vset.pattern.permute.xlu0 %v5270_v17 }
 0x13e   : > { %v5517_v24 = vpop.f32.mrb[8].mxu0  ;;  %4395 = vmatprep.subr.bf16.mxu1 %v5511_v22 }
 0x13f   : > { %v5520_v25 = vpop.f32.mrb[9].mxu0  ;;  %4396 = vmatpush3.bf16.msra.mxu1 %v5511_v22 }
 0x140   : > { %1174 = vperm.xlu0 %4681, %v5484_v14   ;;  %v5524_v26 = vpop.f32.mrb[10].mxu0  ;;  %4397 = vmatprep.subr.bf16.mxu1 %v5505_v20 }
 0x141   : > { %4672 = vset.pattern.permute.xlu1 %v5272_v27  ;;  %v5530_v28 = vpack.c.bf16 %v5524_v26, %v5517_v24  ;;  %v5532_v29 = vpop.f32.mrb[11].mxu0 }
 0x142   : > { %2190 = vperm.xlu1 %4672, %v4377_v10   ;;  %v5536_v30 = vpack.c.bf16 %v5532_v29, %v5520_v25 }
 0x143   : > { %7575 = vst [vmem:[#allocation21_spill] sm:$0xff] %v5530_v28  ;;  %4398 = vmatpush3.bf16.msra.mxu1 %v5505_v20 }
 0x144   : > { %7576 = vst [vmem:[#allocation22_spill] sm:$0xff] %v5536_v30  ;;  %1479 = vrot.lane.b32.xlu0 %v5482_v13, %s5273_s22  ;;  %4399 = vmatprep.subr.bf16.mxu1 %v5536_v30 }
 0x145   : > { %4688 = vset.pattern.permute.xlu0 %v5268_v9 }
 0x146   : > { %4674 = vset.pattern.permute.xlu1 %v5270_v17  ;;  %v5544_v31 = vpop.f32.mrb[12].mxu0 }
 0x147   : > { %1170 = vperm.xlu1 %4674, %v5475_v11   ;;  %v5547_v32 = vpop.f32.mrb[13].mxu0  ;;  %4400 = vmatpush3.bf16.msra.mxu1 %v5536_v30 }
 0x148   : > { %687 = vrot.lane.b32.xlu0 %v5494_v16, %s5269_s12  ;;  %v5552_v33 = vpop.f32.mrb[14].mxu0  ;;  %4401 = vmatprep.subr.bf16.mxu1 %v5530_v28 }
 0x149   : > { %v5557_v34 = vpack.c.bf16 %v5552_v33, %v5544_v31  ;;  %v5559_v35 = vpop.f32.mrb[15].mxu0 }
 0x14a   : > { %v5563_v36 = vpack.c.bf16 %v5559_v35, %v5547_v32 }
 0x14b   : > { %7577 = vst [vmem:[#allocation23_spill] sm:$0xff] %v5557_v34  ;;  %4675 = vset.pattern.permute.xlu1 %v5271_v23  ;;  %4402 = vmatpush3.bf16.msra.mxu1 %v5530_v28 }
 0x14c   : > { %7578 = vst [vmem:[#allocation24_spill] sm:$0xff] %v5563_v36  ;;  %1680 = vperm.xlu1 %4675, %v5475_v11   ;;  %683 = vrot.lane.b32.xlu0 %v5497_v18, %s5269_s12 }
 0x14d   : > { %4403 = vmatprep.subr.bf16.mxu1 %v5563_v36 }
 0x14f   : > { %4404 = vmatpush3.bf16.msra.mxu1 %v5563_v36 }
 0x150   : > { %4676 = vset.pattern.permute.xlu1 %v5272_v27  ;;  %772 = vperm.xlu0 %4688, %v5497_v18  }
 0x151   : > { %2182 = vperm.xlu1 %4676, %v5475_v11   ;;  %4405 = vmatprep.subr.bf16.mxu1 %v5557_v34 }
 0x153   : > { %4406 = vmatpush3.bf16.msra.mxu1 %v5557_v34 }
 0x154   : > { %784 = vperm.xlu0 %4688, %v5500_v19  }
 0x155   : > { %681 = vrot.lane.b32.xlu1 %v5479_v12, %s5269_s12 }
 0x156   : > { %4677 = vset.pattern.permute.xlu1 %v5270_v17 }
 0x158   : > { %4696 = vset.pattern.permute.xlu0 %v5270_v17 }
 0x159   : > { %1182 = vperm.xlu1 %4677, %v5479_v12   ;;  %1190 = vperm.xlu0 %4696, %v5507_v21  }
 0x15d   : > { %4678 = vset.pattern.permute.xlu1 %v5271_v23  ;;  %1481 = vrot.lane.b32.xlu0 %v5511_v22, %s5273_s22 }
 0x15e   : > { %1692 = vperm.xlu1 %4678, %v5479_v12   ;;  %4703 = vset.pattern.permute.xlu0 %v5268_v9 }
 0x161   : > { %695 = vrot.lane.b32.xlu0 %v5517_v24, %s5269_s12 }
 0x162   : > { %4679 = vset.pattern.permute.xlu1 %v5272_v27 }
 0x163   : > { %2194 = vperm.xlu1 %4679, %v5479_v12  }
 0x165   : > { %691 = vrot.lane.b32.xlu0 %v5520_v25, %s5269_s12 }
 0x167   : > { %4680 = vset.pattern.permute.xlu1 %v5268_v9 }
 0x168   : > { %760 = vperm.xlu1 %4680, %v5484_v14  }
 0x169   : > { %788 = vperm.xlu0 %4703, %v5520_v25  }
 0x16c   : > { %4682 = vset.pattern.permute.xlu1 %v5271_v23 }
 0x16d   : > { %1684 = vperm.xlu1 %4682, %v5484_v14   ;;  %800 = vperm.xlu0 %4703, %v5524_v26  }
 0x171   : > { %4683 = vset.pattern.permute.xlu1 %v5272_v27  ;;  %4709 = vset.pattern.permute.xlu0 %v5272_v27 }
 0x172   : > { %2186 = vperm.xlu1 %4683, %v5484_v14   ;;  %2226 = vperm.xlu0 %4709, %v5524_v26  }
 0x176   : > { %1477 = vrot.lane.b32.xlu1 %v5488_v15, %s5273_s22  ;;  %4711 = vset.pattern.permute.xlu0 %v5270_v17 }
 0x177   : > { %1206 = vperm.xlu0 %4711, %v5532_v29   ;;  %4684 = vset.pattern.permute.xlu1 %v5268_v9 }
 0x17a   : > { %780 = vperm.xlu1 %4684, %v5494_v16  }
 0x17b   : > { %703 = vrot.lane.b32.xlu0 %v5544_v31, %s5269_s12 }
 0x17c   : > { %4718 = vset.pattern.permute.xlu0 %v5268_v9 }
 0x17e   : > { %4685 = vset.pattern.permute.xlu1 %v5270_v17 }
 0x17f   : > { %1194 = vperm.xlu1 %4685, %v5494_v16   ;;  %699 = vrot.lane.b32.xlu0 %v5547_v32, %s5269_s12 }
 0x183   : > { %4686 = vset.pattern.permute.xlu1 %v5271_v23  ;;  %804 = vperm.xlu0 %4718, %v5547_v32  }
 0x184   : > { %1704 = vperm.xlu1 %4686, %v5494_v16  }
 0x187   : > { %816 = vperm.xlu0 %4718, %v5552_v33  }
 0x188   : > { %4687 = vset.pattern.permute.xlu1 %v5272_v27 }
 0x189   : > { %2206 = vperm.xlu1 %4687, %v5494_v16  }
 0x18b   : > { %4726 = vset.pattern.permute.xlu0 %v5270_v17 }
 0x18c   : > { %1222 = vperm.xlu0 %4726, %v5559_v35  }
 0x18d   : > { %4689 = vset.pattern.permute.xlu1 %v5270_v17 }
 0x18e   : > { %1186 = vperm.xlu1 %4689, %v5497_v18  }
 0x190   : > { %1485 = vrot.lane.b32.xlu0 %v5536_v30, %s5273_s22 }
 0x192   : > { %4690 = vset.pattern.permute.xlu1 %v5271_v23 }
 0x193   : > { %1696 = vperm.xlu1 %4690, %v5497_v18  }
 0x194   : > { %1487 = vrot.lane.b32.xlu0 %v5530_v28, %s5273_s22 }
 0x197   : > { %4691 = vset.pattern.permute.xlu1 %v5272_v27 }
 0x198   : > { %2198 = vperm.xlu1 %4691, %v5497_v18  }
 0x19c   : > { %689 = vrot.lane.b32.xlu1 %v5500_v19, %s5269_s12 }
 0x19d   : > { %4692 = vset.pattern.permute.xlu1 %v5270_v17 }
 0x1a0   : > { %1198 = vperm.xlu1 %4692, %v5500_v19  }
 0x1a1   : > { %v680_v37 = vpop.permute.xlu1 %679 }
 0x1a2   : > { %v676_v38 = vpop.permute.xlu0 %675 }
 0x1a4   : > { %4693 = vset.pattern.permute.xlu1 %v5271_v23 }
 0x1a5   : > { %1708 = vperm.xlu1 %4693, %v5500_v19  }
 0x1a9   : > { %4694 = vset.pattern.permute.xlu1 %v5272_v27 }
 0x1aa   : > { %2210 = vperm.xlu1 %4694, %v5500_v19  }
 0x1ae   : > { %685 = vrot.lane.b32.xlu1 %v5507_v21, %s5269_s12 }
 0x1af   : > { %4695 = vset.pattern.permute.xlu1 %v5268_v9 }
 0x1b2   : > { %v5647_v39 = vpop.permute.xlu1 %764  ;;  %776 = vperm.xlu1 %4695, %v5507_v21   ;;  %723 = vxpose.xlu0.b32.start [1/16] (narrow) %v676_v38, 8 }
 0x1b3   : > { %v5650_v40 = vpop.permute.xlu0 %756 }
 0x1b6   : > { %4697 = vset.pattern.permute.xlu1 %v5271_v23 }
 0x1b7   : > { %v5653_v41 = vpop.permute.xlu1 %1178  ;;  %v5655_v42 = vpop.permute.xlu0 %768  ;;  %1700 = vperm.xlu1 %4697, %v5507_v21  }
 0x1bb   : > { %v678_v43 = vpop.permute.xlu0 %677  ;;  %4698 = vset.pattern.permute.xlu1 %v5272_v27 }
 0x1bc   : > { %v5659_v44 = vpop.permute.xlu1 %1688  ;;  %2202 = vperm.xlu1 %4698, %v5507_v21   ;;  %724 = vxpose.xlu0.b32.cont [2/16] (narrow) %v678_v43, 8 }
 0x1bf   : > { %v5670_v47 = vpop.permute.xlu0 %1174 }
 0x1c0   : > { %4699 = vset.pattern.permute.xlu1 %v5268_v9  ;;  %725 = vxpose.xlu0.b32.cont [3/16] (narrow) %v680_v37, 8 }
 0x1c1   : > { %v5663_v45 = vpop.permute.xlu1 %2190  ;;  %796 = vperm.xlu1 %4699, %v5517_v24  }
 0x1c3   : > { %v1480_v49 = vpop.permute.xlu0 %1479 }
 0x1c5   : > { %4700 = vset.pattern.permute.xlu1 %v5270_v17 }
 0x1c6   : > { %v5667_v46 = vpop.permute.xlu1 %1170  ;;  %1210 = vperm.xlu1 %4700, %v5517_v24  }
 0x1c7   : > { %v5680_v51 = vpop.permute.xlu0 %687 }
 0x1ca   : > { %4701 = vset.pattern.permute.xlu1 %v5271_v23 }
 0x1cb   : > { %v5673_v48 = vpop.permute.xlu1 %1680  ;;  %1720 = vperm.xlu1 %4701, %v5517_v24   ;;  %v684_v54 = vpop.permute.xlu0 %683 }
 0x1cf   : > { %4702 = vset.pattern.permute.xlu1 %v5272_v27  ;;  %v5700_v58 = vpop.permute.xlu0 %772 }
 0x1d0   : > { %v5677_v50 = vpop.permute.xlu1 %2182  ;;  %2222 = vperm.xlu1 %4702, %v5517_v24  }
 0x1d3   : > { %v5706_v60 = vpop.permute.xlu0 %784 }
 0x1d4   : > { %v682_v52 = vpop.permute.xlu1 %681  ;;  %4704 = vset.pattern.permute.xlu1 %v5270_v17 }
 0x1d5   : > { %1202 = vperm.xlu1 %4704, %v5520_v25   ;;  %726 = vxpose.xlu0.b32.cont [4/16] (narrow) %v682_v52, 8 }
 0x1d8   : > { %v5684_v53 = vpop.permute.xlu1 %1182  ;;  %v5714_v62 = vpop.permute.xlu0 %1190 }
 0x1d9   : > { %4705 = vset.pattern.permute.xlu1 %v5271_v23  ;;  %727 = vxpose.xlu0.b32.cont [5/16] (narrow) %v684_v54, 8 }
 0x1da   : > { %1712 = vperm.xlu1 %4705, %v5520_v25  }
 0x1dc   : > { %v1482_v1 = vpop.permute.xlu0 %1481 }
 0x1dd   : > { %v5688_v55 = vpop.permute.xlu1 %1692 }
 0x1de   : > { %4706 = vset.pattern.permute.xlu1 %v5272_v27 }
 0x1df   : > { %2214 = vperm.xlu1 %4706, %v5520_v25  }
 0x1e0   : > { %v696_v18 = vpop.permute.xlu0 %695 }
 0x1e2   : > { %v5692_v56 = vpop.permute.xlu1 %2194 }
 0x1e3   : > { %697 = vrot.lane.b32.xlu1 %v5524_v26, %s5269_s12 }
 0x1e4   : > { %4707 = vset.pattern.permute.xlu1 %v5270_v17  ;;  %v692_v19 = vpop.permute.xlu0 %691 }
 0x1e7   : > { %v5697_v57 = vpop.permute.xlu1 %760  ;;  %1214 = vperm.xlu1 %4707, %v5524_v26  }
 0x1eb   : > { %4708 = vset.pattern.permute.xlu1 %v5271_v23 }
 0x1ec   : > { %v5703_v59 = vpop.permute.xlu1 %1684  ;;  %1724 = vperm.xlu1 %4708, %v5524_v26  }
 0x1f0   : > { %693 = vrot.lane.b32.xlu1 %v5532_v29, %s5269_s12 }
 0x1f1   : > { %v5710_v61 = vpop.permute.xlu1 %2186  ;;  %4710 = vset.pattern.permute.xlu1 %v5268_v9 }
 0x1f4   : > { %792 = vperm.xlu1 %4710, %v5532_v29  }
 0x1f5   : > { %v1478_v63 = vpop.permute.xlu1 %1477 }
 0x1f6   : > { %4423 = vmatprep.subr.bf16.mxu0 %v1478_v63 }
 0x1f7   : > { %4424 = vmatpush3.bf16.msra.mxu0 %v1478_v63 }
 0x1f8   : > { %4425 = vmatprep.subr.bf16.mxu0 %v1480_v49  ;;  %4712 = vset.pattern.permute.xlu1 %v5271_v23 }
 0x1f9   : > { %v5717_v0 = vpop.permute.xlu1 %780  ;;  %1716 = vperm.xlu1 %4712, %v5532_v29  }
 0x1fb   : > { %4426 = vmatpush3.bf16.msra.mxu0 %v1480_v49 }
 0x1fc   : > { %4427 = vmatprep.subr.bf16.mxu0 %v1482_v1 }
 0x1fd   : > { %4713 = vset.pattern.permute.xlu1 %v5272_v27 }
 0x1fe   : > { %v5721_v2 = vpop.permute.xlu1 %1194  ;;  %2218 = vperm.xlu1 %4713, %v5532_v29  }
 0x1ff   : > { %4428 = vmatpush3.bf16.msra.mxu0 %v1482_v1 }
 0x202   : > { %4714 = vset.pattern.permute.xlu1 %v5268_v9 }
 0x203   : > { %v5725_v3 = vpop.permute.xlu1 %1704  ;;  %812 = vperm.xlu1 %4714, %v5544_v31  }
 0x207   : > { %4715 = vset.pattern.permute.xlu1 %v5270_v17 }
 0x208   : > { %v5729_v4 = vpop.permute.xlu1 %2206  ;;  %1226 = vperm.xlu1 %4715, %v5544_v31  }
 0x209   : > { %7579 = vst [vmem:[#allocation25_spill] sm:$0xff] %v5729_v4  ;;  %v430_v4 = vld [vmem:[%s5849_s29 + $0x8] sm:$0xff] }
 0x20c   : > { %4716 = vset.pattern.permute.xlu1 %v5271_v23 }
 0x20d   : > { %v5733_v5 = vpop.permute.xlu1 %1186  ;;  %1736 = vperm.xlu1 %4716, %v5544_v31  }
 0x211   : > { %4717 = vset.pattern.permute.xlu1 %v5272_v27 }
 0x212   : > { %v5737_v6 = vpop.permute.xlu1 %1696  ;;  %2238 = vperm.xlu1 %4717, %v5544_v31   ;;  %v5793_v31 = vpop.permute.xlu0 %788 }
 0x216   : > { %4719 = vset.pattern.permute.xlu1 %v5270_v17 }
 0x217   : > { %v5741_v7 = vpop.permute.xlu1 %2198  ;;  %1218 = vperm.xlu1 %4719, %v5547_v32  }
 0x218   : > { %7580 = vst [vmem:[#allocation26_spill] sm:$0xff] %v5741_v7 }
 0x21b   : > { %v690_v8 = vpop.permute.xlu1 %689  ;;  %4720 = vset.pattern.permute.xlu1 %v5271_v23 }
 0x21c   : > { %1728 = vperm.xlu1 %4720, %v5547_v32  }
 0x21f   : > { %v5746_v10 = vpop.permute.xlu1 %1198 }
 0x220   : > { %4721 = vset.pattern.permute.xlu1 %v5272_v27 }
 0x221   : > { %2230 = vperm.xlu1 %4721, %v5547_v32  }
 0x224   : > { %v5750_v11 = vpop.permute.xlu1 %1708 }
 0x225   : > { %705 = vrot.lane.b32.xlu1 %v5552_v33, %s5269_s12 }
 0x226   : > { %4722 = vset.pattern.permute.xlu1 %v5270_v17 }
 0x229   : > { %v5755_v12 = vpop.permute.xlu1 %2210  ;;  %1230 = vperm.xlu1 %4722, %v5552_v33  }
 0x22a   : > { %7581 = vst [vmem:[#allocation27_spill] sm:$0xff] %v5755_v12 }
 0x22d   : > { %v686_v14 = vpop.permute.xlu1 %685  ;;  %4723 = vset.pattern.permute.xlu1 %v5271_v23 }
 0x22e   : > { %1740 = vperm.xlu1 %4723, %v5552_v33   ;;  %728 = vxpose.xlu0.b32.cont [6/16] (narrow) %v686_v14, 8 }
 0x231   : > { %v5760_v16 = vpop.permute.xlu1 %776 }
 0x232   : > { %4724 = vset.pattern.permute.xlu1 %v5272_v27  ;;  %729 = vxpose.xlu0.b32.cont [7/16] (narrow) %v5680_v51, 8 }
 0x233   : > { %2242 = vperm.xlu1 %4724, %v5552_v33   ;;  %v5797_v33 = vpop.permute.xlu0 %800 }
 0x236   : > { %v5765_v17 = vpop.permute.xlu1 %1700  ;;  %730 = vxpose.xlu0.b32.cont [8/16] (narrow) %v690_v8, 8 }
 0x237   : > { %701 = vrot.lane.b32.xlu1 %v5559_v35, %s5269_s12  ;;  %v5801_v37 = vpop.permute.xlu0 %2226 }
 0x238   : > { %4725 = vset.pattern.permute.xlu1 %v5268_v9  ;;  %7587 = vst [vmem:[#allocation33_spill] sm:$0xff] %v5801_v37 }
 0x23a   : > { %731 = vxpose.xlu0.b32.cont [9/16] (narrow) %v692_v19, 8 }
 0x23b   : > { %v5770_v21 = vpop.permute.xlu1 %2202  ;;  %808 = vperm.xlu1 %4725, %v5559_v35   ;;  %v5805_v43 = vpop.permute.xlu0 %1206 }
 0x23c   : > { %7582 = vst [vmem:[#allocation28_spill] sm:$0xff] %v5770_v21  ;;  %v437_v21 = vunpack.c.0.s8 %v430_v4 }
 0x23f   : > { %4727 = vset.pattern.permute.xlu1 %v5271_v23  ;;  %v704_v52 = vpop.permute.xlu0 %703 }
 0x240   : > { %v5774_v24 = vpop.permute.xlu1 %796  ;;  %1732 = vperm.xlu1 %4727, %v5559_v35  }
 0x243   : > { %v700_v63 = vpop.permute.xlu0 %699 }
 0x244   : > { %4728 = vset.pattern.permute.xlu1 %v5272_v27 }
 0x245   : > { %v5778_v25 = vpop.permute.xlu1 %1210  ;;  %2234 = vperm.xlu1 %4728, %v5559_v35  }
 0x247   : > { %v5833_v22 = vpop.permute.xlu0 %804 }
 0x249   : > { %1483 = vrot.lane.b32.xlu1 %v5505_v20, %s5273_s22 }
 0x24a   : > { %v5783_v9 = vpop.permute.xlu1 %1720 }
 0x24b   : > { %7583 = vst [vmem:[#allocation29_spill] sm:$0xff] %v5783_v9  ;;  %v5837_v15 = vpop.permute.xlu0 %816 }
 0x24d   : > { %1489 = vrot.lane.b32.xlu1 %v5563_v36, %s5273_s22 }
 0x24f   : > { %v5787_v26 = vpop.permute.xlu1 %2222 }
 0x250   : > { %7584 = vst [vmem:[#allocation30_spill] sm:$0xff] %v5787_v26 }
 0x254   : > { %v5789_v23 = vpop.permute.xlu1 %1202 }
 0x259   : > { %v5791_v29 = vpop.permute.xlu1 %1712 }
 0x25a   : > { %7585 = vst [vmem:[#allocation31_spill] sm:$0xff] %v5791_v29 }
 0x25e   : > { %v5795_v27 = vpop.permute.xlu1 %2214 }
 0x25f   : > { %7586 = vst [vmem:[#allocation32_spill] sm:$0xff] %v5795_v27 }
 0x262   : > { %v698_v32 = vpop.permute.xlu1 %697 }
 0x266   : > { %v5799_v35 = vpop.permute.xlu1 %1214 }
 0x26b   : > { %v5803_v38 = vpop.permute.xlu1 %1724 }
 0x26c   : > { %7588 = vst [vmem:[#allocation34_spill] sm:$0xff] %v5803_v38 }
 0x26f   : > { %v694_v49 = vpop.permute.xlu1 %693 }
 0x270   : > { %732 = vxpose.xlu0.b32.cont [10/16] (narrow) %v694_v49, 8 }
 0x273   : > { %v5807_v51 = vpop.permute.xlu1 %792 }
 0x274   : > { %733 = vxpose.xlu0.b32.cont [11/16] (narrow) %v696_v18, 8 }
 0x278   : > { %v5809_v54 = vpop.permute.xlu1 %1716  ;;  %734 = vxpose.xlu0.b32.cont [12/16] (narrow) %v698_v32, 8 }
 0x279   : > { %7589 = vst [vmem:[#allocation35_spill] sm:$0xff] %v5809_v54 }
 0x27c   : > { %735 = vxpose.xlu0.b32.cont [13/16] (narrow) %v700_v63, 8 }
 0x27d   : > { %v5811_v1 = vpop.permute.xlu1 %2218 }
 0x27e   : > { %7590 = vst [vmem:[#allocation36_spill] sm:$0xff] %v5811_v1 }
 0x282   : > { %v5813_v8 = vpop.permute.xlu1 %812 }
 0x287   : > { %v5815_v14 = vpop.permute.xlu1 %1226 }
 0x28c   : > { %v5817_v19 = vpop.permute.xlu1 %1736 }
 0x28d   : > { %7591 = vst [vmem:[#allocation37_spill] sm:$0xff] %v5817_v19 }
 0x291   : > { %v5819_v36 = vpop.permute.xlu1 %2238 }
 0x292   : > { %7592 = vst [vmem:[#allocation38_spill] sm:$0xff] %v5819_v36 }
 0x296   : > { %v5821_v49 = vpop.permute.xlu1 %1218 }
 0x29b   : > { %v5823_v28 = vpop.permute.xlu1 %1728 }
 0x29c   : > { %7593 = vst [vmem:[#allocation39_spill] sm:$0xff] %v5823_v28 }
 0x2a0   : > { %v5825_v18 = vpop.permute.xlu1 %2230 }
 0x2a1   : > { %7594 = vst [vmem:[#allocation40_spill] sm:$0xff] %v5825_v18  ;;  %v5841_v18 = vpop.permute.xlu0 %1222 }
 0x2a4   : > { %v706_v30 = vpop.permute.xlu1 %705 }
 0x2a8   : > { %v5827_v32 = vpop.permute.xlu1 %1230 }
 0x2ad   : > { %v5829_v63 = vpop.permute.xlu1 %1740 }
 0x2ae   : > { %7595 = vst [vmem:[#allocation41_spill] sm:$0xff] %v5829_v63  ;;  %v1486_v63 = vpop.permute.xlu0 %1485 }
 0x2b2   : > { %v5831_v20 = vpop.permute.xlu1 %2242 }
 0x2b3   : > { %7596 = vst [vmem:[#allocation42_spill] sm:$0xff] %v5831_v20  ;;  %v1488_v20 = vpop.permute.xlu0 %1487 }
 0x2b6   : > { %v702_v13 = vpop.permute.xlu1 %701 }
 0x2b7   : > { %736 = vxpose.xlu0.b32.cont [14/16] (narrow) %v702_v13, 8 }
 0x2ba   : > { %v5835_v34 = vpop.permute.xlu1 %808 }
 0x2bb   : > { %737 = vxpose.xlu0.b32.cont [15/16] (narrow) %v704_v52, 8  ;;  %v429_v52 = vld [vmem:[%s5849_s29] sm:$0xff] }
 0x2bc   : > { %v435_v26 = vunpack.c.2.s8 %v429_v52 }
 0x2be   : > { %v5872_v29 = vcvt.s32.f32 %v435_v26 }
 0x2bf   : > { %738 = vxpose.xlu0.b32.end [16/16] (narrow) %v706_v30, 8  ;;  %v5839_v36 = vpop.permute.xlu1 %1732  ;;  %v819_v30 = vlaneseq }
 0x2c0   : > { %7597 = vst [vmem:[#allocation43_spill] sm:$0xff] %v5839_v36  ;;  %v436_v36 = vunpack.c.3.s8 %v429_v52  ;;  %7603 = vst [vmem:[#allocation49_spill] sm:$0xff] %v5872_v29  ;;  %vm467_vm8 = vcmp.gt.f32.partialorder %v5872_v29, 0.0  ;;  %v7631_v29 = vld [vmem:[#allocation35_spill] sm:$0xff] }
 0x2c2   : > { %v5870_v38 = vcvt.s32.f32 %v436_v36 }
 0x2c4   : > { %v5843_v19 = vpop.permute.xlu1 %2234  ;;  %7602 = vst [vmem:[#allocation48_spill] sm:$0xff] %v5870_v38  ;;  %vm468_vm7 = vcmp.gt.f32.partialorder %v5870_v38, 0.0 }
 0x2c5   : > { %7598 = vst [vmem:[#allocation44_spill] sm:$0xff] %v5843_v19  ;;  %v433_v19 = vunpack.c.0.s8 %v429_v52 }
 0x2c7   : > { %v5860_v1 = vcvt.s32.f32 %v433_v19 }
 0x2c8   : > { %v1484_v28 = vpop.permute.xlu1 %1483 }
 0x2c9   : > { %4429 = vmatprep.subr.bf16.mxu0 %v1484_v28  ;;  %7601 = vst [vmem:[#allocation47_spill] sm:$0xff] %v5860_v1  ;;  %vm465_vm2 = vcmp.gt.f32.partialorder %v5860_v1, 0.0  ;;  %v7633_v1 = vld [vmem:[#allocation34_spill] sm:$0xff] }
 0x2ca   : > { %4430 = vmatpush3.bf16.msra.mxu0 %v1484_v28  ;;  %v5851_v28 = vshrl.u32 %v819_v30, 7 }
 0x2cb   : > { %4431 = vmatprep.subr.bf16.mxu0 %v1486_v63 }
 0x2cc   : > { %v1490_v13 = vpop.permute.xlu1 %1489  ;;  %7599 = vst [vmem:[#allocation45_spill] sm:$0xff] %v5851_v28 }
 0x2ce   : > { %4432 = vmatpush3.bf16.msra.mxu0 %v1486_v63  ;;  %v434_v63 = vunpack.c.1.s8 %v429_v52 }
 0x2cf   : > { %4433 = vmatprep.subr.bf16.mxu0 %v1488_v20 }
 0x2d0   : > { %v5858_v27 = vcvt.s32.f32 %v434_v63 }
 0x2d2   : > { %4434 = vmatpush3.bf16.msra.mxu0 %v1488_v20  ;;  %v7493_v20 = vsub.s32 0, %v5851_v28  ;;  %7600 = vst [vmem:[#allocation46_spill] sm:$0xff] %v5858_v27  ;;  %vm466_vm1 = vcmp.gt.f32.partialorder %v5858_v27, 0.0 }
 0x2d3   : > { %4435 = vmatprep.subr.bf16.mxu0 %v1490_v13 }
 0x2d6   : > { %4436 = vmatpush3.bf16.msra.mxu0 %v1490_v13  ;;  %v1235_v13 = vsub.s32 1, %v5851_v28 }
 0x303   : > { %v5856_v37 = vpop.trf.xlu0 }
 0x304   : > { %v5865_v30 = vrot.slane %v5856_v37, %v7493_v20  ;;  %v5868_v9 = vrot.slane %v5856_v37, %v1235_v13 }
 0x306   : > { %v824_v52 = vadd.f32 %v5865_v30, %v5697_v57  ;;  %v823_v63 = vadd.f32 %v5865_v30, %v5650_v40  ;;  %v826_v19 = vadd.f32 %v5865_v30, %v5655_v42  ;;  %v825_v20 = vadd.f32 %v5865_v30, %v5647_v39 }
 0x307   : > { %v1238_v36 = vadd.f32 %v5868_v9, %v5670_v47  ;;  %v1237_v57 = vadd.f32 %v5868_v9, %v5667_v46  ;;  %v1240_v7 = vadd.f32 %v5868_v9, %v5684_v53 }
 0x308   : > { %vm840_vm3 = vcmp.gt.f32.partialorder %v824_v52, 0.0  ;;  %v856_v26 = vmul.f32 0.2, %v824_v52  ;;  %vm839_vm4 = vcmp.gt.f32.partialorder %v823_v63, 0.0  ;;  %v855_v40 = vmul.f32 0.2, %v823_v63 }
 0x309   : > { %vm842_vm5 = vcmp.gt.f32.partialorder %v826_v19, 0.0  ;;  %v858_v42 = vmul.f32 0.2, %v826_v19  ;;  %vm841_vm6 = vcmp.gt.f32.partialorder %v825_v20, 0.0  ;;  %v857_v13 = vmul.f32 0.2, %v825_v20 }
 0x30a   : > { %v872_v39 = vsel %vm840_vm3, %v824_v52, %v856_v26  ;;  %v871_v54 = vsel %vm839_vm4, %v823_v63, %v855_v40  ;;  %v1270_v12 = vmul.f32 0.2, %v1238_v36  ;;  %vm1254_vm9 = vcmp.gt.f32.partialorder %v1238_v36, 0.0 }
 0x30b   : > { %v5893_v47 = vsel %vm466_vm1, %v872_v39, -1e+30  ;;  %v5897_v46 = vsel %vm465_vm2, %v871_v54, -1e+30  ;;  %v874_v52 = vsel %vm842_vm5, %v826_v19, %v858_v42  ;;  %v873_v63 = vsel %vm841_vm6, %v825_v20, %v857_v13 }
 0x30c   : > { %7604 = vst [vmem:[#allocation50_spill] sm:$0xff] %v5893_v47  ;;  %905 = vmax.xlane.f32.xlu0 %v5893_v47  ;;  %903 = vmax.xlane.f32.xlu1 %v5897_v46  ;;  %v1239_v26 = vadd.f32 %v5868_v9, %v5653_v41  ;;  %vm1253_vm10 = vcmp.gt.f32.partialorder %v1237_v57, 0.0  ;;  %v1269_v40 = vmul.f32 0.2, %v1237_v57  ;;  %v438_v39 = vunpack.c.1.s8 %v430_v4 }
 0x30d   : > { %v5907_v54 = vsel %vm468_vm7, %v874_v52, -1e+30  ;;  %v5911_v53 = vsel %vm467_vm8, %v873_v63, -1e+30  ;;  %v1286_v47 = vsel %vm1254_vm9, %v1238_v36, %v1270_v12  ;;  %v828_v20 = vadd.f32 %v5865_v30, %v5760_v16 }
 0x30e   : > { %7605 = vst [vmem:[#allocation51_spill] sm:$0xff] %v5907_v54  ;;  %v1285_v41 = vsel %vm1253_vm10, %v1237_v57, %v1269_v40  ;;  %v1272_v19 = vmul.f32 0.2, %v1240_v7  ;;  %v1271_v42 = vmul.f32 0.2, %v1239_v26  ;;  %v827_v13 = vadd.f32 %v5865_v30, %v5700_v58 }
 0x30f   : > { %vm1256_vm11 = vcmp.gt.f32.partialorder %v1240_v7, 0.0  ;;  %vm1255_vm12 = vcmp.gt.f32.partialorder %v1239_v26, 0.0  ;;  %v5919_v52 = vcvt.s32.f32 %v438_v39  ;;  %v5923_v12 = vsel %vm466_vm1, %v1286_v47, -1e+30 }
 0x310   : > { %909 = vmax.xlane.f32.xlu0 %v5907_v54  ;;  %907 = vmax.xlane.f32.xlu1 %v5911_v53  ;;  %v5925_v36 = vcvt.s32.f32 %v437_v21  ;;  %v440_v16 = vunpack.c.3.s8 %v430_v4  ;;  %v439_v63 = vunpack.c.2.s8 %v430_v4  ;;  %v5929_v57 = vsel %vm465_vm2, %v1285_v41, -1e+30 }
 0x311   : > { %7606 = vst [vmem:[#allocation52_spill] sm:$0xff] %v5919_v52  ;;  %v860_v40 = vmul.f32 0.2, %v828_v20  ;;  %v830_v58 = vadd.f32 %v5865_v30, %v5706_v60  ;;  %v829_v39 = vadd.f32 %v5865_v30, %v5717_v0  ;;  %v1288_v47 = vsel %vm1256_vm11, %v1240_v7, %v1272_v19 }
 0x312   : > { %7607 = vst [vmem:[#allocation53_spill] sm:$0xff] %v5925_v36  ;;  %v1287_v21 = vsel %vm1255_vm12, %v1239_v26, %v1271_v42  ;;  %vm844_vm13 = vcmp.gt.f32.partialorder %v828_v20, 0.0  ;;  %v859_v54 = vmul.f32 0.2, %v827_v13  ;;  %vm470_vm14 = vcmp.gt.f32.partialorder %v5919_v52, 0.0  ;;  %v7637_v52 = vld [vmem:[#allocation36_spill] sm:$0xff] }
 0x313   : > { %vm843_vm15 = vcmp.gt.f32.partialorder %v827_v13, 0.0  ;;  %vm469_vm0 = vcmp.gt.f32.partialorder %v5925_v36, 0.0  ;;  %v5939_v4 = vcvt.s32.f32 %v440_v16  ;;  %v5941_v41 = vcvt.s32.f32 %v439_v63  ;;  %v7638_v36 = vld [vmem:[#allocation32_spill] sm:$0xff] }
 0x314   : > { %1319 = vmax.xlane.f32.xlu0 %v5923_v12  ;;  %1317 = vmax.xlane.f32.xlu1 %v5929_v57  ;;  %v1242_v60 = vadd.f32 %v5868_v9, %v5714_v62  ;;  %v5947_v0 = vsel %vm468_vm7, %v1288_v47, -1e+30  ;;  %v5951_v7 = vsel %vm467_vm8, %v1287_v21, -1e+30  ;;  %v876_v26 = vsel %vm844_vm13, %v828_v20, %v860_v40  ;;  %v431_v47 = vld [vmem:[%s5849_s29 + $0x10] sm:$0xff] }
 0x315   : > { %7608 = vst [vmem:[#allocation54_spill] sm:$0xff] %v5939_v4  ;;  %7609 = vst [vmem:[#allocation55_spill] sm:$0xff] %v5941_v41  ;;  %v862_v19 = vmul.f32 0.2, %v830_v58  ;;  %v875_v42 = vsel %vm843_vm15, %v827_v13, %v859_v54  ;;  %vm846_vm3 = vcmp.gt.f32.partialorder %v830_v58, 0.0  ;;  %v1241_v62 = vadd.f32 %v5868_v9, %v5733_v5 }
 0x316   : > { %7610 = vst [vmem:[#allocation56_spill] sm:$0xff] %v5947_v0  ;;  %7611 = vst [vmem:[#allocation57_spill] sm:$0xff] %v5951_v7  ;;  %v861_v16 = vmul.f32 0.2, %v829_v39  ;;  %vm845_vm4 = vcmp.gt.f32.partialorder %v829_v39, 0.0  ;;  %vm7517_vm5 = vcmp.gt.f32.partialorder %v5939_v4, 0.0  ;;  %v1244_v13 = vadd.f32 %v5868_v9, %v5746_v10 }
 0x317   : > { %v5959_v63 = vsel %vm470_vm14, %v876_v26, -1e+30  ;;  %vm7518_vm6 = vcmp.gt.f32.partialorder %v5941_v41, 0.0  ;;  %v5965_v20 = vsel %vm469_vm0, %v875_v42, -1e+30  ;;  %v878_v40 = vsel %vm846_vm3, %v830_v58, %v862_v19  ;;  %v7643_v41 = vld [vmem:[#allocation30_spill] sm:$0xff] }
 0x318   : > { %1323 = vmax.xlane.f32.xlu0 %v5947_v0  ;;  %1321 = vmax.xlane.f32.xlu1 %v5951_v7  ;;  %7612 = vst [vmem:[#allocation58_spill] sm:$0xff] %v5959_v63  ;;  %v1274_v54 = vmul.f32 0.2, %v1242_v60  ;;  %v877_v5 = vsel %vm845_vm4, %v829_v39, %v861_v16  ;;  %vm1258_vm9 = vcmp.gt.f32.partialorder %v1242_v60, 0.0  ;;  %v1273_v21 = vmul.f32 0.2, %v1241_v62 }
 0x319   : > { %v1243_v26 = vadd.f32 %v5868_v9, %v5721_v2  ;;  %vm1257_vm10 = vcmp.gt.f32.partialorder %v1241_v62, 0.0  ;;  %v5976_v42 = vsel %vm7517_vm5, %v878_v40, -1e+30  ;;  %v442_v58 = vunpack.c.1.s8 %v431_v47 }
 0x31a   : > { %7613 = vst [vmem:[#allocation59_spill] sm:$0xff] %v5976_v42  ;;  %v441_v19 = vunpack.c.0.s8 %v431_v47  ;;  %v5980_v10 = vsel %vm7518_vm6, %v877_v5, -1e+30  ;;  %v1276_v0 = vmul.f32 0.2, %v1244_v13  ;;  %v832_v39 = vadd.f32 %v5865_v30, %v5807_v51 }
 0x31b   : > { %v1289_v2 = vsel %vm1257_vm10, %v1241_v62, %v1273_v21  ;;  %vm1260_vm11 = vcmp.gt.f32.partialorder %v1244_v13, 0.0  ;;  %v1275_v16 = vmul.f32 0.2, %v1243_v26  ;;  %v831_v40 = vadd.f32 %v5865_v30, %v5793_v31 }
 0x31c   : > { %913 = vmax.xlane.f32.xlu0 %v5959_v63  ;;  %911 = vmax.xlane.f32.xlu1 %v5965_v20  ;;  %v1290_v63 = vsel %vm1258_vm9, %v1242_v60, %v1274_v54  ;;  %vm1259_vm12 = vcmp.gt.f32.partialorder %v1243_v26, 0.0  ;;  %v444_v7 = vunpack.c.3.s8 %v431_v47  ;;  %v5992_v60 = vcvt.s32.f32 %v442_v58 }
 0x31d   : > { %v5990_v5 = vsel %vm470_vm14, %v1290_v63, -1e+30  ;;  %v5994_v54 = vcvt.s32.f32 %v441_v19  ;;  %v443_v51 = vunpack.c.2.s8 %v431_v47  ;;  %v1292_v62 = vsel %vm1260_vm11, %v1244_v13, %v1276_v0 }
 0x31e   : > { %7614 = vst [vmem:[#allocation60_spill] sm:$0xff] %v5992_v60  ;;  %v864_v21 = vmul.f32 0.2, %v832_v39  ;;  %v834_v31 = vadd.f32 %v5865_v30, %v5797_v33  ;;  %v1291_v63 = vsel %vm1259_vm12, %v1243_v26, %v1275_v16  ;;  %vm848_vm13 = vcmp.gt.f32.partialorder %v832_v39, 0.0 }
 0x31f   : > { %7615 = vst [vmem:[#allocation61_spill] sm:$0xff] %v5994_v54  ;;  %v863_v58 = vmul.f32 0.2, %v831_v40  ;;  %v833_v19 = vadd.f32 %v5865_v30, %v5774_v24  ;;  %vm847_vm15 = vcmp.gt.f32.partialorder %v831_v40, 0.0  ;;  %v6006_v47 = vcvt.s32.f32 %v444_v7 }
 0x320   : > { %917 = vmax.xlane.f32.xlu0 %v5976_v42  ;;  %915 = vmax.xlane.f32.xlu1 %v5980_v10  ;;  %v5998_v42 = vsel %vm469_vm0, %v1289_v2, -1e+30  ;;  %v6010_v0 = vsel %vm7517_vm5, %v1292_v62, -1e+30  ;;  %vm7507_vm3 = vcmp.gt.f32.partialorder %v5992_v60, 0.0  ;;  %vm7504_vm4 = vcmp.gt.f32.partialorder %v5994_v54, 0.0 }
 0x321   : > { %7616 = vst [vmem:[#allocation62_spill] sm:$0xff] %v6006_v47  ;;  %7617 = vst [vmem:[#allocation63_spill] sm:$0xff] %v6010_v0  ;;  %v6014_v33 = vcvt.s32.f32 %v443_v51  ;;  %v6018_v13 = vsel %vm7518_vm6, %v1291_v63, -1e+30  ;;  %v880_v26 = vsel %vm848_vm13, %v832_v39, %v864_v21  ;;  %v866_v24 = vmul.f32 0.2, %v834_v31 }
 0x322   : > { %v1246_v7 = vadd.f32 %v5868_v9, %v5805_v43  ;;  %v879_v2 = vsel %vm847_vm15, %v831_v40, %v863_v58  ;;  %vm850_vm9 = vcmp.gt.f32.partialorder %v834_v31, 0.0  ;;  %v865_v16 = vmul.f32 0.2, %v833_v19  ;;  %v432_v43 = vld [vmem:[%s5849_s29 + $0x18] sm:$0xff]  ;;  %s5280_s29 = smov 64  }
 0x323   : > { %7618 = vst [vmem:[#allocation64_spill] sm:$0xff] %v6014_v33  ;;  %v1245_v51 = vadd.f32 %v5868_v9, %v5789_v23  ;;  %vm849_vm10 = vcmp.gt.f32.partialorder %v833_v19, 0.0  ;;  %v6028_v62 = vsel %vm7507_vm3, %v880_v26, -1e+30  ;;  %vm7505_vm11 = vcmp.gt.f32.partialorder %v6006_v47, 0.0 }
 0x324   : > { %1327 = vmax.xlane.f32.xlu0 %v5990_v5  ;;  %1325 = vmax.xlane.f32.xlu1 %v5998_v42  ;;  %7619 = vst [vmem:[#allocation65_spill] sm:$0xff] %v6028_v62  ;;  %vm7506_vm12 = vcmp.gt.f32.partialorder %v6014_v33, 0.0  ;;  %v6035_v39 = vsel %vm7504_vm4, %v879_v2, -1e+30  ;;  %v882_v40 = vsel %vm850_vm9, %v834_v31, %v866_v24  ;;  %v1278_v21 = vmul.f32 0.2, %v1246_v7 }
 0x325   : > { %7620 = vst [vmem:[#allocation66_spill] sm:$0xff] %v6035_v39  ;;  %v1248_v63 = vadd.f32 %v5868_v9, %v5799_v35  ;;  %v881_v23 = vsel %vm849_vm10, %v833_v19, %v865_v16  ;;  %vm1262_vm13 = vcmp.gt.f32.partialorder %v1246_v7, 0.0  ;;  %v1277_v58 = vmul.f32 0.2, %v1245_v51 }
 0x326   : > { %v1247_v26 = vadd.f32 %v5868_v9, %v5778_v25  ;;  %vm1261_vm15 = vcmp.gt.f32.partialorder %v1245_v51, 0.0  ;;  %v6045_v2 = vsel %vm7505_vm11, %v882_v40, -1e+30  ;;  %v445_v31 = vunpack.c.0.s8 %v432_v43 }
 0x327   : > { %7621 = vst [vmem:[#allocation67_spill] sm:$0xff] %v6045_v2  ;;  %v6049_v35 = vsel %vm7506_vm12, %v881_v23, -1e+30  ;;  %v1294_v24 = vsel %vm1262_vm13, %v1246_v7, %v1278_v21  ;;  %v836_v19 = vadd.f32 %v5865_v30, %v5835_v34  ;;  %v1293_v25 = vsel %vm1261_vm15, %v1245_v51, %v1277_v58 }
 0x328   : > { %1331 = vmax.xlane.f32.xlu0 %v6010_v0  ;;  %1329 = vmax.xlane.f32.xlu1 %v6018_v13  ;;  %v446_v0 = vunpack.c.1.s8 %v432_v43  ;;  %vm1264_vm9 = vcmp.gt.f32.partialorder %v1248_v63, 0.0  ;;  %v1279_v16 = vmul.f32 0.2, %v1247_v26  ;;  %v835_v40 = vadd.f32 %v5865_v30, %v5833_v22 }
 0x329   : > { %vm1263_vm10 = vcmp.gt.f32.partialorder %v1247_v26, 0.0  ;;  %v6061_v7 = vsel %vm7507_vm3, %v1294_v24, -1e+30  ;;  %v6063_v21 = vcvt.s32.f32 %v445_v31  ;;  %v448_v34 = vunpack.c.3.s8 %v432_v43 }
 0x32a   : > { %v447_v23 = vunpack.c.2.s8 %v432_v43  ;;  %vm852_vm13 = vcmp.gt.f32.partialorder %v836_v19, 0.0  ;;  %v868_v58 = vmul.f32 0.2, %v836_v19  ;;  %v1295_v22 = vsel %vm1263_vm10, %v1247_v26, %v1279_v16 }
 0x32b   : > { %7623 = vst [vmem:[#allocation69_spill] sm:$0xff] %v6063_v21  ;;  %v838_v24 = vadd.f32 %v5865_v30, %v5837_v15  ;;  %v837_v31 = vadd.f32 %v5865_v30, %v5813_v8  ;;  %v1745_v43 = vsub.s32 2, %v5851_v28  ;;  %vm851_vm15 = vcmp.gt.f32.partialorder %v835_v40, 0.0 }
 0x32c   : > { %921 = vmax.xlane.f32.xlu0 %v6028_v62  ;;  %919 = vmax.xlane.f32.xlu1 %v6035_v39  ;;  %v1280_v62 = vmul.f32 0.2, %v1248_v63  ;;  %v6057_v39 = vcvt.s32.f32 %v446_v0  ;;  %v867_v0 = vmul.f32 0.2, %v835_v40  ;;  %v6088_v15 = vsel %vm7506_vm12, %v1295_v22, -1e+30 }
 0x32d   : > { %v884_v8 = vsel %vm852_vm13, %v836_v19, %v868_v58  ;;  %v1250_v30 = vadd.f32 %v5868_v9, %v5841_v18  ;;  %v870_v16 = vmul.f32 0.2, %v838_v24  ;;  %vm854_vm10 = vcmp.gt.f32.partialorder %v838_v24, 0.0 }
 0x32e   : > { %7622 = vst [vmem:[#allocation68_spill] sm:$0xff] %v6057_v39  ;;  %v1296_v51 = vsel %vm1264_vm9, %v1248_v63, %v1280_v62  ;;  %vm477_vm9 = vcmp.gt.f32.partialorder %v6063_v21, 0.0  ;;  %v6078_v62 = vcvt.s32.f32 %v448_v34  ;;  %v6080_v63 = vcvt.s32.f32 %v447_v23 }
 0x32f   : > { %v6084_v26 = vsel %vm7505_vm11, %v1296_v51, -1e+30  ;;  %v869_v34 = vmul.f32 0.2, %v837_v31  ;;  %v1249_v23 = vadd.f32 %v5868_v9, %v5821_v49  ;;  %vm853_vm11 = vcmp.gt.f32.partialorder %v837_v31, 0.0 }
 0x330   : > { %925 = vmax.xlane.f32.xlu0 %v6045_v2  ;;  %923 = vmax.xlane.f32.xlu1 %v6049_v35  ;;  %v6067_v2 = vsel %vm7504_vm4, %v1293_v25, -1e+30  ;;  %vm478_vm4 = vcmp.gt.f32.partialorder %v6057_v39, 0.0  ;;  %7624 = vst [vmem:[#allocation70_spill] sm:$0xff] %v6078_v62  ;;  %7625 = vst [vmem:[#allocation71_spill] sm:$0xff] %v6080_v63  ;;  %v883_v25 = vsel %vm851_vm15, %v835_v40, %v867_v0  ;;  %vm7557_vm13 = vcmp.gt.f32.partialorder %v6078_v62, 0.0 }
 0x331   : > { %7626 = vst [vmem:[#allocation72_spill] sm:$0xff] %v6084_v26  ;;  %v6098_v51 = vrot.slane %v5856_v37, %v1745_v43  ;;  %v6102_v19 = vsel %vm478_vm4, %v884_v8, -1e+30  ;;  %vm479_vm12 = vcmp.gt.f32.partialorder %v6080_v63, 0.0  ;;  %v6108_v18 = vsel %vm477_vm9, %v883_v25, -1e+30 }
 0x332   : > { %vm1266_vm15 = vcmp.gt.f32.partialorder %v1250_v30, 0.0  ;;  %v1282_v40 = vmul.f32 0.2, %v1250_v30  ;;  %v1252_v49 = vadd.f32 %v5868_v9, %v5827_v32  ;;  %v886_v58 = vsel %vm854_vm10, %v838_v24, %v870_v16  ;;  %v7671_v39 = vld [vmem:[#allocation50_spill] sm:$0xff] }
 0x333   : > { %v885_v22 = vsel %vm853_vm11, %v837_v31, %v869_v34  ;;  %v1281_v0 = vmul.f32 0.2, %v1249_v23  ;;  %v1251_v43 = vadd.f32 %v5868_v9, %v5815_v14  ;;  %vm1265_vm3 = vcmp.gt.f32.partialorder %v1249_v23, 0.0 }
 0x334   : > { %1335 = vmax.xlane.f32.xlu0 %v6061_v7  ;;  %1333 = vmax.xlane.f32.xlu1 %v6067_v2  ;;  %v2247_v8 = vsub.s32 3, %v5851_v28  ;;  %v6119_v25 = vsel %vm7557_vm13, %v886_v58, -1e+30  ;;  %v6123_v32 = vsel %vm479_vm12, %v885_v22, -1e+30  ;;  %v1748_v24 = vadd.f32 %v6098_v51, %v5703_v59  ;;  %v7634_v28 = vld [vmem:[#allocation29_spill] sm:$0xff] }
 0x335   : > { %v1297_v9 = vsel %vm1265_vm3, %v1249_v23, %v1281_v0  ;;  %v1284_v14 = vmul.f32 0.2, %v1252_v49  ;;  %v1283_v31 = vmul.f32 0.2, %v1251_v43  ;;  %v1747_v16 = vadd.f32 %v6098_v51, %v5673_v48 }
 0x336   : > { %vm1268_vm11 = vcmp.gt.f32.partialorder %v1252_v49, 0.0  ;;  %vm1267_vm10 = vcmp.gt.f32.partialorder %v1251_v43, 0.0  ;;  %v6132_v34 = vrot.slane %v5856_v37, %v2247_v8  ;;  %v6140_v59 = vsel %vm477_vm9, %v1297_v9, -1e+30 }
 0x337   : > { %v1750_v23 = vadd.f32 %v6098_v51, %v5688_v55  ;;  %v1749_v48 = vadd.f32 %v6098_v51, %v5659_v44  ;;  %v1300_v37 = vsel %vm1268_vm11, %v1252_v49, %v1284_v14  ;;  %v1299_v58 = vsel %vm1267_vm10, %v1251_v43, %v1283_v31 }
 0x338   : > { %1339 = vmax.xlane.f32.xlu0 %v6084_v26  ;;  %1337 = vmax.xlane.f32.xlu1 %v6088_v15  ;;  %v1298_v26 = vsel %vm1266_vm15, %v1250_v30, %v1282_v40  ;;  %v1780_v40 = vmul.f32 0.2, %v1748_v24  ;;  %vm1764_vm3 = vcmp.gt.f32.partialorder %v1748_v24, 0.0  ;;  %vm1763_vm15 = vcmp.gt.f32.partialorder %v1747_v16, 0.0 }
 0x339   : > { %v6136_v30 = vsel %vm478_vm4, %v1298_v26, -1e+30  ;;  %v1779_v26 = vmul.f32 0.2, %v1747_v16  ;;  %v2250_v22 = vadd.f32 %v6132_v34, %v5710_v61  ;;  %v6152_v0 = vsel %vm7557_vm13, %v1300_v37, -1e+30 }
 0x33a   : > { %v6156_v55 = vsel %vm479_vm12, %v1299_v58, -1e+30  ;;  %v1796_v44 = vsel %vm1764_vm3, %v1748_v24, %v1780_v40  ;;  %v1782_v8 = vmul.f32 0.2, %v1750_v23  ;;  %vm1766_vm11 = vcmp.gt.f32.partialorder %v1750_v23, 0.0 }
 0x33b   : > { %v1795_v49 = vsel %vm1763_vm15, %v1747_v16, %v1779_v26  ;;  %v1781_v43 = vmul.f32 0.2, %v1749_v48  ;;  %v2249_v61 = vadd.f32 %v6132_v34, %v5677_v50  ;;  %vm1765_vm10 = vcmp.gt.f32.partialorder %v1749_v48, 0.0 }
 0x33c   : > { %929 = vmax.xlane.f32.xlu0 %v6102_v19  ;;  %927 = vmax.xlane.f32.xlu1 %v6108_v18  ;;  %v6164_v9 = vsel %vm466_vm1, %v1796_v44, -1e+30  ;;  %v6168_v14 = vsel %vm465_vm2, %v1795_v49, -1e+30  ;;  %v1798_v24 = vsel %vm1766_vm11, %v1750_v23, %v1782_v8  ;;  %v2282_v31 = vmul.f32 0.2, %v2250_v22 }
 0x33d   : > { %v2252_v40 = vadd.f32 %v6132_v34, %v5692_v56  ;;  %v1797_v16 = vsel %vm1765_vm10, %v1749_v48, %v1781_v43  ;;  %vm2266_vm3 = vcmp.gt.f32.partialorder %v2250_v22, 0.0  ;;  %v2281_v50 = vmul.f32 0.2, %v2249_v61 }
 0x33e   : > { %v2251_v37 = vadd.f32 %v6132_v34, %v5663_v45  ;;  %vm2265_vm15 = vcmp.gt.f32.partialorder %v2249_v61, 0.0  ;;  %v6178_v58 = vsel %vm468_vm7, %v1798_v24, -1e+30  ;;  %v6182_v23 = vsel %vm467_vm8, %v1797_v16, -1e+30 }
 0x33f   : > { %v2298_v56 = vsel %vm2266_vm3, %v2250_v22, %v2282_v31  ;;  %v2284_v26 = vmul.f32 0.2, %v2252_v40  ;;  %v1752_v44 = vadd.f32 %v6098_v51, %v5765_v17  ;;  %v2297_v48 = vsel %vm2265_vm15, %v2249_v61, %v2281_v50 }
 0x340   : > { %933 = vmax.xlane.f32.xlu0 %v6119_v25  ;;  %931 = vmax.xlane.f32.xlu1 %v6123_v32  ;;  %vm2268_vm11 = vcmp.gt.f32.partialorder %v2252_v40, 0.0  ;;  %v2283_v45 = vmul.f32 0.2, %v2251_v37  ;;  %v1751_v8 = vadd.f32 %v6098_v51, %v5737_v6  ;;  %vm2267_vm10 = vcmp.gt.f32.partialorder %v2251_v37, 0.0 }
 0x341   : > { %v6192_v49 = vsel %vm466_vm1, %v2298_v56, -1e+30  ;;  %v6196_v22 = vsel %vm465_vm2, %v2297_v48, -1e+30  ;;  %v2300_v17 = vsel %vm2268_vm11, %v2252_v40, %v2284_v26  ;;  %v1784_v43 = vmul.f32 0.2, %v1752_v44 }
 0x342   : > { %v1754_v24 = vadd.f32 %v6098_v51, %v5750_v11  ;;  %v2299_v61 = vsel %vm2267_vm10, %v2251_v37, %v2283_v45  ;;  %vm1768_vm3 = vcmp.gt.f32.partialorder %v1752_v44, 0.0  ;;  %v1783_v6 = vmul.f32 0.2, %v1751_v8  ;;  %v7627_v56 = vld [vmem:[#allocation28_spill] sm:$0xff]  ;;  %v7628_v48 = vld [vmem:[#allocation26_spill] sm:$0xff] }
 0x343   : > { %v1753_v31 = vadd.f32 %v6098_v51, %v5725_v3  ;;  %vm1767_vm15 = vcmp.gt.f32.partialorder %v1751_v8, 0.0  ;;  %v6206_v16 = vsel %vm468_vm7, %v2300_v17, -1e+30  ;;  %v6210_v40 = vsel %vm467_vm8, %v2299_v61, -1e+30 }
 0x344   : > { %1343 = vmax.xlane.f32.xlu0 %v6136_v30  ;;  %1341 = vmax.xlane.f32.xlu1 %v6140_v59  ;;  %v1800_v11 = vsel %vm1768_vm3, %v1752_v44, %v1784_v43  ;;  %v1786_v50 = vmul.f32 0.2, %v1754_v24  ;;  %v2254_v26 = vadd.f32 %v6132_v34, %v7627_v56  ;;  %v1799_v37 = vsel %vm1767_vm15, %v1751_v8, %v1783_v6  ;;  %v7629_v56 = vld [vmem:[#allocation27_spill] sm:$0xff] }
 0x345   : > { %vm1770_vm11 = vcmp.gt.f32.partialorder %v1754_v24, 0.0  ;;  %v1785_v3 = vmul.f32 0.2, %v1753_v31  ;;  %v2253_v45 = vadd.f32 %v6132_v34, %v7628_v48  ;;  %vm1769_vm10 = vcmp.gt.f32.partialorder %v1753_v31, 0.0  ;;  %v7630_v48 = vld [vmem:[#allocation25_spill] sm:$0xff] }
 0x346   : > { %v6220_v17 = vsel %vm470_vm14, %v1800_v11, -1e+30  ;;  %v6224_v44 = vsel %vm469_vm0, %v1799_v37, -1e+30  ;;  %v1802_v43 = vsel %vm1770_vm11, %v1754_v24, %v1786_v50  ;;  %v2286_v61 = vmul.f32 0.2, %v2254_v26 }
 0x347   : > { %v2256_v38 = vadd.f32 %v6132_v34, %v7629_v56  ;;  %v1801_v8 = vsel %vm1769_vm10, %v1753_v31, %v1785_v3  ;;  %vm2270_vm3 = vcmp.gt.f32.partialorder %v2254_v26, 0.0  ;;  %v2285_v6 = vmul.f32 0.2, %v2253_v45 }
 0x348   : > { %1347 = vmax.xlane.f32.xlu0 %v6152_v0  ;;  %1345 = vmax.xlane.f32.xlu1 %v6156_v55  ;;  %v2255_v11 = vadd.f32 %v6132_v34, %v7630_v48  ;;  %vm2269_vm15 = vcmp.gt.f32.partialorder %v2253_v45, 0.0  ;;  %v6234_v37 = vsel %vm7517_vm5, %v1802_v43, -1e+30  ;;  %v6238_v24 = vsel %vm7518_vm6, %v1801_v8, -1e+30  ;;  %v7632_v48 = vld [vmem:[#allocation31_spill] sm:$0xff] }
 0x349   : > { %v2302_v50 = vsel %vm2270_vm3, %v2254_v26, %v2286_v61  ;;  %v2288_v56 = vmul.f32 0.2, %v2256_v38  ;;  %v1756_v27 = vadd.f32 %v6098_v51, %v7631_v29  ;;  %v2301_v31 = vsel %vm2269_vm15, %v2253_v45, %v2285_v6 }
 0x34a   : > { %vm2272_vm11 = vcmp.gt.f32.partialorder %v2256_v38, 0.0  ;;  %v2287_v3 = vmul.f32 0.2, %v2255_v11  ;;  %v1755_v43 = vadd.f32 %v6098_v51, %v7632_v48  ;;  %vm2271_vm10 = vcmp.gt.f32.partialorder %v2255_v11, 0.0 }
 0x34b   : > { %v6248_v8 = vsel %vm470_vm14, %v2302_v50, -1e+30  ;;  %v6252_v26 = vsel %vm469_vm0, %v2301_v31, -1e+30  ;;  %v2304_v29 = vsel %vm2272_vm11, %v2256_v38, %v2288_v56  ;;  %vm1772_vm3 = vcmp.gt.f32.partialorder %v1756_v27, 0.0 }
 0x34c   : > { %1829 = vmax.xlane.f32.xlu0 %v6164_v9  ;;  %1827 = vmax.xlane.f32.xlu1 %v6168_v14  ;;  %v1788_v61 = vmul.f32 0.2, %v1756_v27  ;;  %v2303_v45 = vsel %vm2271_vm10, %v2255_v11, %v2287_v3  ;;  %v1787_v6 = vmul.f32 0.2, %v1755_v43  ;;  %v1758_v48 = vadd.f32 %v6098_v51, %v7633_v1 }
 0x34d   : > { %v1757_v50 = vadd.f32 %v6098_v51, %v7634_v28  ;;  %vm1771_vm15 = vcmp.gt.f32.partialorder %v1755_v43, 0.0  ;;  %v6262_v31 = vsel %vm7517_vm5, %v2304_v29, -1e+30  ;;  %v6266_v38 = vsel %vm7518_vm6, %v2303_v45, -1e+30 }
 0x34e   : > { %7635 = vst [vmem:[#allocation28_spill] sm:$0xff] %v6262_v31  ;;  %7636 = vst [vmem:[#allocation26_spill] sm:$0xff] %v6266_v38  ;;  %v1804_v56 = vsel %vm1772_vm3, %v1756_v27, %v1788_v61  ;;  %v2258_v11 = vadd.f32 %v6132_v34, %v7637_v52  ;;  %v1803_v1 = vsel %vm1771_vm15, %v1755_v43, %v1787_v6  ;;  %v1790_v3 = vmul.f32 0.2, %v1758_v48  ;;  %v7642_v61 = vld [vmem:[#allocation33_spill] sm:$0xff] }
 0x34f   : > { %v1789_v28 = vmul.f32 0.2, %v1757_v50  ;;  %v2257_v4 = vadd.f32 %v6132_v34, %v7638_v36  ;;  %vm1774_vm11 = vcmp.gt.f32.partialorder %v1758_v48, 0.0  ;;  %vm1773_vm10 = vcmp.gt.f32.partialorder %v1757_v50, 0.0 }
 0x350   : > { %1833 = vmax.xlane.f32.xlu0 %v6178_v58  ;;  %1831 = vmax.xlane.f32.xlu1 %v6182_v23  ;;  %vm7639_vm5 = vcmp.gt.f32.partialorder %v5992_v60, 0.0  ;;  %vm7640_vm3 = vcmp.gt.f32.partialorder %v5994_v54, 0.0  ;;  %vm2274_vm6 = vcmp.gt.f32.partialorder %v2258_v11, 0.0  ;;  %v2290_v52 = vmul.f32 0.2, %v2258_v11 }
 0x351   : > { %v6276_v29 = vsel %vm7639_vm5, %v1804_v56, -1e+30  ;;  %v6280_v27 = vsel %vm7640_vm3, %v1803_v1, -1e+30  ;;  %v2260_v43 = vadd.f32 %v6132_v34, %v7642_v61  ;;  %v1806_v36 = vsel %vm1774_vm11, %v1758_v48, %v1790_v3  ;;  %v7647_v3 = vld [vmem:[#allocation43_spill] sm:$0xff] }
 0x352   : > { %7641 = vst [vmem:[#allocation27_spill] sm:$0xff] %v6280_v27  ;;  %v1805_v45 = vsel %vm1773_vm10, %v1757_v50, %v1789_v28  ;;  %v2289_v6 = vmul.f32 0.2, %v2257_v4  ;;  %v2259_v56 = vadd.f32 %v6132_v34, %v7643_v41  ;;  %vm2273_vm5 = vcmp.gt.f32.partialorder %v2257_v4, 0.0  ;;  %v7648_v28 = vld [vmem:[#allocation39_spill] sm:$0xff] }
 0x353   : > { %vm7644_vm15 = vcmp.gt.f32.partialorder %v6006_v47, 0.0  ;;  %vm7645_vm3 = vcmp.gt.f32.partialorder %v6014_v33, 0.0  ;;  %v2306_v61 = vsel %vm2274_vm6, %v2258_v11, %v2290_v52  ;;  %v1760_v41 = vadd.f32 %v6098_v51, %v7647_v3  ;;  %v7652_v52 = vld [vmem:[#allocation41_spill] sm:$0xff] }
 0x354   : > { %2331 = vmax.xlane.f32.xlu0 %v6192_v49  ;;  %2329 = vmax.xlane.f32.xlu1 %v6196_v22  ;;  %v6290_v1 = vsel %vm7644_vm15, %v1806_v36, -1e+30  ;;  %v2305_v48 = vsel %vm2273_vm5, %v2257_v4, %v2289_v6  ;;  %v2291_v50 = vmul.f32 0.2, %v2259_v56  ;;  %vm2276_vm11 = vcmp.gt.f32.partialorder %v2260_v43, 0.0 }
 0x355   : > { %vm2275_vm10 = vcmp.gt.f32.partialorder %v2259_v56, 0.0  ;;  %vm7649_vm15 = vcmp.gt.f32.partialorder %v5992_v60, 0.0  ;;  %vm7650_vm6 = vcmp.gt.f32.partialorder %v5994_v54, 0.0  ;;  %v1762_v4 = vadd.f32 %v6098_v51, %v7652_v52 }
 0x356   : > { %v6304_v36 = vsel %vm7649_vm15, %v2306_v61, -1e+30  ;;  %v6308_v11 = vsel %vm7650_vm6, %v2305_v48, -1e+30  ;;  %vm1776_vm5 = vcmp.gt.f32.partialorder %v1760_v41, 0.0  ;;  %v7654_v61 = vld [vmem:[#allocation44_spill] sm:$0xff] }
 0x357   : > { %7651 = vst [vmem:[#allocation35_spill] sm:$0xff] %v6308_v11  ;;  %v2262_v48 = vadd.f32 %v6132_v34, %v7654_v61  ;;  %vm7655_vm15 = vcmp.gt.f32.partialorder %v6006_v47, 0.0  ;;  %vm7657_vm6 = vcmp.gt.f32.partialorder %v6014_v33, 0.0  ;;  %v1794_v52 = vmul.f32 0.2, %v1762_v4 }
 0x358   : > { %2335 = vmax.xlane.f32.xlu0 %v6206_v16  ;;  %2333 = vmax.xlane.f32.xlu1 %v6210_v40 }
 0x359   : > { %v2294_v47 = vmul.f32 0.2, %v2262_v48 }
 0x35c   : > { %1837 = vmax.xlane.f32.xlu0 %v6220_v17  ;;  %1835 = vmax.xlane.f32.xlu1 %v6224_v44 }
 0x360   : > { %1841 = vmax.xlane.f32.xlu0 %v6234_v37  ;;  %1839 = vmax.xlane.f32.xlu1 %v6238_v24 }
 0x364   : > { %2339 = vmax.xlane.f32.xlu0 %v6248_v8  ;;  %2337 = vmax.xlane.f32.xlu1 %v6252_v26 }
 0x368   : > { %2343 = vmax.xlane.f32.xlu0 %v6262_v31  ;;  %2341 = vmax.xlane.f32.xlu1 %v6266_v38  ;;  %v6294_v31 = vsel %vm7645_vm3, %v1805_v45, -1e+30  ;;  %v2292_v38 = vmul.f32 0.2, %v2260_v43  ;;  %v7653_v45 = vld [vmem:[#allocation37_spill] sm:$0xff] }
 0x369   : > { %7646 = vst [vmem:[#allocation25_spill] sm:$0xff] %v6294_v31  ;;  %v1761_v6 = vadd.f32 %v6098_v51, %v7653_v45  ;;  %v7658_v45 = vld [vmem:[#allocation40_spill] sm:$0xff] }
 0x36a   : > { %v2308_v3 = vsel %vm2276_vm11, %v2260_v43, %v2292_v38  ;;  %v2261_v38 = vadd.f32 %v6132_v34, %v7658_v45  ;;  %vm1778_vm11 = vcmp.gt.f32.partialorder %v1762_v4, 0.0 }
 0x36b   : > { %v6320_v54 = vsel %vm7655_vm15, %v2308_v3, -1e+30  ;;  %v1810_v61 = vsel %vm1778_vm11, %v1762_v4, %v1794_v52  ;;  %vm1152_vm11 = vcmask 64512  }
 0x36c   : > { %1845 = vmax.xlane.f32.xlu0 %v6276_v29  ;;  %1843 = vmax.xlane.f32.xlu1 %v6280_v27  ;;  %v1759_v27 = vadd.f32 %v6098_v51, %v7648_v28  ;;  %v2307_v28 = vsel %vm2275_vm10, %v2259_v56, %v2291_v50  ;;  %7656 = vst [vmem:[#allocation31_spill] sm:$0xff] %v6320_v54  ;;  %v1793_v50 = vmul.f32 0.2, %v1761_v6  ;;  %vm1777_vm10 = vcmp.gt.f32.partialorder %v1761_v6, 0.0 }
 0x36d   : > { %v6324_v51 = vsel %vm7657_vm6, %v2307_v28, -1e+30 }
 0x36e   : > { %v1791_v60 = vmul.f32 0.2, %v1759_v27  ;;  %vm1775_vm3 = vcmp.gt.f32.partialorder %v1759_v27, 0.0  ;;  %v1809_v45 = vsel %vm1777_vm10, %v1761_v6, %v1793_v50  ;;  %vm1662_vm10 = vcmask 130112  }
 0x36f   : > { %v6350_v4 = vsel %vm479_vm12, %v1809_v45, -1e+30 }
 0x370   : > { %1849 = vmax.xlane.f32.xlu0 %v6290_v1  ;;  %1847 = vmax.xlane.f32.xlu1 %v6294_v31  ;;  %v1792_v31 = vmul.f32 0.2, %v1760_v41  ;;  %v1807_v56 = vsel %vm1775_vm3, %v1759_v27, %v1791_v60  ;;  %v7661_v60 = vld [vmem:[#allocation42_spill] sm:$0xff]  ;;  %vm2277_vm3 = vcmp.gt.f32.partialorder %v2261_v38, 0.0  ;;  %7664 = vst [vmem:[#allocation32_spill] sm:$0xff] %v6350_v4 }
 0x371   : > { %v6336_v28 = vsel %vm477_vm9, %v1807_v56, -1e+30  ;;  %v2264_v27 = vadd.f32 %v6132_v34, %v7661_v60 }
 0x372   : > { %v1808_v43 = vsel %vm1776_vm5, %v1760_v41, %v1792_v31  ;;  %7660 = vst [vmem:[#allocation29_spill] sm:$0xff] %v6336_v28  ;;  %v2293_v31 = vmul.f32 0.2, %v2261_v38  ;;  %v7662_v41 = vld [vmem:[#allocation38_spill] sm:$0xff]  ;;  %vm2278_vm5 = vcmp.gt.f32.partialorder %v2262_v48, 0.0 }
 0x373   : > { %v6332_v3 = vsel %vm478_vm4, %v1808_v43, -1e+30  ;;  %v2263_v33 = vadd.f32 %v6132_v34, %v7662_v41  ;;  %v6346_v43 = vsel %vm7557_vm13, %v1810_v61, -1e+30  ;;  %v2310_v6 = vsel %vm2278_vm5, %v2262_v48, %v2294_v47 }
 0x374   : > { %2347 = vmax.xlane.f32.xlu0 %v6304_v36  ;;  %2345 = vmax.xlane.f32.xlu1 %v6308_v11  ;;  %7659 = vst [vmem:[#allocation34_spill] sm:$0xff] %v6332_v3  ;;  %7663 = vst [vmem:[#allocation36_spill] sm:$0xff] %v6346_v43  ;;  %v2309_v52 = vsel %vm2277_vm3, %v2261_v38, %v2293_v31  ;;  %v2296_v56 = vmul.f32 0.2, %v2264_v27  ;;  %vm2280_vm15 = vcmp.gt.f32.partialorder %v2264_v27, 0.0  ;;  %v7669_v31 = vld [vmem:[#allocation18_spill] sm:$0xff] }
 0x375   : > { %v2295_v50 = vmul.f32 0.2, %v2263_v33  ;;  %vm2279_vm6 = vcmp.gt.f32.partialorder %v2263_v33, 0.0  ;;  %v6356_v34 = vsel %vm478_vm4, %v2310_v6, -1e+30  ;;  %v7670_v6 = vld [vmem:[#allocation23_spill] sm:$0xff] }
 0x376   : > { %7665 = vst [vmem:[#allocation33_spill] sm:$0xff] %v6356_v34  ;;  %v6360_v61 = vsel %vm477_vm9, %v2309_v52, -1e+30  ;;  %v2312_v45 = vsel %vm2280_vm15, %v2264_v27, %v2296_v56  ;;  %vm2164_vm5 = vcmask 195712   ;;  %vm2666_vm3 = vcmask 261312  }
 0x377   : > { %7666 = vst [vmem:[#allocation30_spill] sm:$0xff] %v6360_v61  ;;  %v2311_v60 = vsel %vm2279_vm6, %v2263_v33, %v2295_v50  ;;  %v6366_v47 = vsel %vm7557_vm13, %v2312_v45, -1e+30  ;;  %vm2842_vm15 = vcmask 261120  }
 0x378   : > { %2351 = vmax.xlane.f32.xlu0 %v6320_v54  ;;  %2349 = vmax.xlane.f32.xlu1 %v6324_v51  ;;  %7667 = vst [vmem:[#allocation43_spill] sm:$0xff] %v6366_v47  ;;  %v6370_v48 = vsel %vm479_vm12, %v2311_v60, -1e+30  ;;  %v7672_v54 = vld [vmem:[#allocation51_spill] sm:$0xff] }
 0x379   : > { %7668 = vst [vmem:[#allocation39_spill] sm:$0xff] %v6370_v48 }
 0x37c   : > { %1853 = vmax.xlane.f32.xlu0 %v6332_v3  ;;  %1851 = vmax.xlane.f32.xlu1 %v6336_v28 }
 0x380   : > { %1857 = vmax.xlane.f32.xlu0 %v6346_v43  ;;  %1855 = vmax.xlane.f32.xlu1 %v6350_v4 }
 0x384   : > { %2355 = vmax.xlane.f32.xlu0 %v6356_v34  ;;  %2353 = vmax.xlane.f32.xlu1 %v6360_v61 }
 0x388   : > { %2359 = vmax.xlane.f32.xlu0 %v6366_v47  ;;  %2357 = vmax.xlane.f32.xlu1 %v6370_v48 }
 0x399   : > { %v906_v38 = vpop.xlane.xlu0 %905  ;;  %1979 = vrot.lane.b32.xlu1 %v7669_v31, %s5274_s27  ;;  %v904_v41 = vpop.xlane.xlu1 %903 }
 0x39a   : > { %v935_v63 = vsub.f32 %v5897_v46, %v904_v41  ;;  %v936_v21 = vsub.f32 %v7671_v39, %v906_v38 }
 0x39c   : > { %v951_v48 = vmul.f32 1.442695, %v935_v63  ;;  %v953_v4 = vmul.f32 1.442695, %v936_v21 }
 0x39d   : > { %v910_v27 = vpop.xlane.xlu0 %909  ;;  %2481 = vrot.lane.b32.xlu1 %v7669_v31, %s5275_s15  ;;  %v908_v33 = vpop.xlane.xlu1 %907 }
 0x39e   : > { %1491 = vrot.lane.b32.xlu0 %v7670_v6, %s5273_s22  ;;  %v937_v34 = vsub.f32 %v5911_v53, %v908_v33  ;;  %4782 = vpow2.f32 %v951_v48  ;;  %v938_v11 = vsub.f32 %v7672_v54, %v910_v27  ;;  %v7673_v48 = vld [vmem:[#allocation59_spill] sm:$0xff]  ;;  %v7675_v27 = vld [vmem:[#allocation56_spill] sm:$0xff] }
 0x39f   : > { %4784 = vpow2.f32 %v953_v4 }
 0x3a0   : > { %v955_v46 = vmul.f32 1.442695, %v937_v34  ;;  %v7674_v34 = vld [vmem:[#allocation57_spill] sm:$0xff] }
 0x3a1   : > { %v1320_v52 = vpop.xlane.xlu0 %1319  ;;  %v1318_v56 = vpop.xlane.xlu1 %1317 }
 0x3a2   : > { %v1349_v31 = vsub.f32 %v5929_v57, %v1318_v56  ;;  %v957_v57 = vmul.f32 1.442695, %v938_v11  ;;  %v1350_v53 = vsub.f32 %v5923_v12, %v1320_v52 }
 0x3a4   : > { %v1365_v43 = vmul.f32 1.442695, %v1349_v31  ;;  %v1367_v54 = vmul.f32 1.442695, %v1350_v53 }
 0x3a5   : > { %v1324_v50 = vpop.xlane.xlu0 %1323  ;;  %v1322_v45 = vpop.xlane.xlu1 %1321 }
 0x3a6   : > { %4786 = vpow2.f32 %v1365_v43  ;;  %v1351_v43 = vsub.f32 %v7674_v34, %v1322_v45  ;;  %v1352_v52 = vsub.f32 %v7675_v27, %v1324_v50  ;;  %v7676_v50 = vld [vmem:[#allocation58_spill] sm:$0xff]  ;;  %v7677_v34 = vld [vmem:[#allocation63_spill] sm:$0xff]  ;;  %v7678_v27 = vld [vmem:[#allocation65_spill] sm:$0xff] }
 0x3a7   : > { %4788 = vpow2.f32 %v955_v46 }
 0x3a8   : > { %v6393_v4 = vpop.eup %4782  ;;  %v1369_v56 = vmul.f32 1.442695, %v1351_v43 }
 0x3a9   : > { %v6380_v60 = vpop.xlane.xlu0 %913  ;;  %v912_v62 = vpop.xlane.xlu1 %911 }
 0x3aa   : > { %v939_v3 = vsub.f32 %v5965_v20, %v912_v62 }
 0x3ac   : > { %v959_v38 = vmul.f32 1.442695, %v939_v3 }
 0x3ad   : > { %v918_v47 = vpop.xlane.xlu0 %917  ;;  %v916_v61 = vpop.xlane.xlu1 %915 }
 0x3ae   : > { %v941_v63 = vsub.f32 %v5980_v10, %v916_v61  ;;  %4790 = vpow2.f32 %v959_v38  ;;  %v942_v20 = vsub.f32 %v7673_v48, %v918_v47  ;;  %v6402_v61 = vpop.eup %4784 }
 0x3af   : > { %4792 = vpow2.f32 %v957_v57  ;;  %v940_v57 = vsub.f32 %v7676_v50, %v6380_v60 }
 0x3b0   : > { %v963_v62 = vmul.f32 1.442695, %v941_v63  ;;  %v965_v12 = vmul.f32 1.442695, %v942_v20  ;;  %v6404_v47 = vpop.eup %4786  ;;  %v1371_v63 = vmul.f32 1.442695, %v1352_v52 }
 0x3b1   : > { %v1328_v6 = vpop.xlane.xlu0 %1327  ;;  %v1326_v28 = vpop.xlane.xlu1 %1325 }
 0x3b2   : > { %4794 = vpow2.f32 %v963_v62  ;;  %v1353_v11 = vsub.f32 %v5998_v42, %v1326_v28  ;;  %v1354_v46 = vsub.f32 %v5990_v5, %v1328_v6  ;;  %v6412_v42 = vpop.eup %4788 }
 0x3b3   : > { %4796 = vpow2.f32 %v1367_v54  ;;  %v961_v54 = vmul.f32 1.442695, %v940_v57 }
 0x3b4   : > { %4798 = vpow2.f32 %v965_v12  ;;  %v1373_v38 = vmul.f32 1.442695, %v1353_v11  ;;  %v1375_v20 = vmul.f32 1.442695, %v1354_v46  ;;  %v7679_v46 = vld [vmem:[#allocation66_spill] sm:$0xff] }
 0x3b5   : > { %v1332_v41 = vpop.xlane.xlu0 %1331  ;;  %v1330_v39 = vpop.xlane.xlu1 %1329  ;;  %4800 = vpow2.f32 %v1369_v56 }
 0x3b6   : > { %4802 = vpow2.f32 %v1373_v38  ;;  %v1355_v5 = vsub.f32 %v6018_v13, %v1330_v39  ;;  %v1356_v43 = vsub.f32 %v7677_v34, %v1332_v41 }
 0x3b7   : > { %4804 = vpow2.f32 %v1371_v63 }
 0x3b8   : > { %v6414_v28 = vpop.eup %4790  ;;  %4806 = vpow2.f32 %v1375_v20  ;;  %v1377_v11 = vmul.f32 1.442695, %v1355_v5  ;;  %v1379_v56 = vmul.f32 1.442695, %v1356_v43 }
 0x3b9   : > { %v922_v21 = vpop.xlane.xlu0 %921  ;;  %v6390_v33 = vpop.xlane.xlu1 %919  ;;  %4808 = vpow2.f32 %v961_v54 }
 0x3ba   : > { %v6423_v6 = vpop.eup %4792  ;;  %v944_v52 = vsub.f32 %v7678_v27, %v922_v21  ;;  %v943_v41 = vsub.f32 %v7679_v46, %v6390_v33  ;;  %4810 = vpow2.f32 %v1377_v11  ;;  %v7680_v27 = vld [vmem:[#allocation67_spill] sm:$0xff] }
 0x3bb   : > { %4812 = vpow2.f32 %v1379_v56 }
 0x3bc   : > { %v6425_v62 = vpop.eup %4794  ;;  %v969_v50 = vmul.f32 1.442695, %v944_v52  ;;  %v967_v5 = vmul.f32 1.442695, %v943_v41 }
 0x3bd   : > { %v6396_v3 = vpop.xlane.xlu0 %925  ;;  %983 = vadd.xlane.f32.xlu0 %v6393_v4  ;;  %v6399_v10 = vpop.xlane.xlu1 %923 }
 0x3be   : > { %v6433_v13 = vpop.eup %4796  ;;  %v945_v33 = vsub.f32 %v6049_v35, %v6399_v10  ;;  %4814 = vpow2.f32 %v969_v50  ;;  %v946_v52 = vsub.f32 %v7680_v27, %v6396_v3  ;;  %v7681_v27 = vld [vmem:[#allocation72_spill] sm:$0xff] }
 0x3bf   : > { %v6435_v39 = vpop.eup %4798  ;;  %4816 = vpow2.f32 %v967_v5 }
 0x3c0   : > { %v6444_v57 = vpop.eup %4800  ;;  %v971_v35 = vmul.f32 1.442695, %v945_v33  ;;  %v973_v50 = vmul.f32 1.442695, %v946_v52 }
 0x3c1   : > { %v6407_v31 = vpop.xlane.xlu0 %1335  ;;  %985 = vadd.xlane.f32.xlu0 %v6402_v61  ;;  %1397 = vadd.xlane.f32.xlu1 %v6404_v47  ;;  %v1334_v45 = vpop.xlane.xlu1 %1333 }
 0x3c2   : > { %v1357_v21 = vsub.f32 %v6067_v2, %v1334_v45  ;;  %v6446_v20 = vpop.eup %4802  ;;  %v1358_v3 = vsub.f32 %v6061_v7, %v6407_v31 }
 0x3c3   : > { %v6455_v45 = vpop.eup %4804 }
 0x3c4   : > { %v1381_v43 = vmul.f32 1.442695, %v1357_v21  ;;  %v6457_v11 = vpop.eup %4806 }
 0x3c5   : > { %v6418_v53 = vpop.xlane.xlu0 %1339  ;;  %987 = vadd.xlane.f32.xlu0 %v6412_v42  ;;  %991 = vadd.xlane.f32.xlu1 %v6414_v28  ;;  %v1338_v48 = vpop.xlane.xlu1 %1337 }
 0x3c6   : > { %v1359_v2 = vsub.f32 %v6088_v15, %v1338_v48  ;;  %4818 = vpow2.f32 %v1381_v43  ;;  %v6466_v48 = vpop.eup %4808  ;;  %v1360_v7 = vsub.f32 %v7681_v27, %v6418_v53 }
 0x3c7   : > { %v6468_v41 = vpop.eup %4810  ;;  %4820 = vpow2.f32 %v971_v35 }
 0x3c8   : > { %v1385_v46 = vmul.f32 1.442695, %v1359_v2  ;;  %v1383_v2 = vmul.f32 1.442695, %v1358_v3 }
 0x3c9   : > { %v930_v60 = vpop.xlane.xlu0 %929  ;;  %989 = vadd.xlane.f32.xlu0 %v6423_v6  ;;  %995 = vadd.xlane.f32.xlu1 %v6425_v62  ;;  %v6430_v12 = vpop.xlane.xlu1 %927 }
 0x3ca   : > { %v948_v15 = vsub.f32 %v6102_v19, %v930_v60  ;;  %4822 = vpow2.f32 %v1385_v46  ;;  %v6477_v60 = vpop.eup %4812  ;;  %v947_v53 = vsub.f32 %v6108_v18, %v6430_v12 }
 0x3cb   : > { %v6479_v43 = vpop.eup %4814  ;;  %4824 = vpow2.f32 %v973_v50 }
 0x3cc   : > { %v977_v33 = vmul.f32 1.442695, %v948_v15  ;;  %v1387_v15 = vmul.f32 1.442695, %v1360_v7 }
 0x3cd   : > { %v6439_v38 = vpop.xlane.xlu0 %933  ;;  %1399 = vadd.xlane.f32.xlu0 %v6433_v13  ;;  %997 = vadd.xlane.f32.xlu1 %v6435_v39  ;;  %v932_v63 = vpop.xlane.xlu1 %931 }
 0x3ce   : > { %v949_v19 = vsub.f32 %v6123_v32, %v932_v63  ;;  %4826 = vpow2.f32 %v977_v33  ;;  %v6488_v63 = vpop.eup %4816  ;;  %v950_v18 = vsub.f32 %v6119_v25, %v6439_v38 }
 0x3cf   : > { %4828 = vpow2.f32 %v1383_v2  ;;  %v975_v2 = vmul.f32 1.442695, %v947_v53 }
 0x3d0   : > { %v979_v35 = vmul.f32 1.442695, %v949_v19  ;;  %v6490_v46 = vpop.eup %4818 }
 0x3d1   : > { %v6450_v54 = vpop.xlane.xlu0 %1343  ;;  %1401 = vadd.xlane.f32.xlu0 %v6444_v57  ;;  %1405 = vadd.xlane.f32.xlu1 %v6446_v20  ;;  %v1342_v34 = vpop.xlane.xlu1 %1341 }
 0x3d2   : > { %v1361_v32 = vsub.f32 %v6140_v59, %v1342_v34  ;;  %4830 = vpow2.f32 %v979_v35  ;;  %v6501_v34 = vpop.eup %4820  ;;  %v1362_v25 = vsub.f32 %v6136_v30, %v6450_v54 }
 0x3d3   : > { %4832 = vpow2.f32 %v1387_v15 }
 0x3d4   : > { %v1389_v33 = vmul.f32 1.442695, %v1361_v32  ;;  %v6503_v19 = vpop.eup %4822  ;;  %v981_v32 = vmul.f32 1.442695, %v950_v18 }
 0x3d5   : > { %v6461_v10 = vpop.xlane.xlu0 %1347  ;;  %1403 = vadd.xlane.f32.xlu0 %v6455_v45  ;;  %1407 = vadd.xlane.f32.xlu1 %v6457_v11  ;;  %v1346_v56 = vpop.xlane.xlu1 %1345 }
 0x3d6   : > { %v1363_v59 = vsub.f32 %v6156_v55, %v1346_v56  ;;  %4834 = vpow2.f32 %v1389_v33  ;;  %v6512_v56 = vpop.eup %4824  ;;  %v1364_v30 = vsub.f32 %v6152_v0, %v6461_v10 }
 0x3d7   : > { %4836 = vpow2.f32 %v975_v2 }
 0x3d8   : > { %v1393_v7 = vmul.f32 1.442695, %v1363_v59  ;;  %v6514_v35 = vpop.eup %4826  ;;  %v1391_v59 = vmul.f32 1.442695, %v1362_v25 }
 0x3d9   : > { %v6472_v21 = vpop.xlane.xlu0 %1829  ;;  %993 = vadd.xlane.f32.xlu0 %v6466_v48  ;;  %1409 = vadd.xlane.f32.xlu1 %v6468_v41  ;;  %v1828_v5 = vpop.xlane.xlu1 %1827 }
 0x3da   : > { %v1859_v55 = vsub.f32 %v6168_v14, %v1828_v5  ;;  %4838 = vpow2.f32 %v1393_v7  ;;  %v6525_v5 = vpop.eup %4828  ;;  %v1860_v0 = vsub.f32 %v6164_v9, %v6472_v21 }
 0x3db   : > { %4840 = vpow2.f32 %v981_v32 }
 0x3dc   : > { %v1875_v53 = vmul.f32 1.442695, %v1859_v55  ;;  %v6527_v33 = vpop.eup %4830  ;;  %v1395_v55 = vmul.f32 1.442695, %v1364_v30 }
 0x3dd   : > { %v6483_v31 = vpop.xlane.xlu0 %1833  ;;  %1001 = vadd.xlane.f32.xlu0 %v6479_v43  ;;  %1411 = vadd.xlane.f32.xlu1 %v6477_v60  ;;  %v1832_v52 = vpop.xlane.xlu1 %1831 }
 0x3de   : > { %v1861_v14 = vsub.f32 %v6182_v23, %v1832_v52  ;;  %4842 = vpow2.f32 %v1875_v53  ;;  %v1862_v23 = vsub.f32 %v6178_v58, %v6483_v31  ;;  %v6539_v18 = vpop.eup %4832 }
 0x3df   : > { %4844 = vpow2.f32 %v1391_v59 }
 0x3e0   : > { %v1879_v52 = vmul.f32 1.442695, %v1861_v14  ;;  %v6541_v7 = vpop.eup %4834  ;;  %v1881_v25 = vmul.f32 1.442695, %v1862_v23  ;;  %v1877_v14 = vmul.f32 1.442695, %v1860_v0 }
 0x3e1   : > { %v6494_v50 = vpop.xlane.xlu0 %2331  ;;  %999 = vadd.xlane.f32.xlu1 %v6488_v63  ;;  %1413 = vadd.xlane.f32.xlu0 %v6490_v46  ;;  %v6498_v3 = vpop.xlane.xlu1 %2329  ;;  %7682 = vst [vmem:[#allocation41_spill] sm:$0xff] %v6541_v7 }
 0x3e2   : > { %4846 = vpow2.f32 %v1879_v52  ;;  %v2362_v58 = vsub.f32 %v6192_v49, %v6494_v50  ;;  %v6553_v31 = vpop.eup %4836  ;;  %v2361_v9 = vsub.f32 %v6196_v22, %v6498_v3 }
 0x3e3   : > { %4848 = vpow2.f32 %v1395_v55 }
 0x3e4   : > { %v6555_v53 = vpop.eup %4838  ;;  %4850 = vpow2.f32 %v1881_v25  ;;  %v2379_v30 = vmul.f32 1.442695, %v2362_v58  ;;  %v2377_v52 = vmul.f32 1.442695, %v2361_v9 }
 0x3e5   : > { %v6507_v12 = vpop.xlane.xlu0 %2335  ;;  %1003 = vadd.xlane.f32.xlu1 %v6501_v34  ;;  %1417 = vadd.xlane.f32.xlu0 %v6503_v19  ;;  %v2334_v27 = vpop.xlane.xlu1 %2333  ;;  %7683 = vst [vmem:[#allocation37_spill] sm:$0xff] %v6555_v53  ;;  %4852 = vpow2.f32 %v1877_v14 }
 0x3e6   : > { %v2363_v49 = vsub.f32 %v6210_v40, %v2334_v27  ;;  %v6566_v50 = vpop.eup %4840  ;;  %4854 = vpow2.f32 %v2379_v30  ;;  %v2364_v3 = vsub.f32 %v6206_v16, %v6507_v12 }
 0x3e7   : > { %7684 = vst [vmem:[#allocation44_spill] sm:$0xff] %v6566_v50  ;;  %4856 = vpow2.f32 %v2377_v52 }
 0x3e8   : > { %v6568_v23 = vpop.eup %4842  ;;  %v2381_v0 = vmul.f32 1.442695, %v2363_v49  ;;  %v2383_v14 = vmul.f32 1.442695, %v2364_v3 }
 0x3e9   : > { %v6518_v38 = vpop.xlane.xlu0 %1837  ;;  %1005 = vadd.xlane.f32.xlu1 %v6512_v56  ;;  %1009 = vadd.xlane.f32.xlu0 %v6514_v35  ;;  %v6522_v15 = vpop.xlane.xlu1 %1835  ;;  %7685 = vst [vmem:[#allocation40_spill] sm:$0xff] %v6568_v23 }
 0x3ea   : > { %v6578_v40 = vpop.eup %4844  ;;  %4858 = vpow2.f32 %v2381_v0 }
 0x3eb   : > { %7686 = vst [vmem:[#allocation42_spill] sm:$0xff] %v6578_v40  ;;  %4860 = vpow2.f32 %v2383_v14 }
 0x3ec   : > { %v6580_v27 = vpop.eup %4846 }
 0x3ed   : > { %v6531_v54 = vpop.xlane.xlu0 %1841  ;;  %1415 = vadd.xlane.f32.xlu1 %v6525_v5  ;;  %1011 = vadd.xlane.f32.xlu0 %v6527_v33  ;;  %v6535_v2 = vpop.xlane.xlu1 %1839  ;;  %7687 = vst [vmem:[#allocation38_spill] sm:$0xff] %v6580_v27 }
 0x3ee   : > { %v6588_v9 = vpop.eup %4848 }
 0x3ef   : > { %7688 = vst [vmem:[#allocation18_spill] sm:$0xff] %v6588_v9  ;;  %v6590_v30 = vpop.eup %4850 }
 0x3f0   : > { %7689 = vst [vmem:[#allocation50_spill] sm:$0xff] %v6590_v30  ;;  %v6598_v49 = vpop.eup %4852 }
 0x3f1   : > { %v6545_v10 = vpop.xlane.xlu0 %2339  ;;  %1419 = vadd.xlane.f32.xlu1 %v6539_v18  ;;  %1421 = vadd.xlane.f32.xlu0 %v6541_v7  ;;  %v6549_v32 = vpop.xlane.xlu1 %2337  ;;  %7690 = vst [vmem:[#allocation51_spill] sm:$0xff] %v6598_v49 }
 0x3f2   : > { %v6600_v52 = vpop.eup %4854 }
 0x3f3   : > { %7691 = vst [vmem:[#allocation59_spill] sm:$0xff] %v6600_v52  ;;  %v6608_v0 = vpop.eup %4856 }
 0x3f4   : > { %7692 = vst [vmem:[#allocation57_spill] sm:$0xff] %v6608_v0 }
 0x3f5   : > { %v6559_v21 = vpop.xlane.xlu0 %2343  ;;  %1007 = vadd.xlane.f32.xlu1 %v6553_v31  ;;  %1425 = vadd.xlane.f32.xlu0 %v6555_v53  ;;  %v6563_v59 = vpop.xlane.xlu1 %2341 }
 0x3f9   : > { %v6570_v55 = vpop.xlane.xlu0 %1845  ;;  %1013 = vadd.xlane.f32.xlu1 %v6566_v50  ;;  %1907 = vadd.xlane.f32.xlu0 %v6568_v23  ;;  %v6574_v22 = vpop.xlane.xlu1 %1843 }
 0x3fa   : > { %v6610_v23 = vpop.eup %4858 }
 0x3fb   : > { %7693 = vst [vmem:[#allocation56_spill] sm:$0xff] %v6610_v23 }
 0x3fd   : > { %v6582_v25 = vpop.xlane.xlu0 %1849  ;;  %1423 = vadd.xlane.f32.xlu1 %v6578_v40  ;;  %1911 = vadd.xlane.f32.xlu0 %v6580_v27  ;;  %v6586_v58 = vpop.xlane.xlu1 %1847 }
 0x401   : > { %v6592_v16 = vpop.xlane.xlu0 %2347  ;;  %1427 = vadd.xlane.f32.xlu1 %v6588_v9  ;;  %1913 = vadd.xlane.f32.xlu0 %v6590_v30  ;;  %v6596_v12 = vpop.xlane.xlu1 %2345 }
 0x402   : > { %v6618_v9 = vpop.eup %4860 }
 0x403   : > { %7696 = vst [vmem:[#allocation65_spill] sm:$0xff] %v6618_v9 }
 0x405   : > { %v6602_v27 = vpop.xlane.xlu0 %2351  ;;  %1909 = vadd.xlane.f32.xlu1 %v6598_v49  ;;  %2411 = vadd.xlane.f32.xlu0 %v6600_v52  ;;  %v6606_v3 = vpop.xlane.xlu1 %2349 }
 0x409   : > { %v6612_v30 = vpop.xlane.xlu0 %1853  ;;  %2409 = vadd.xlane.f32.xlu1 %v6608_v0  ;;  %2413 = vadd.xlane.f32.xlu0 %v6610_v23  ;;  %v6616_v14 = vpop.xlane.xlu1 %1851 }
 0x40a   : > { %7694 = vst [vmem:[#allocation58_spill] sm:$0xff] %v6612_v30  ;;  %7695 = vst [vmem:[#allocation63_spill] sm:$0xff] %v6616_v14  ;;  %v7703_v14 = vld [vmem:[#allocation17_spill] sm:$0xff] }
 0x40d   : > { %v6620_v53 = vpop.xlane.xlu0 %1857  ;;  %2415 = vadd.xlane.f32.xlu0 %v6618_v9  ;;  %v6623_v52 = vpop.xlane.xlu1 %1855 }
 0x40e   : > { %7697 = vst [vmem:[#allocation66_spill] sm:$0xff] %v6620_v53  ;;  %7698 = vst [vmem:[#allocation67_spill] sm:$0xff] %v6623_v52  ;;  %v7704_v52 = vld [vmem:[#allocation20_spill] sm:$0xff]  ;;  %v1865_v53 = vsub.f32 %v6238_v24, %v6535_v2 }
 0x40f   : > { %v7706_v24 = vld [vmem:[#allocation28_spill] sm:$0xff] }
 0x411   : > { %v6625_v49 = vpop.xlane.xlu0 %2355  ;;  %v6627_v40 = vpop.xlane.xlu1 %2353 }
 0x412   : > { %7699 = vst [vmem:[#allocation72_spill] sm:$0xff] %v6625_v49  ;;  %7700 = vst [vmem:[#allocation73_spill] sm:$0xff] %v6627_v40  ;;  %v1863_v40 = vsub.f32 %v6224_v44, %v6522_v15 }
 0x414   : > { %v1883_v49 = vmul.f32 1.442695, %v1863_v40 }
 0x415   : > { %v6629_v7 = vpop.xlane.xlu0 %2359  ;;  %v6631_v30 = vpop.xlane.xlu1 %2357 }
 0x416   : > { %7701 = vst [vmem:[#allocation74_spill] sm:$0xff] %v6629_v7  ;;  %7702 = vst [vmem:[#allocation75_spill] sm:$0xff] %v6631_v30  ;;  %v1864_v7 = vsub.f32 %v6220_v17, %v6518_v38  ;;  %v1866_v30 = vsub.f32 %v6234_v37, %v6531_v54  ;;  %v2365_v17 = vsub.f32 %v6252_v26, %v6549_v32  ;;  %v7705_v38 = vld [vmem:[#allocation26_spill] sm:$0xff] }
 0x417   : > { %v2367_v15 = vsub.f32 %v7705_v38, %v6563_v59  ;;  %v2368_v54 = vsub.f32 %v7706_v24, %v6559_v21 }
 0x418   : > { %v1889_v50 = vmul.f32 1.442695, %v1866_v30  ;;  %v2385_v37 = vmul.f32 1.442695, %v2365_v17 }
 0x419   : > { %v1492_v0 = vpop.permute.xlu0 %1491  ;;  %v6633_v23 = vpop.permute.xlu1 %1979  ;;  %v2389_v2 = vmul.f32 1.442695, %v2367_v15 }
 0x41a   : > { %4437 = vmatprep.subr.bf16.mxu0 %v1492_v0  ;;  %1981 = vrot.lane.b32.xlu1 %v7703_v14, %s5274_s27 }
 0x41b   : > { %4455 = vmatprep.subr.bf16.mxu1 %v6633_v23  ;;  %4438 = vmatpush3.bf16.msra.mxu0 %v1492_v0  ;;  %v1885_v0 = vmul.f32 1.442695, %v1864_v7 }
 0x41d   : > { %v6638_v9 = vpop.permute.xlu1 %2481  ;;  %4862 = vpow2.f32 %v1885_v0 }
 0x41e   : > { %1983 = vrot.lane.b32.xlu1 %v7704_v52, %s5274_s27  ;;  %4487 = vmatprep.subr.bf16.mxu0 %v6638_v9  ;;  %4864 = vpow2.f32 %v1883_v49 }
 0x41f   : > { %4866 = vpow2.f32 %v1889_v50 }
 0x422   : > { %2485 = vrot.lane.b32.xlu1 %v7704_v52, %s5275_s15  ;;  %v2366_v52 = vsub.f32 %v6248_v8, %v6545_v10  ;;  %v2391_v8 = vmul.f32 1.442695, %v2368_v54 }
 0x423   : > { %2483 = vrot.lane.b32.xlu0 %v7703_v14, %s5275_s15  ;;  %v1887_v14 = vmul.f32 1.442695, %v1865_v53 }
 0x424   : > { %v2387_v44 = vmul.f32 1.442695, %v2366_v52 }
 0x425   : > { %4868 = vpow2.f32 %v1887_v14 }
 0x426   : > { %4870 = vpow2.f32 %v2387_v44 }
 0x427   : > { %v6663_v7 = vpop.eup %4862  ;;  %4872 = vpow2.f32 %v2385_v37 }
 0x428   : > { %4874 = vpow2.f32 %v2389_v2  ;;  %v6666_v26 = vpop.eup %4864 }
 0x429   : > { %v6668_v10 = vpop.eup %4866  ;;  %4876 = vpow2.f32 %v2391_v8 }
 0x42f   : > { %v6672_v32 = vpop.eup %4868 }
 0x430   : > { %v6674_v53 = vpop.eup %4870 }
 0x431   : > { %v6678_v59 = vpop.eup %4872 }
 0x432   : > { %v6680_v50 = vpop.eup %4874 }
 0x433   : > { %7707 = vst [vmem:[#allocation17_spill] sm:$0xff] %v6680_v50  ;;  %v6684_v49 = vpop.eup %4876 }
 0x434   : > { %7708 = vst [vmem:[#allocation20_spill] sm:$0xff] %v6684_v49 }
 0x442   : > { %1917 = vadd.xlane.f32.xlu0 %v6663_v7 }
 0x446   : > { %1921 = vadd.xlane.f32.xlu0 %v6668_v10  ;;  %1915 = vadd.xlane.f32.xlu1 %v6666_v26 }
 0x44a   : > { %v984_v21 = vpop.xlane.xlu0 %983  ;;  %2419 = vadd.xlane.f32.xlu0 %v6674_v53  ;;  %1919 = vadd.xlane.f32.xlu1 %v6672_v32 }
 0x44b   : > { %4878 = vrcp.f32 %v984_v21 }
 0x44e   : > { %v986_v40 = vpop.xlane.xlu0 %985  ;;  %2417 = vadd.xlane.f32.xlu1 %v6678_v59  ;;  %2421 = vadd.xlane.f32.xlu0 %v6680_v50  ;;  %v1398_v30 = vpop.xlane.xlu1 %1397 }
 0x44f   : > { %4880 = vrcp.f32 %v986_v40 }
 0x452   : > { %v988_v0 = vpop.xlane.xlu0 %987  ;;  %2423 = vadd.xlane.f32.xlu0 %v6684_v49  ;;  %v992_v52 = vpop.xlane.xlu1 %991 }
 0x453   : > { %4882 = vrcp.f32 %v988_v0  ;;  %v7709_v0 = vld [vmem:[#allocation19_spill] sm:$0xff] }
 0x455   : > { %v4879_v44 = vpop.eup %4878 }
 0x456   : > { %v990_v14 = vpop.xlane.xlu0 %989  ;;  %v996_v17 = vpop.xlane.xlu1 %995  ;;  %v1031_v24 = vmul.f32 %v4879_v44, %v6393_v4  ;;  %v7710_v44 = vld [vmem:[#allocation22_spill] sm:$0xff] }
 0x457   : > { %4884 = vrcp.f32 %v990_v14 }
 0x458   : > { %4886 = vrcp.f32 %v1398_v30 }
 0x459   : > { %v4881_v38 = vpop.eup %4880 }
 0x45a   : > { %v1400_v15 = vpop.xlane.xlu0 %1399  ;;  %v998_v37 = vpop.xlane.xlu1 %997  ;;  %v1032_v54 = vmul.f32 %v4881_v38, %v6402_v61 }
 0x45b   : > { %4888 = vrcp.f32 %v1400_v15 }
 0x45c   : > { %v1047_v2 = vpack.c.bf16 %v1032_v54, %v1031_v24  ;;  %4890 = vrcp.f32 %v998_v37 }
 0x45d   : > { %v4883_v40 = vpop.eup %4882 }
 0x45e   : > { %4407 = vmatprep.mubr.bf16.mxu1 %v1047_v2  ;;  %v1402_v8 = vpop.xlane.xlu0 %1401  ;;  %v1406_v21 = vpop.xlane.xlu1 %1405  ;;  %v1033_v49 = vmul.f32 %v4883_v40, %v6412_v42 }
 0x45f   : > { %1985 = vrot.lane.b32.xlu1 %v7709_v0, %s5274_s27  ;;  %4892 = vrcp.f32 %v1402_v8 }
 0x460   : > { %4894 = vrcp.f32 %v1406_v21 }
 0x461   : > { %v4885_v50 = vpop.eup %4884 }
 0x462   : > { %v1404_v30 = vpop.xlane.xlu0 %1403  ;;  %v1408_v14 = vpop.xlane.xlu1 %1407  ;;  %v1034_v4 = vmul.f32 %v4885_v50, %v6423_v6 }
 0x463   : > { %v4887_v61 = vpop.eup %4886  ;;  %4896 = vrcp.f32 %v1404_v30  ;;  %1987 = vrot.lane.b32.xlu1 %v7710_v44, %s5274_s27 }
 0x464   : > { %4898 = vrcp.f32 %v1408_v14  ;;  %v1048_v38 = vpack.c.bf16 %v1034_v4, %v1033_v49  ;;  %v1445_v54 = vmul.f32 %v4887_v61, %v6404_v47 }
 0x465   : > { %v4889_v15 = vpop.eup %4888  ;;  %4900 = vrcp.f32 %v992_v52 }
 0x466   : > { %4902 = vrcp.f32 %v996_v17  ;;  %v994_v37 = vpop.xlane.xlu0 %993  ;;  %v1410_v24 = vpop.xlane.xlu1 %1409  ;;  %4408 = vmatmul.mubr.bf16.vlgmr.msra.gmra.mrb[0].mxu1 %v1048_v38  ;;  %v1446_v2 = vmul.f32 %v4889_v15, %v6433_v13 }
 0x467   : > { %4904 = vrcp.f32 %v994_v37  ;;  %4456 = vmatpush3.bf16.msra.mxu1 %v6633_v23  ;;  %2489 = vrot.lane.b32.xlu1 %v7710_v44, %s5275_s15  ;;  %v4891_v6 = vpop.eup %4890 }
 0x468   : > { %2487 = vrot.lane.b32.xlu0 %v7709_v0, %s5275_s15  ;;  %v1461_v42 = vpack.c.bf16 %v1446_v2, %v1445_v54  ;;  %4906 = vrcp.f32 %v1410_v24  ;;  %v1038_v15 = vmul.f32 %v4891_v6, %v6435_v39  ;;  %v1868_v54 = vsub.f32 %v6276_v29, %v6570_v55 }
 0x469   : > { %v4893_v52 = vpop.eup %4892  ;;  %v1870_v29 = vsub.f32 %v6290_v1, %v6582_v25 }
 0x46a   : > { %v1002_v50 = vpop.xlane.xlu0 %1001  ;;  %4439 = vmatprep.mubr.bf16.mxu0 %v1461_v42  ;;  %v1412_v49 = vpop.xlane.xlu1 %1411  ;;  %v1447_v8 = vmul.f32 %v4893_v52, %v6444_v57  ;;  %v7711_v42 = vld [vmem:[#allocation27_spill] sm:$0xff] }
 0x46b   : > { %v4895_v17 = vpop.eup %4894  ;;  %4908 = vrcp.f32 %v1412_v49  ;;  %v1867_v39 = vsub.f32 %v7711_v42, %v6574_v22  ;;  %v2370_v22 = vsub.f32 %v6304_v36, %v6592_v16 }
 0x46c   : > { %4910 = vrcp.f32 %v1002_v50  ;;  %v1449_v0 = vmul.f32 %v4895_v17, %v6446_v20 }
 0x46d   : > { %v4897_v47 = vpop.eup %4896  ;;  %v1891_v52 = vmul.f32 1.442695, %v1867_v39 }
 0x46e   : > { %v4899_v13 = vpop.eup %4898  ;;  %v1448_v23 = vmul.f32 %v4897_v47, %v6455_v45  ;;  %v1414_v21 = vpop.xlane.xlu0 %1413 }
 0x46f   : > { %v1000_v40 = vpop.xlane.xlu1 %999  ;;  %v4901_v30 = vpop.eup %4900  ;;  %v1450_v14 = vmul.f32 %v4899_v13, %v6457_v11 }
 0x470   : > { %v4903_v4 = vpop.eup %4902  ;;  %4912 = vrcp.f32 %v1000_v40  ;;  %v1462_v61 = vpack.c.bf16 %v1448_v23, %v1447_v8  ;;  %v1035_v45 = vmul.f32 %v4901_v30, %v6414_v28  ;;  %v1897_v23 = vmul.f32 1.442695, %v1870_v29 }
 0x471   : > { %v4905_v44 = vpop.eup %4904  ;;  %v1463_v38 = vpack.c.bf16 %v1450_v14, %v1449_v0  ;;  %v1037_v20 = vmul.f32 %v4903_v4, %v6425_v62  ;;  %v2395_v40 = vmul.f32 1.442695, %v2370_v22 }
 0x472   : > { %v1418_v37 = vpop.xlane.xlu0 %1417  ;;  %4440 = vmatmul.mubr.bf16.vlgmr.msra.gmra.mrb[16].mxu0 %v1462_v61  ;;  %v1036_v24 = vmul.f32 %v4905_v44, %v6466_v48  ;;  %v4907_v11 = vpop.eup %4906  ;;  %v1893_v48 = vmul.f32 1.442695, %v1868_v54  ;;  %v7714_v44 = vld [vmem:[#allocation31_spill] sm:$0xff] }
 0x473   : > { %v1004_v57 = vpop.xlane.xlu1 %1003  ;;  %4488 = vmatpush3.bf16.msra.mxu0 %v6638_v9  ;;  %4443 = vmatprep.mubr.bf16.mxu0 %v1463_v38  ;;  %v1050_v6 = vpack.c.bf16 %v1038_v15, %v1037_v20  ;;  %v1451_v55 = vmul.f32 %v4907_v11, %v6468_v41  ;;  %v2372_v38 = vsub.f32 %v7714_v44, %v6602_v27  ;;  %v7718_v44 = vld [vmem:[#allocation37_spill] sm:$0xff] }
 0x474   : > { %v1049_v2 = vpack.c.bf16 %v1036_v24, %v1035_v45  ;;  %4914 = vrcp.f32 %v1004_v57 }
 0x475   : > { %v4909_v50 = vpop.eup %4908 }
 0x476   : > { %v1010_v49 = vpop.xlane.xlu0 %1009  ;;  %4411 = vmatprep.mubr.bf16.mxu1 %v1049_v2  ;;  %v1452_v62 = vmul.f32 %v4909_v50, %v6477_v60  ;;  %v4911_v9 = vpop.eup %4910  ;;  %v7712_v60 = vld [vmem:[#allocation25_spill] sm:$0xff]  ;;  %v2399_v2 = vmul.f32 1.442695, %v2372_v38 }
 0x477   : > { %v1006_v28 = vpop.xlane.xlu1 %1005  ;;  %4412 = vmatmul.mubr.bf16.gmra.mrb[4].mxu1 %v1050_v6  ;;  %v1040_v41 = vmul.f32 %v4911_v9, %v6479_v43  ;;  %v1869_v25 = vsub.f32 %v7712_v60, %v6586_v58  ;;  %v7713_v43 = vld [vmem:[#allocation35_spill] sm:$0xff] }
 0x478   : > { %4916 = vrcp.f32 %v1006_v28  ;;  %v1464_v17 = vpack.c.bf16 %v1452_v62, %v1451_v55  ;;  %v2369_v14 = vsub.f32 %v7713_v43, %v6596_v12 }
 0x479   : > { %4918 = vrcp.f32 %v1414_v21  ;;  %v2371_v21 = vsub.f32 %v6324_v51, %v6606_v3 }
 0x47a   : > { %v4913_v47 = vpop.eup %4912  ;;  %v1012_v13 = vpop.xlane.xlu0 %1011  ;;  %4920 = vpow2.f32 %v1893_v48  ;;  %4444 = vmatmul.mubr.bf16.gmra.mrb[20].mxu0 %v1464_v17  ;;  %v2393_v45 = vmul.f32 1.442695, %v2369_v14 }
 0x47b   : > { %v1416_v8 = vpop.xlane.xlu1 %1415  ;;  %v1039_v1 = vmul.f32 %v4913_v47, %v6488_v63  ;;  %v1895_v63 = vmul.f32 1.442695, %v1869_v25  ;;  %v2397_v15 = vmul.f32 1.442695, %v2371_v21  ;;  %v7716_v21 = vld [vmem:[#allocation41_spill] sm:$0xff] }
 0x47c   : > { %4922 = vrcp.f32 %v1416_v8 }
 0x47d   : > { %4924 = vpow2.f32 %v1891_v52  ;;  %v1051_v30 = vpack.c.bf16 %v1040_v41, %v1039_v1  ;;  %v7715_v41 = vld [vmem:[#allocation44_spill] sm:$0xff] }
 0x47e   : > { %4926 = vrcp.f32 %v1418_v37  ;;  %v1422_v36 = vpop.xlane.xlu0 %1421  ;;  %v4915_v0 = vpop.eup %4914 }
 0x47f   : > { %v1420_v16 = vpop.xlane.xlu1 %1419  ;;  %4928 = vpow2.f32 %v1897_v23  ;;  %4415 = vmatprep.mubr.bf16.mxu1 %v1051_v30  ;;  %v1041_v37 = vmul.f32 %v4915_v0, %v6501_v34 }
 0x480   : > { %4930 = vrcp.f32 %v1420_v16 }
 0x481   : > { %4932 = vpow2.f32 %v2395_v40 }
 0x482   : > { %v4917_v4 = vpop.eup %4916  ;;  %4934 = vrcp.f32 %v1010_v49  ;;  %v1426_v58 = vpop.xlane.xlu0 %1425 }
 0x483   : > { %v1008_v61 = vpop.xlane.xlu1 %1007  ;;  %v1042_v51 = vmul.f32 %v4917_v4, %v6512_v56  ;;  %v4919_v3 = vpop.eup %4918 }
 0x484   : > { %4936 = vrcp.f32 %v1008_v61  ;;  %v6733_v57 = vpop.eup %4920  ;;  %v1453_v34 = vmul.f32 %v4919_v3, %v6490_v46 }
 0x485   : > { %4938 = vpow2.f32 %v1895_v63  ;;  %v1052_v24 = vpack.c.bf16 %v1042_v51, %v1041_v37 }
 0x486   : > { %v4923_v12 = vpop.eup %4922  ;;  %4940 = vrcp.f32 %v1012_v13  ;;  %v1908_v54 = vpop.xlane.xlu0 %1907 }
 0x487   : > { %v1014_v20 = vpop.xlane.xlu1 %1013  ;;  %v6735_v11 = vpop.eup %4924  ;;  %4942 = vpow2.f32 %v2397_v15  ;;  %4416 = vmatmul.mubr.bf16.gmra.mrb[8].mxu1 %v1052_v24  ;;  %1925 = vadd.xlane.f32.xlu0 %v6733_v57  ;;  %v1454_v56 = vmul.f32 %v4923_v12, %v6525_v5  ;;  %v7719_v15 = vld [vmem:[#allocation18_spill] sm:$0xff] }
 0x488   : > { %v4927_v27 = vpop.eup %4926  ;;  %4944 = vrcp.f32 %v1014_v20 }
 0x489   : > { %v6740_v42 = vpop.eup %4928  ;;  %4946 = vpow2.f32 %v2393_v45  ;;  %v1465_v39 = vpack.c.bf16 %v1454_v56, %v1453_v34  ;;  %v1455_v46 = vmul.f32 %v4927_v27, %v6503_v19 }
 0x48a   : > { %v4931_v6 = vpop.eup %4930  ;;  %4948 = vrcp.f32 %v1422_v36  ;;  %v6742_v50 = vpop.xlane.xlu0 %1911 }
 0x48b   : > { %v1424_v49 = vpop.xlane.xlu1 %1423  ;;  %v6744_v28 = vpop.eup %4932  ;;  %4950 = vpow2.f32 %v2399_v2  ;;  %4447 = vmatprep.mubr.bf16.mxu0 %v1465_v39  ;;  %1929 = vadd.xlane.f32.xlu0 %v6740_v42  ;;  %v1456_v5 = vmul.f32 %v4931_v6, %v6539_v18  ;;  %v7721_v2 = vld [vmem:[#allocation51_spill] sm:$0xff] }
 0x48c   : > { %v4935_v48 = vpop.eup %4934  ;;  %4952 = vrcp.f32 %v1424_v49  ;;  %1923 = vadd.xlane.f32.xlu1 %v6735_v11  ;;  %v7722_v49 = vld [vmem:[#allocation57_spill] sm:$0xff] }
 0x48d   : > { %v1466_v29 = vpack.c.bf16 %v1456_v5, %v1455_v46  ;;  %4954 = vrcp.f32 %v1426_v58  ;;  %v1044_v19 = vmul.f32 %v4935_v48, %v6514_v35  ;;  %v7723_v5 = vld [vmem:[#allocation59_spill] sm:$0xff] }
 0x48e   : > { %v4937_v55 = vpop.eup %4936  ;;  %v6750_v62 = vpop.xlane.xlu0 %1913 }
 0x48f   : > { %v1428_v9 = vpop.xlane.xlu1 %1427  ;;  %v6752_v52 = vpop.eup %4938  ;;  %4448 = vmatmul.mubr.bf16.gmra.mrb[24].mxu0 %v1466_v29  ;;  %2427 = vadd.xlane.f32.xlu0 %v6744_v28  ;;  %v1043_v22 = vmul.f32 %v4937_v55, %v6553_v31  ;;  %v7724_v29 = vld [vmem:[#allocation21_spill] sm:$0xff] }
 0x490   : > { %v4941_v18 = vpop.eup %4940  ;;  %4956 = vrcp.f32 %v1428_v9  ;;  %1927 = vadd.xlane.f32.xlu1 %v6752_v52  ;;  %v7725_v9 = vld [vmem:[#allocation24_spill] sm:$0xff] }
 0x491   : > { %v6758_v17 = vpop.eup %4942  ;;  %v1053_v47 = vpack.c.bf16 %v1044_v19, %v1043_v22  ;;  %4958 = vrcp.f32 %v1908_v54  ;;  %v1045_v31 = vmul.f32 %v4941_v18, %v6527_v33  ;;  %v7717_v33 = vld [vmem:[#allocation42_spill] sm:$0xff]  ;;  %v7720_v54 = vld [vmem:[#allocation40_spill] sm:$0xff] }
 0x492   : > { %v4945_v13 = vpop.eup %4944  ;;  %v2412_v8 = vpop.xlane.xlu0 %2411  ;;  %v7726_v22 = vld [vmem:[#allocation58_spill] sm:$0xff] }
 0x493   : > { %v1910_v23 = vpop.xlane.xlu1 %1909  ;;  %v6760_v1 = vpop.eup %4946  ;;  %4419 = vmatprep.mubr.bf16.mxu1 %v1053_v47  ;;  %2429 = vadd.xlane.f32.xlu0 %v6758_v17  ;;  %v1046_v35 = vmul.f32 %v4945_v13, %v7715_v41  ;;  %v7727_v19 = vld [vmem:[#allocation34_spill] sm:$0xff]  ;;  %v7731_v41 = vld [vmem:[#allocation29_spill] sm:$0xff] }
 0x494   : > { %v4949_v60 = vpop.eup %4948  ;;  %4960 = vrcp.f32 %v1910_v23  ;;  %2425 = vadd.xlane.f32.xlu1 %v6760_v1  ;;  %v1872_v18 = vsub.f32 %v7727_v19, %v7726_v22  ;;  %v7728_v13 = vld [vmem:[#allocation66_spill] sm:$0xff] }
 0x495   : > { %v6766_v25 = vpop.eup %4950  ;;  %v1054_v40 = vpack.c.bf16 %v1046_v35, %v1045_v31  ;;  %4962 = vrcp.f32 %v2412_v8  ;;  %v1457_v0 = vmul.f32 %v4949_v60, %v7716_v21  ;;  %v7729_v8 = vld [vmem:[#allocation36_spill] sm:$0xff]  ;;  %v7730_v31 = vld [vmem:[#allocation63_spill] sm:$0xff] }
 0x496   : > { %v4953_v30 = vpop.eup %4952  ;;  %v6768_v36 = vpop.xlane.xlu0 %2413  ;;  %v1901_v47 = vmul.f32 1.442695, %v1872_v18  ;;  %v1874_v23 = vsub.f32 %v7729_v8, %v7728_v13  ;;  %v1871_v35 = vsub.f32 %v7731_v41, %v7730_v31 }
 0x497   : > { %v2410_v16 = vpop.xlane.xlu1 %2409  ;;  %4420 = vmatmul.mubr.bf16.gmra.mrb[12].mxu1 %v1054_v40  ;;  %2431 = vadd.xlane.f32.xlu0 %v6766_v25  ;;  %v1458_v63 = vmul.f32 %v4953_v30, %v7717_v33  ;;  %v4955_v43 = vpop.eup %4954  ;;  %v7732_v40 = vld [vmem:[#allocation72_spill] sm:$0xff]  ;;  %v7733_v30 = vld [vmem:[#allocation33_spill] sm:$0xff] }
 0x498   : > { %4964 = vrcp.f32 %v2410_v16  ;;  %v1459_v38 = vmul.f32 %v4955_v43, %v7718_v44  ;;  %v1905_v60 = vmul.f32 1.442695, %v1874_v23  ;;  %v2374_v16 = vsub.f32 %v7733_v30, %v7732_v40  ;;  %v7735_v33 = vld [vmem:[#allocation32_spill] sm:$0xff]  ;;  %v7742_v23 = vld [vmem:[#allocation23_spill] sm:$0xff] }
 0x499   : > { %v1467_v14 = vpack.c.bf16 %v1458_v63, %v1457_v0  ;;  %4966 = vpow2.f32 %v1901_v47  ;;  %v1899_v21 = vmul.f32 1.442695, %v1871_v35  ;;  %v7734_v0 = vld [vmem:[#allocation67_spill] sm:$0xff] }
 0x49a   : > { %v4957_v4 = vpop.eup %4956  ;;  %v6773_v58 = vpop.xlane.xlu0 %2415  ;;  %v1873_v63 = vsub.f32 %v7735_v33, %v7734_v0  ;;  %4968 = vpow2.f32 %v1905_v60  ;;  %v2403_v43 = vmul.f32 1.442695, %v2374_v16 }
 0x49b   : > { %v1982_v61 = vpop.permute.xlu1 %1981  ;;  %4451 = vmatprep.mubr.bf16.mxu0 %v1467_v14  ;;  %v1460_v37 = vmul.f32 %v4957_v4, %v7719_v15  ;;  %v4959_v51 = vpop.eup %4958  ;;  %v7736_v14 = vld [vmem:[#allocation75_spill] sm:$0xff]  ;;  %4970 = vpow2.f32 %v1899_v21  ;;  %v7739_v15 = vld [vmem:[#allocation30_spill] sm:$0xff] }
 0x49c   : > { %4457 = vmatprep.subr.bf16.mxu1 %v1982_v61  ;;  %v1955_v20 = vmul.f32 %v4959_v51, %v7720_v54  ;;  %v7737_v4 = vld [vmem:[#allocation39_spill] sm:$0xff]  ;;  %v1903_v44 = vmul.f32 1.442695, %v1873_v63  ;;  %4972 = vpow2.f32 %v2403_v43  ;;  %v7740_v51 = vld [vmem:[#allocation74_spill] sm:$0xff] }
 0x49d   : > { %4458 = vmatpush3.bf16.msra.mxu1 %v1982_v61  ;;  %v1468_v3 = vpack.c.bf16 %v1460_v37, %v1459_v38  ;;  %v2375_v61 = vsub.f32 %v7737_v4, %v7736_v14  ;;  %v7738_v38 = vld [vmem:[#allocation73_spill] sm:$0xff] }
 0x49e   : > { %v4961_v45 = vpop.eup %4960  ;;  %v2484_v24 = vpop.permute.xlu0 %2483  ;;  %v2373_v37 = vsub.f32 %v7739_v15, %v7738_v38  ;;  %4974 = vpow2.f32 %v1903_v44 }
 0x49f   : > { %v1984_v12 = vpop.permute.xlu1 %1983  ;;  %4452 = vmatmul.mubr.bf16.gmra.mrb[28].mxu0 %v1468_v3  ;;  %v1956_v34 = vmul.f32 %v4961_v45, %v7721_v2  ;;  %v4963_v56 = vpop.eup %4962  ;;  %4489 = vmatprep.subr.bf16.mxu0 %v2484_v24  ;;  %v7741_v3 = vld [vmem:[#allocation43_spill] sm:$0xff] }
 0x4a0   : > { %4459 = vmatprep.subr.bf16.mxu1 %v1984_v12  ;;  %4490 = vmatpush3.bf16.msra.mxu0 %v2484_v24  ;;  %v2458_v48 = vmul.f32 %v4963_v56, %v7723_v5  ;;  %v2376_v45 = vsub.f32 %v7741_v3, %v7740_v51  ;;  %v2405_v24 = vmul.f32 1.442695, %v2375_v61 }
 0x4a1   : > { %4460 = vmatpush3.bf16.msra.mxu1 %v1984_v12  ;;  %v1971_v27 = vpack.c.bf16 %v1956_v34, %v1955_v20  ;;  %v2401_v12 = vmul.f32 1.442695, %v2373_v37 }
 0x4a2   : > { %v4965_v39 = vpop.eup %4964  ;;  %v2407_v20 = vmul.f32 1.442695, %v2376_v45  ;;  %4976 = vpow2.f32 %v2405_v24 }
 0x4a3   : > { %v2486_v6 = vpop.permute.xlu1 %2485  ;;  %4471 = vmatprep.mubr.bf16.mxu1 %v1971_v27  ;;  %v2457_v46 = vmul.f32 %v4965_v39, %v7722_v49  ;;  %v6805_v54 = vpop.eup %4966  ;;  %4978 = vpow2.f32 %v2401_v12 }
 0x4a4   : > { %4491 = vmatprep.subr.bf16.mxu0 %v2486_v6  ;;  %v6808_v2 = vpop.eup %4968  ;;  %4980 = vpow2.f32 %v2407_v20 }
 0x4a5   : > { %1989 = vrot.lane.b32.xlu1 %v7724_v29, %s5274_s27  ;;  %4492 = vmatpush3.bf16.msra.mxu0 %v2486_v6  ;;  %v2473_v55 = vpack.c.bf16 %v2458_v48, %v2457_v46  ;;  %v6812_v56 = vpop.eup %4970  ;;  %4982 = vrcp.f32 %v6742_v50 }
 0x4a6   : > { %v6816_v27 = vpop.eup %4972  ;;  %4984 = vrcp.f32 %v6750_v62 }
 0x4a7   : > { %4503 = vmatprep.mubr.bf16.mxu0 %v2473_v55 }
 0x4a8   : > { %v6822_v49 = vpop.eup %4974 }
 0x4a9   : > { %1991 = vrot.lane.b32.xlu1 %v7725_v9, %s5274_s27 }
 0x4ac   : > { %v6826_v46 = vpop.eup %4976 }
 0x4ad   : > { %2493 = vrot.lane.b32.xlu1 %v7725_v9, %s5275_s15  ;;  %2491 = vrot.lane.b32.xlu0 %v7724_v29, %s5275_s15  ;;  %v6832_v29 = vpop.eup %4978 }
 0x4ae   : > { %v6836_v55 = vpop.eup %4980 }
 0x4cc   : > { %1933 = vadd.xlane.f32.xlu0 %v6805_v54 }
 0x4cf   : > { %v6810_v34 = vpop.xlane.xlu0 %1917 }
 0x4d0   : > { %1937 = vadd.xlane.f32.xlu0 %v6808_v2 }
 0x4d1   : > { %1931 = vadd.xlane.f32.xlu1 %v6812_v56 }
 0x4d3   : > { %v6818_v39 = vpop.xlane.xlu0 %1921  ;;  %v6820_v6 = vpop.xlane.xlu1 %1915 }
 0x4d4   : > { %2435 = vadd.xlane.f32.xlu0 %v6816_v27  ;;  %4986 = vrcp.f32 %v6820_v6 }
 0x4d5   : > { %1935 = vadd.xlane.f32.xlu1 %v6822_v49  ;;  %4988 = vrcp.f32 %v6773_v58 }
 0x4d6   : > { %4990 = vrcp.f32 %v6810_v34  ;;  %v4983_v34 = vpop.eup %4982 }
 0x4d7   : > { %v6828_v5 = vpop.xlane.xlu0 %2419  ;;  %v6830_v48 = vpop.xlane.xlu1 %1919 }
 0x4d8   : > { %2437 = vadd.xlane.f32.xlu0 %v6826_v46 }
 0x4d9   : > { %2433 = vadd.xlane.f32.xlu1 %v6832_v29 }
 0x4db   : > { %v6838_v9 = vpop.xlane.xlu0 %2421  ;;  %v6840_v22 = vpop.xlane.xlu1 %2417 }
 0x4dc   : > { %2439 = vadd.xlane.f32.xlu0 %v6836_v55  ;;  %4992 = vrcp.f32 %v6840_v22 }
 0x4dd   : > { %4994 = vrcp.f32 %v6768_v36 }
 0x4de   : > { %4996 = vrcp.f32 %v6828_v5  ;;  %v4985_v5 = vpop.eup %4984 }
 0x4df   : > { %v6843_v19 = vpop.xlane.xlu0 %2423  ;;  %v1986_v18 = vpop.permute.xlu1 %1985  ;;  %4998 = vrcp.f32 %v6818_v39 }
 0x4e0   : > { %4461 = vmatprep.subr.bf16.mxu1 %v1986_v18  ;;  %5000 = vrcp.f32 %v6830_v48 }
 0x4e1   : > { %4462 = vmatpush3.bf16.msra.mxu1 %v1986_v18 }
 0x4e3   : > { %v2488_v47 = vpop.permute.xlu0 %2487  ;;  %v1988_v13 = vpop.permute.xlu1 %1987 }
 0x4e4   : > { %4463 = vmatprep.subr.bf16.mxu1 %v1988_v13  ;;  %4493 = vmatprep.subr.bf16.mxu0 %v2488_v47 }
 0x4e5   : > { %4464 = vmatpush3.bf16.msra.mxu1 %v1988_v13  ;;  %4494 = vmatpush3.bf16.msra.mxu0 %v2488_v47 }
 0x4e7   : > { %v2490_v8 = vpop.permute.xlu1 %2489 }
 0x4e8   : > { %4495 = vmatprep.subr.bf16.mxu0 %v2490_v8 }
 0x4e9   : > { %4496 = vmatpush3.bf16.msra.mxu0 %v2490_v8 }
 0x4ea   : > { %1993 = vrot.lane.b32.xlu1 %v7742_v23, %s5274_s27  ;;  %s5281_s27 = smov 32  }
 0x4f2   : > { %2495 = vrot.lane.b32.xlu0 %v7742_v23, %s5275_s15 }
 0x514   : > { %v6849_v31 = vpop.xlane.xlu0 %1925 }
 0x518   : > { %v6851_v41 = vpop.xlane.xlu0 %1929 }
 0x519   : > { %v6853_v35 = vpop.xlane.xlu1 %1923 }
 0x51a   : > { %5002 = vrcp.f32 %v6853_v35 }
 0x51b   : > { %5004 = vrcp.f32 %v6843_v19 }
 0x51c   : > { %v6855_v60 = vpop.xlane.xlu0 %2427  ;;  %5006 = vrcp.f32 %v6849_v31 }
 0x51d   : > { %v6857_v40 = vpop.xlane.xlu1 %1927 }
 0x520   : > { %v6859_v30 = vpop.xlane.xlu0 %2429 }
 0x521   : > { %v6861_v16 = vpop.xlane.xlu1 %2425 }
 0x522   : > { %5008 = vrcp.f32 %v6861_v16 }
 0x523   : > { %5010 = vrcp.f32 %v6838_v9 }
 0x524   : > { %v6863_v21 = vpop.xlane.xlu0 %2431  ;;  %5012 = vrcp.f32 %v6855_v60 }
 0x525   : > { %v1990_v0 = vpop.permute.xlu1 %1989  ;;  %5014 = vrcp.f32 %v6851_v41 }
 0x526   : > { %4465 = vmatprep.subr.bf16.mxu1 %v1990_v0  ;;  %5016 = vrcp.f32 %v6857_v40 }
 0x527   : > { %4466 = vmatpush3.bf16.msra.mxu1 %v1990_v0 }
 0x528   : > { %v2492_v33 = vpop.permute.xlu0 %2491 }
 0x529   : > { %v1992_v63 = vpop.permute.xlu1 %1991  ;;  %4497 = vmatprep.subr.bf16.mxu0 %v2492_v33 }
 0x52a   : > { %4467 = vmatprep.subr.bf16.mxu1 %v1992_v63  ;;  %4498 = vmatpush3.bf16.msra.mxu0 %v2492_v33 }
 0x52b   : > { %4468 = vmatpush3.bf16.msra.mxu1 %v1992_v63 }
 0x52d   : > { %v2494_v43 = vpop.permute.xlu1 %2493 }
 0x52e   : > { %4499 = vmatprep.subr.bf16.mxu0 %v2494_v43 }
 0x52f   : > { %4500 = vmatpush3.bf16.msra.mxu0 %v2494_v43 }
 0x539   : > { %v4409_v14 = vpop.f32.mrb[0].mxu1 }
 0x53a   : > { %1155 = vst.msk [vmem:[#allocation2 + $0x10] sm:$0xff] %vm1152_vm11, %v4409_v14  ;;  %v1089_v4 = vpop.f32.mrb[1].mxu1 }
 0x53b   : > { %1153 = vst.msk [vmem:[#allocation2] sm:$0xff] %vm1152_vm11, %v1089_v4  ;;  %v4410_v61 = vpop.f32.mrb[2].mxu1 }
 0x53c   : > { %1156 = vst.msk [vmem:[#allocation2 + $0x18] sm:$0xff] %vm1152_vm11, %v4410_v61  ;;  %v1092_v44 = vpop.f32.mrb[3].mxu1 }
 0x53d   : > { %1154 = vst.msk [vmem:[#allocation2 + $0x8] sm:$0xff] %vm1152_vm11, %v1092_v44  ;;  %v4987_v44 = vpop.eup %4986 }
 0x53e   : > { %v4989_v39 = vpop.eup %4988  ;;  %v1959_v31 = vmul.f32 %v4987_v44, %v6666_v26 }
 0x53f   : > { %v4991_v48 = vpop.eup %4990 }
 0x540   : > { %v1960_v26 = vmul.f32 %v4991_v48, %v6663_v7 }
 0x542   : > { %v1973_v40 = vpack.c.bf16 %v1960_v26, %v1959_v31 }
 0x545   : > { %v4441_v38 = vpop.f32.mrb[16].mxu0 }
 0x546   : > { %1618 = vrot.lane.b32.xlu1 %v4441_v38, %s5276_s19  ;;  %v1535_v15 = vpop.f32.mrb[17].mxu0  ;;  %v7743_v38 = vld [vmem:[#allocation50_spill] sm:$0xff] }
 0x547   : > { %v4442_v37 = vpop.f32.mrb[18].mxu0  ;;  %v1958_v35 = vmul.f32 %v4985_v5, %v7743_v38 }
 0x548   : > { %v1538_v51 = vpop.f32.mrb[19].mxu0 }
 0x54a   : > { %1614 = vrot.lane.b32.xlu1 %v1535_v15, %s5276_s19  ;;  %v4413_v3 = vpop.f32.mrb[4].mxu1 }
 0x54b   : > { %1159 = vst.msk [vmem:[#allocation2 + $0x30] sm:$0xff] %vm1152_vm11, %v4413_v3  ;;  %v1105_v45 = vpop.f32.mrb[5].mxu1 }
 0x54c   : > { %1157 = vst.msk [vmem:[#allocation2 + $0x20] sm:$0xff] %vm1152_vm11, %v1105_v45  ;;  %v4414_v24 = vpop.f32.mrb[6].mxu1  ;;  %v7744_v45 = vld [vmem:[#allocation38_spill] sm:$0xff] }
 0x54d   : > { %1160 = vst.msk [vmem:[#allocation2 + $0x38] sm:$0xff] %vm1152_vm11, %v4414_v24  ;;  %v1108_v12 = vpop.f32.mrb[7].mxu1  ;;  %v4445_v20 = vpop.f32.mrb[20].mxu0  ;;  %v1957_v24 = vmul.f32 %v4983_v34, %v7744_v45 }
 0x54e   : > { %1158 = vst.msk [vmem:[#allocation2 + $0x28] sm:$0xff] %vm1152_vm11, %v1108_v12  ;;  %1620 = vrot.lane.b32.xlu1 %v4442_v37, %s5276_s19  ;;  %1626 = vrot.lane.b32.xlu0 %v4445_v20, %s5276_s19  ;;  %v1551_v18 = vpop.f32.mrb[21].mxu0  ;;  %v4993_v37 = vpop.eup %4992  ;;  %v7745_v12 = vld [vmem:[#allocation65_spill] sm:$0xff] }
 0x54f   : > { %v4446_v47 = vpop.f32.mrb[22].mxu0  ;;  %v4995_v3 = vpop.eup %4994  ;;  %v2460_v20 = vmul.f32 %v4989_v39, %v7745_v12  ;;  %v7747_v39 = vld [vmem:[#allocation20_spill] sm:$0xff] }
 0x550   : > { %v1554_v13 = vpop.f32.mrb[23].mxu0  ;;  %v4997_v9 = vpop.eup %4996 }
 0x551   : > { %v2462_v7 = vmul.f32 %v4997_v9, %v6674_v53 }
 0x552   : > { %1616 = vrot.lane.b32.xlu1 %v1538_v51, %s5276_s19  ;;  %1622 = vrot.lane.b32.xlu0 %v1551_v18, %s5276_s19  ;;  %v4999_v18 = vpop.eup %4998 }
 0x556   : > { %1628 = vrot.lane.b32.xlu1 %v4446_v47, %s5276_s19 }
 0x559   : > { %v6880_v8 = vpop.xlane.xlu0 %1933 }
 0x55a   : > { %v4417_v23 = vpop.f32.mrb[8].mxu1  ;;  %1624 = vrot.lane.b32.xlu1 %v1554_v13, %s5276_s19  ;;  %v1972_v13 = vpack.c.bf16 %v1958_v35, %v1957_v24 }
 0x55b   : > { %1163 = vst.msk [vmem:[#allocation2 + $0x50] sm:$0xff] %vm1152_vm11, %v4417_v23  ;;  %v1121_v0 = vpop.f32.mrb[9].mxu1  ;;  %v2461_v23 = vmul.f32 %v4993_v37, %v6678_v59 }
 0x55c   : > { %1161 = vst.msk [vmem:[#allocation2 + $0x40] sm:$0xff] %vm1152_vm11, %v1121_v0  ;;  %v4418_v33 = vpop.f32.mrb[10].mxu1  ;;  %v5001_v0 = vpop.eup %5000 }
 0x55d   : > { %1164 = vst.msk [vmem:[#allocation2 + $0x58] sm:$0xff] %vm1152_vm11, %v4418_v33  ;;  %v1124_v63 = vpop.f32.mrb[11].mxu1  ;;  %v6889_v43 = vpop.xlane.xlu0 %1937  ;;  %v7746_v33 = vld [vmem:[#allocation56_spill] sm:$0xff] }
 0x55e   : > { %1162 = vst.msk [vmem:[#allocation2 + $0x48] sm:$0xff] %vm1152_vm11, %v1124_v63  ;;  %v1932_v50 = vpop.xlane.xlu1 %1931  ;;  %v2459_v63 = vmul.f32 %v4995_v3, %v7746_v33 }
 0x55f   : > { %5018 = vrcp.f32 %v1932_v50 }
 0x560   : > { %5020 = vrcp.f32 %v6863_v21  ;;  %v2474_v59 = vpack.c.bf16 %v2460_v20, %v2459_v63  ;;  %v1961_v21 = vmul.f32 %v5001_v0, %v6672_v32 }
 0x561   : > { %v6896_v62 = vpop.xlane.xlu0 %2435  ;;  %5022 = vrcp.f32 %v6880_v8 }
 0x562   : > { %v4449_v6 = vpop.f32.mrb[24].mxu0  ;;  %v6899_v14 = vpop.xlane.xlu1 %1935 }
 0x563   : > { %1634 = vrot.lane.b32.xlu0 %v4449_v6, %s5276_s19  ;;  %v1567_v58 = vpop.f32.mrb[25].mxu0  ;;  %v5003_v6 = vpop.eup %5002 }
 0x564   : > { %v4450_v4 = vpop.f32.mrb[26].mxu0  ;;  %v5005_v50 = vpop.eup %5004  ;;  %v1963_v8 = vmul.f32 %v5003_v6, %v6735_v11 }
 0x565   : > { %1636 = vrot.lane.b32.xlu1 %v4450_v4, %s5276_s19  ;;  %v1570_v36 = vpop.f32.mrb[27].mxu0  ;;  %v6906_v22 = vpop.xlane.xlu0 %2437  ;;  %v2475_v4 = vpack.c.bf16 %v2462_v7, %v2461_v23  ;;  %v2464_v48 = vmul.f32 %v5005_v50, %v7747_v39 }
 0x566   : > { %v2434_v61 = vpop.xlane.xlu1 %2433 }
 0x567   : > { %1630 = vrot.lane.b32.xlu0 %v1567_v58, %s5276_s19  ;;  %5024 = vrcp.f32 %v2434_v61  ;;  %v5007_v58 = vpop.eup %5006  ;;  %v1962_v61 = vmul.f32 %v4999_v18, %v6668_v10  ;;  %v7748_v10 = vld [vmem:[#allocation17_spill] sm:$0xff] }
 0x568   : > { %5026 = vrcp.f32 %v6859_v30  ;;  %v5009_v34 = vpop.eup %5008  ;;  %v1964_v32 = vmul.f32 %v5007_v58, %v6733_v57 }
 0x569   : > { %1632 = vrot.lane.b32.xlu1 %v1570_v36, %s5276_s19  ;;  %v6915_v15 = vpop.xlane.xlu0 %2439  ;;  %5028 = vrcp.f32 %v6896_v62  ;;  %v5011_v5 = vpop.eup %5010  ;;  %v1974_v11 = vpack.c.bf16 %v1962_v61, %v1961_v21  ;;  %v2465_v35 = vmul.f32 %v5009_v34, %v6760_v1 }
 0x56a   : > { %v1994_v19 = vpop.permute.xlu1 %1993  ;;  %v4421_v51 = vpop.f32.mrb[12].mxu1  ;;  %5030 = vrcp.f32 %v6899_v14 }
 0x56b   : > { %1167 = vst.msk [vmem:[#allocation2 + $0x70] sm:$0xff] %vm1152_vm11, %v4421_v51  ;;  %v1137_v16 = vpop.f32.mrb[13].mxu1  ;;  %4469 = vmatprep.subr.bf16.mxu1 %v1994_v19  ;;  %v5013_v44 = vpop.eup %5012  ;;  %5032 = vrcp.f32 %v6889_v43  ;;  %v2463_v51 = vmul.f32 %v5011_v5, %v7748_v10 }
 0x56c   : > { %1165 = vst.msk [vmem:[#allocation2 + $0x60] sm:$0xff] %vm1152_vm11, %v1137_v16  ;;  %v4422_v60 = vpop.f32.mrb[14].mxu1  ;;  %4470 = vmatpush3.bf16.msra.mxu1 %v1994_v19  ;;  %v5015_v62 = vpop.eup %5014  ;;  %v1975_v19 = vpack.c.bf16 %v1964_v32, %v1963_v8  ;;  %5034 = vrcp.f32 %v6915_v15  ;;  %v2466_v57 = vmul.f32 %v5013_v44, %v6744_v28 }
 0x56d   : > { %1168 = vst.msk [vmem:[#allocation2 + $0x78] sm:$0xff] %vm1152_vm11, %v4422_v60  ;;  %v1140_v41 = vpop.f32.mrb[15].mxu1  ;;  %v2496_v47 = vpop.permute.xlu0 %2495  ;;  %v2476_v3 = vpack.c.bf16 %v2464_v48, %v2463_v51  ;;  %5036 = vrcp.f32 %v6906_v22  ;;  %v1966_v9 = vmul.f32 %v5015_v62, %v6740_v42 }
 0x56e   : > { %1166 = vst.msk [vmem:[#allocation2 + $0x68] sm:$0xff] %vm1152_vm11, %v1140_v41  ;;  %4501 = vmatprep.subr.bf16.mxu0 %v2496_v47  ;;  %v5017_v37 = vpop.eup %5016  ;;  %v2477_v1 = vpack.c.bf16 %v2466_v57, %v2465_v35 }
 0x56f   : > { %4472 = vmatmul.mubr.bf16.vlgmr.msra.gmra.mrb[16].mxu1 %v1972_v13  ;;  %4502 = vmatpush3.bf16.msra.mxu0 %v2496_v47  ;;  %v5019_v31 = vpop.eup %5018  ;;  %v1965_v43 = vmul.f32 %v5017_v37, %v6752_v52 }
 0x570   : > { %4475 = vmatprep.mubr.bf16.mxu1 %v1973_v40  ;;  %v5021_v14 = vpop.eup %5020  ;;  %v1967_v15 = vmul.f32 %v5019_v31, %v6812_v56 }
 0x571   : > { %v5023_v45 = vpop.eup %5022  ;;  %v2468_v20 = vmul.f32 %v5021_v14, %v6766_v25  ;;  %v1976_v60 = vpack.c.bf16 %v1966_v9, %v1965_v43 }
 0x572   : > { %v4453_v36 = vpop.f32.mrb[28].mxu0  ;;  %4504 = vmatmul.mubr.bf16.vlgmr.msra.gmra.mrb[32].mxu0 %v2474_v59  ;;  %v5025_v24 = vpop.eup %5024  ;;  %v1968_v12 = vmul.f32 %v5023_v45, %v6805_v54 }
 0x573   : > { %1642 = vrot.lane.b32.xlu0 %v4453_v36, %s5276_s19  ;;  %v1583_v53 = vpop.f32.mrb[29].mxu0  ;;  %4507 = vmatprep.mubr.bf16.mxu0 %v2475_v4  ;;  %v5027_v16 = vpop.eup %5026  ;;  %v2469_v22 = vmul.f32 %v5025_v24, %v6832_v29 }
 0x574   : > { %v4454_v30 = vpop.f32.mrb[30].mxu0  ;;  %v5029_v28 = vpop.eup %5028  ;;  %v1977_v18 = vpack.c.bf16 %v1968_v12, %v1967_v15  ;;  %v2467_v52 = vmul.f32 %v5027_v16, %v6758_v17 }
 0x575   : > { %1644 = vrot.lane.b32.xlu1 %v4454_v30, %s5276_s19  ;;  %v1586_v38 = vpop.f32.mrb[31].mxu0  ;;  %v5031_v26 = vpop.eup %5030  ;;  %v2470_v41 = vmul.f32 %v5029_v28, %v6816_v27  ;;  %v4741_v28 = vld [vmem:[%s7463_s4 + $0x8] sm:$0xff]  }
 0x576   : > { %v5033_v56 = vpop.eup %5032  ;;  %v2478_v47 = vpack.c.bf16 %v2468_v20, %v2467_v52  ;;  %v1969_v23 = vmul.f32 %v5031_v26, %v6822_v49 }
 0x577   : > { %1638 = vrot.lane.b32.xlu0 %v1583_v53, %s5276_s19  ;;  %4476 = vmatmul.mubr.bf16.gmra.mrb[20].mxu1 %v1974_v11  ;;  %v5035_v13 = vpop.eup %5034  ;;  %v2479_v42 = vpack.c.bf16 %v2470_v41, %v2469_v22  ;;  %v1970_v25 = vmul.f32 %v5033_v56, %v6808_v2  ;;  %v4740_v11 = vld [vmem:[%s7463_s4] sm:$0xff]  }
 0x578   : > { %4479 = vmatprep.mubr.bf16.mxu1 %v1975_v19  ;;  %v5037_v54 = vpop.eup %5036  ;;  %v2472_v29 = vmul.f32 %v5035_v13, %v6836_v55  ;;  %4519 = vmatprep.subr.bf16.mxu1 %v4740_v11 }
 0x579   : > { %1640 = vrot.lane.b32.xlu1 %v1586_v38, %s5276_s19  ;;  %v1978_v0 = vpack.c.bf16 %v1970_v25, %v1969_v23  ;;  %v2471_v17 = vmul.f32 %v5037_v54, %v6826_v46  ;;  %4520 = vmatpush3.bf16.msra.mxu1 %v4740_v11  ;;  %v7026_v23 = vld [vmem:[%s7462_s3] ss:$0 sm:$0xff] }
 0x57a   : > { %4508 = vmatmul.mubr.bf16.gmra.mrb[36].mxu0 %v2476_v3  ;;  %4521 = vmatprep.subr.bf16.mxu1 %v4741_v28 }
 0x57b   : > { %4511 = vmatprep.mubr.bf16.mxu0 %v2477_v1  ;;  %v2480_v33 = vpack.c.bf16 %v2472_v29, %v2471_v17 }
 0x57d   : > { %4522 = vmatpush3.bf16.msra.mxu1 %v4741_v28 }
 0x57f   : > { %4480 = vmatmul.mubr.bf16.gmra.mrb[24].mxu1 %v1976_v60 }
 0x580   : > { %4483 = vmatprep.mubr.bf16.mxu1 %v1977_v18  ;;  %v5279_v18 = vmov 33  }
 0x581   : > { %4729 = vset.pattern.permute.xlu1 %v5279_v18  ;;  %4730 = vset.pattern.permute.xlu0 %v5279_v18 }
 0x582   : > { %4512 = vmatmul.mubr.bf16.gmra.mrb[40].mxu0 %v2478_v47 }
 0x583   : > { %4515 = vmatprep.mubr.bf16.mxu0 %v2479_v42 }
 0x587   : > { %4484 = vmatmul.mubr.bf16.gmra.mrb[28].mxu1 %v1978_v0 }
 0x58a   : > { %4516 = vmatmul.mubr.bf16.gmra.mrb[44].mxu0 %v2480_v33 }
 0x5b8   : > { %v1619_v27 = vpop.permute.xlu1 %1618 }
 0x5b9   : > { %1665 = vst.msk [vmem:[#allocation2 + $0x10] sm:$0xff] %vm1662_vm10, %v1619_v27 }
 0x5bc   : > { %v1615_v63 = vpop.permute.xlu1 %1614 }
 0x5bd   : > { %1663 = vst.msk [vmem:[#allocation2] sm:$0xff] %vm1662_vm10, %v1615_v63 }
 0x5c0   : > { %v1621_v49 = vpop.permute.xlu1 %1620  ;;  %v1627_v40 = vpop.permute.xlu0 %1626 }
 0x5c1   : > { %1666 = vst.msk [vmem:[#allocation2 + $0x18] sm:$0xff] %vm1662_vm10, %v1621_v49  ;;  %1669 = vst.msk [vmem:[#allocation2 + $0x30] sm:$0xff] %vm1662_vm10, %v1627_v40 }
 0x5c4   : > { %v1617_v2 = vpop.permute.xlu1 %1616  ;;  %v1623_v55 = vpop.permute.xlu0 %1622 }
 0x5c5   : > { %1664 = vst.msk [vmem:[#allocation2 + $0x8] sm:$0xff] %vm1662_vm10, %v1617_v2  ;;  %1667 = vst.msk [vmem:[#allocation2 + $0x20] sm:$0xff] %vm1662_vm10, %v1623_v55 }
 0x5c8   : > { %v1629_v46 = vpop.permute.xlu1 %1628 }
 0x5c9   : > { %1670 = vst.msk [vmem:[#allocation2 + $0x38] sm:$0xff] %vm1662_vm10, %v1629_v46 }
 0x5cc   : > { %v1625_v6 = vpop.permute.xlu1 %1624 }
 0x5cd   : > { %1668 = vst.msk [vmem:[#allocation2 + $0x28] sm:$0xff] %vm1662_vm10, %v1625_v6 }
 0x5d5   : > { %v1635_v7 = vpop.permute.xlu0 %1634 }
 0x5d6   : > { %1673 = vst.msk [vmem:[#allocation2 + $0x50] sm:$0xff] %vm1662_vm10, %v1635_v7 }
 0x5d7   : > { %v1637_v50 = vpop.permute.xlu1 %1636 }
 0x5d8   : > { %1674 = vst.msk [vmem:[#allocation2 + $0x58] sm:$0xff] %vm1662_vm10, %v1637_v50 }
 0x5d9   : > { %v1631_v59 = vpop.permute.xlu0 %1630 }
 0x5da   : > { %1671 = vst.msk [vmem:[#allocation2 + $0x40] sm:$0xff] %vm1662_vm10, %v1631_v59 }
 0x5db   : > { %v1633_v58 = vpop.permute.xlu1 %1632 }
 0x5dc   : > { %1672 = vst.msk [vmem:[#allocation2 + $0x48] sm:$0xff] %vm1662_vm10, %v1633_v58 }
 0x5e5   : > { %v1643_v4 = vpop.permute.xlu0 %1642 }
 0x5e6   : > { %1677 = vst.msk [vmem:[#allocation2 + $0x70] sm:$0xff] %vm1662_vm10, %v1643_v4 }
 0x5e7   : > { %v1645_v21 = vpop.permute.xlu1 %1644 }
 0x5e8   : > { %1678 = vst.msk [vmem:[#allocation2 + $0x78] sm:$0xff] %vm1662_vm10, %v1645_v21 }
 0x5e9   : > { %v1639_v34 = vpop.permute.xlu0 %1638 }
 0x5ea   : > { %1675 = vst.msk [vmem:[#allocation2 + $0x60] sm:$0xff] %vm1662_vm10, %v1639_v34 }
 0x5eb   : > { %v1641_v36 = vpop.permute.xlu1 %1640 }
 0x5ec   : > { %1676 = vst.msk [vmem:[#allocation2 + $0x68] sm:$0xff] %vm1662_vm10, %v1641_v36 }
 0x642   : > { %v4473_v8 = vpop.f32.mrb[16].mxu1 }
 0x643   : > { %2120 = vrot.lane.b32.xlu0 %v4473_v8, %s5277_s24  ;;  %v2037_v5 = vpop.f32.mrb[17].mxu1 }
 0x644   : > { %v4474_v53 = vpop.f32.mrb[18].mxu1 }
 0x645   : > { %2122 = vrot.lane.b32.xlu1 %v4474_v53, %s5277_s24  ;;  %v2040_v61 = vpop.f32.mrb[19].mxu1  ;;  %v4505_v44 = vpop.f32.mrb[32].mxu0 }
 0x646   : > { %v2539_v30 = vpop.f32.mrb[33].mxu0 }
 0x647   : > { %2622 = vrot.lane.b32.xlu0 %v4505_v44, %s5278_s28  ;;  %v4506_v32 = vpop.f32.mrb[34].mxu0 }
 0x648   : > { %v2542_v39 = vpop.f32.mrb[35].mxu0 }
 0x649   : > { %2624 = vrot.lane.b32.xlu1 %v4506_v32, %s5278_s28 }
 0x64a   : > { %v4477_v48 = vpop.f32.mrb[20].mxu1 }
 0x64b   : > { %2116 = vrot.lane.b32.xlu0 %v2037_v5, %s5277_s24  ;;  %v2053_v62 = vpop.f32.mrb[21].mxu1 }
 0x64c   : > { %v4478_v38 = vpop.f32.mrb[22].mxu1 }
 0x64d   : > { %2118 = vrot.lane.b32.xlu1 %v2040_v61, %s5277_s24  ;;  %v2056_v35 = vpop.f32.mrb[23].mxu1  ;;  %v4509_v37 = vpop.f32.mrb[36].mxu0 }
 0x64e   : > { %v2555_v19 = vpop.f32.mrb[37].mxu0 }
 0x64f   : > { %2618 = vrot.lane.b32.xlu0 %v2539_v30, %s5278_s28  ;;  %v4510_v10 = vpop.f32.mrb[38].mxu0 }
 0x650   : > { %v2558_v51 = vpop.f32.mrb[39].mxu0 }
 0x651   : > { %2620 = vrot.lane.b32.xlu1 %v2542_v39, %s5278_s28 }
 0x652   : > { %v4481_v31 = vpop.f32.mrb[24].mxu1 }
 0x653   : > { %2128 = vrot.lane.b32.xlu0 %v4477_v48, %s5277_s24  ;;  %v2069_v57 = vpop.f32.mrb[25].mxu1 }
 0x654   : > { %v4482_v14 = vpop.f32.mrb[26].mxu1 }
 0x655   : > { %2130 = vrot.lane.b32.xlu1 %v4478_v38, %s5277_s24  ;;  %v2072_v3 = vpop.f32.mrb[27].mxu1  ;;  %v4513_v45 = vpop.f32.mrb[40].mxu0 }
 0x656   : > { %v2571_v1 = vpop.f32.mrb[41].mxu0 }
 0x657   : > { %2630 = vrot.lane.b32.xlu0 %v4509_v37, %s5278_s28  ;;  %v4514_v43 = vpop.f32.mrb[42].mxu0 }
 0x658   : > { %v2574_v24 = vpop.f32.mrb[43].mxu0 }
 0x659   : > { %2632 = vrot.lane.b32.xlu1 %v4510_v10, %s5278_s28 }
 0x65a   : > { %v4485_v15 = vpop.f32.mrb[28].mxu1 }
 0x65b   : > { %2124 = vrot.lane.b32.xlu0 %v2053_v62, %s5277_s24  ;;  %v2085_v16 = vpop.f32.mrb[29].mxu1 }
 0x65c   : > { %v4486_v9 = vpop.f32.mrb[30].mxu1 }
 0x65d   : > { %2126 = vrot.lane.b32.xlu1 %v2056_v35, %s5277_s24  ;;  %v2088_v12 = vpop.f32.mrb[31].mxu1  ;;  %v4517_v20 = vpop.f32.mrb[44].mxu0 }
 0x65e   : > { %v2587_v60 = vpop.f32.mrb[45].mxu0 }
 0x65f   : > { %2626 = vrot.lane.b32.xlu0 %v2555_v19, %s5278_s28  ;;  %v4518_v22 = vpop.f32.mrb[46].mxu0 }
 0x660   : > { %v2590_v26 = vpop.f32.mrb[47].mxu0 }
 0x661   : > { %2628 = vrot.lane.b32.xlu1 %v2558_v51, %s5278_s28 }
 0x663   : > { %2136 = vrot.lane.b32.xlu0 %v4481_v31, %s5277_s24 }
 0x665   : > { %2138 = vrot.lane.b32.xlu1 %v4482_v14, %s5277_s24 }
 0x667   : > { %2638 = vrot.lane.b32.xlu0 %v4513_v45, %s5278_s28 }
 0x669   : > { %2640 = vrot.lane.b32.xlu1 %v4514_v43, %s5278_s28 }
 0x66b   : > { %2132 = vrot.lane.b32.xlu0 %v2069_v57, %s5277_s24 }
 0x66d   : > { %2134 = vrot.lane.b32.xlu1 %v2072_v3, %s5277_s24 }
 0x66f   : > { %2634 = vrot.lane.b32.xlu0 %v2571_v1, %s5278_s28 }
 0x671   : > { %2636 = vrot.lane.b32.xlu1 %v2574_v24, %s5278_s28 }
 0x673   : > { %2144 = vrot.lane.b32.xlu0 %v4485_v15, %s5277_s24 }
 0x675   : > { %2146 = vrot.lane.b32.xlu1 %v4486_v9, %s5277_s24 }
 0x677   : > { %2140 = vrot.lane.b32.xlu0 %v2085_v16, %s5277_s24 }
 0x679   : > { %2142 = vrot.lane.b32.xlu1 %v2088_v12, %s5277_s24  ;;  %s397_s24 = sand.u32 1, %s5254_s14  }
 0x67b   : > { %2642 = vrot.lane.b32.xlu0 %v2587_v60, %s5278_s28 }
 0x67d   : > { %2644 = vrot.lane.b32.xlu1 %v2590_v26, %s5278_s28 }
 0x67f   : > { %2646 = vrot.lane.b32.xlu0 %v4517_v20, %s5278_s28 }
 0x681   : > { %2648 = vrot.lane.b32.xlu1 %v4518_v22, %s5278_s28  ;;  %s4124_s28 = sshll.u32 %s397_s24, 3 }
 0x682   : > { %s399_s22 = scalar_lea.vmem [#allocation9], %s4124_s28 }
 0x683   : > { %s4023_s18 = sshll.u32 %s399_s22, 4  ;;  %s7419_s18 = int_to_ptr.vmem [resolvable:$true] %s4023_s18 }
 0x684   : > { %s5192_s17 = scalar_lea.vmem %s7419_s18, 128 }
 0x685   : > { %p5193_p1 = scmp.ne.s32.totalorder %s7419_s18, %s5192_s17 }
 0x687   : > { %p5194_p3 = pnand %p5193_p1, %p7774_p2 }
 0x689   : > { %p5195_p4 = pneg %p5194_p3 }
 0x6b5   : > { %v2121_v52 = vpop.permute.xlu0 %2120 }
 0x6b6   : > { %2167 = vst.msk [vmem:[#allocation2 + $0x10] sm:$0xff] %vm2164_vm5, %v2121_v52 }
 0x6b7   : > { %v2123_v41 = vpop.permute.xlu1 %2122 }
 0x6b8   : > { %2168 = vst.msk [vmem:[#allocation2 + $0x18] sm:$0xff] %vm2164_vm5, %v2123_v41 }
 0x6b9   : > { %v2623_v56 = vpop.permute.xlu0 %2622 }
 0x6ba   : > { %2669 = vst.msk [vmem:[#allocation2 + $0x10] sm:$0xff] %vm2666_vm3, %v2623_v56 }
 0x6bb   : > { %v2625_v47 = vpop.permute.xlu1 %2624 }
 0x6bc   : > { %2670 = vst.msk [vmem:[#allocation2 + $0x18] sm:$0xff] %vm2666_vm3, %v2625_v47 }
 0x6bd   : > { %v2117_v13 = vpop.permute.xlu0 %2116 }
 0x6be   : > { %2165 = vst.msk [vmem:[#allocation2] sm:$0xff] %vm2164_vm5, %v2117_v13 }
 0x6bf   : > { %v2119_v42 = vpop.permute.xlu1 %2118 }
 0x6c0   : > { %2166 = vst.msk [vmem:[#allocation2 + $0x8] sm:$0xff] %vm2164_vm5, %v2119_v42 }
 0x6c1   : > { %v2619_v54 = vpop.permute.xlu0 %2618  ;;  %v2685_v25 = vld [vmem:[#allocation2 + $0x10] sm:$0xff] }
 0x6c2   : > { %2667 = vst.msk [vmem:[#allocation2] sm:$0xff] %vm2666_vm3, %v2619_v54  ;;  %v7030_v17 = vadd.f32 %v7026_v23, %v2685_v25 }
 0x6c3   : > { %v2621_v29 = vpop.permute.xlu1 %2620  ;;  %v2686_v0 = vld [vmem:[#allocation2 + $0x18] sm:$0xff] }
 0x6c4   : > { %2668 = vst.msk [vmem:[#allocation2 + $0x8] sm:$0xff] %vm2666_vm3, %v2621_v29  ;;  %v7034_v33 = vadd.f32 %v7026_v23, %v2686_v0  ;;  %v2740_v40 = vmin.f32 %v7030_v17, 0.0  ;;  %vm2724_vm13 = vcmp.gt.f32.partialorder %v7030_v17, 0.0 }
 0x6c5   : > { %v2129_v27 = vpop.permute.xlu0 %2128 }
 0x6c6   : > { %2171 = vst.msk [vmem:[#allocation2 + $0x30] sm:$0xff] %vm2164_vm5, %v2129_v27  ;;  %v2741_v63 = vmin.f32 %v7034_v33, 0.0  ;;  %v2758_v59 = vmul.f32 1.442695, %v2740_v40  ;;  %vm2725_vm11 = vcmp.gt.f32.partialorder %v7034_v33, 0.0 }
 0x6c7   : > { %v2131_v49 = vpop.permute.xlu1 %2130 }
 0x6c8   : > { %2172 = vst.msk [vmem:[#allocation2 + $0x38] sm:$0xff] %vm2164_vm5, %v2131_v49  ;;  %v2760_v46 = vmul.f32 1.442695, %v2741_v63 }
 0x6c9   : > { %v2631_v2 = vpop.permute.xlu0 %2630  ;;  %v2683_v55 = vld [vmem:[#allocation2] sm:$0xff] }
 0x6ca   : > { %2673 = vst.msk [vmem:[#allocation2 + $0x30] sm:$0xff] %vm2666_vm3, %v2631_v2  ;;  %v7042_v6 = vadd.f32 %v7026_v23, %v2683_v55  ;;  %5038 = vpow2.f32 %v2760_v46 }
 0x6cb   : > { %v2633_v7 = vpop.permute.xlu1 %2632  ;;  %v2684_v50 = vld [vmem:[#allocation2 + $0x8] sm:$0xff]  ;;  %5040 = vpow2.f32 %v2758_v59 }
 0x6cc   : > { %2674 = vst.msk [vmem:[#allocation2 + $0x38] sm:$0xff] %vm2666_vm3, %v2633_v7  ;;  %v2707_v58 = vadd.f32 %v7026_v23, %v2684_v50  ;;  %v2738_v4 = vmin.f32 %v7042_v6, 0.0  ;;  %vm2722_vm6 = vcmp.gt.f32.partialorder %v7042_v6, 0.0 }
 0x6cd   : > { %v2125_v21 = vpop.permute.xlu0 %2124 }
 0x6ce   : > { %2169 = vst.msk [vmem:[#allocation2 + $0x20] sm:$0xff] %vm2164_vm5, %v2125_v21  ;;  %v2739_v34 = vmin.f32 %v2707_v58, 0.0  ;;  %v2754_v36 = vmul.f32 1.442695, %v2738_v4  ;;  %vm2723_vm10 = vcmp.gt.f32.partialorder %v2707_v58, 0.0 }
 0x6cf   : > { %v2127_v8 = vpop.permute.xlu1 %2126 }
 0x6d0   : > { %2170 = vst.msk [vmem:[#allocation2 + $0x28] sm:$0xff] %vm2164_vm5, %v2127_v8  ;;  %5042 = vpow2.f32 %v2754_v36  ;;  %v2756_v5 = vmul.f32 1.442695, %v2739_v34 }
 0x6d1   : > { %v2627_v53 = vpop.permute.xlu0 %2626  ;;  %v2689_v61 = vld [vmem:[#allocation2 + $0x30] sm:$0xff] }
 0x6d2   : > { %2671 = vst.msk [vmem:[#allocation2 + $0x20] sm:$0xff] %vm2666_vm3, %v2627_v53  ;;  %5044 = vpow2.f32 %v2756_v5  ;;  %v7051_v32 = vadd.f32 %v7026_v23, %v2689_v61 }
 0x6d3   : > { %v2629_v44 = vpop.permute.xlu1 %2628  ;;  %v2690_v30 = vld [vmem:[#allocation2 + $0x38] sm:$0xff] }
 0x6d4   : > { %2672 = vst.msk [vmem:[#allocation2 + $0x28] sm:$0xff] %vm2666_vm3, %v2629_v44  ;;  %v7055_v39 = vadd.f32 %v7026_v23, %v2690_v30  ;;  %v5039_v38 = vpop.eup %5038  ;;  %v2744_v35 = vmin.f32 %v7051_v32, 0.0 }
 0x6d5   : > { %v2137_v48 = vpop.permute.xlu0 %2136  ;;  %v5041_v37 = vpop.eup %5040  ;;  %v4150_v57 = vadd.f32 -1.0, %v5039_v38 }
 0x6d6   : > { %2175 = vst.msk [vmem:[#allocation2 + $0x50] sm:$0xff] %vm2164_vm5, %v2137_v48  ;;  %v2745_v62 = vmin.f32 %v7055_v39, 0.0  ;;  %v2766_v43 = vmul.f32 1.442695, %v2744_v35  ;;  %v4149_v15 = vadd.f32 -1.0, %v5041_v37 }
 0x6d7   : > { %v2139_v11 = vpop.permute.xlu1 %2138  ;;  %v2805_v20 = vsel %vm2725_vm11, %v7034_v33, %v4150_v57 }
 0x6d8   : > { %2176 = vst.msk [vmem:[#allocation2 + $0x58] sm:$0xff] %vm2164_vm5, %v2139_v11  ;;  %v2768_v51 = vmul.f32 1.442695, %v2745_v62  ;;  %v2804_v56 = vsel %vm2724_vm13, %v7030_v17, %v4149_v15 }
 0x6d9   : > { %v2639_v19 = vpop.permute.xlu0 %2638  ;;  %v2687_v10 = vld [vmem:[#allocation2 + $0x20] sm:$0xff]  ;;  %v2819_v42 = vpack.c.bf16 %v2805_v20, %v2804_v56 }
 0x6da   : > { %v5043_v31 = vpop.eup %5042  ;;  %2677 = vst.msk [vmem:[#allocation2 + $0x50] sm:$0xff] %vm2666_vm3, %v2639_v19  ;;  %v7063_v14 = vadd.f32 %v7026_v23, %v2687_v10  ;;  %5046 = vpow2.f32 %v2768_v51 }
 0x6db   : > { %v2641_v3 = vpop.permute.xlu1 %2640  ;;  %v4147_v45 = vadd.f32 -1.0, %v5043_v31  ;;  %v2688_v1 = vld [vmem:[#allocation2 + $0x28] sm:$0xff]  ;;  %5048 = vpow2.f32 %v2766_v43 }
 0x6dc   : > { %v5045_v24 = vpop.eup %5044  ;;  %2678 = vst.msk [vmem:[#allocation2 + $0x58] sm:$0xff] %vm2666_vm3, %v2641_v3  ;;  %v7067_v16 = vadd.f32 %v7026_v23, %v2688_v1  ;;  %v2742_v9 = vmin.f32 %v7063_v14, 0.0  ;;  %vm2726_vm13 = vcmp.gt.f32.partialorder %v7063_v14, 0.0 }
 0x6dd   : > { %v2133_v28 = vpop.permute.xlu0 %2132  ;;  %v4148_v12 = vadd.f32 -1.0, %v5045_v24  ;;  %v2802_v18 = vsel %vm2722_vm6, %v7042_v6, %v4147_v45  ;;  %vm2729_vm6 = vcmp.gt.f32.partialorder %v7055_v39, 0.0 }
 0x6de   : > { %2173 = vst.msk [vmem:[#allocation2 + $0x40] sm:$0xff] %vm2164_vm5, %v2133_v28  ;;  %v2743_v60 = vmin.f32 %v7067_v16, 0.0  ;;  %v2762_v22 = vmul.f32 1.442695, %v2742_v9  ;;  %vm2727_vm11 = vcmp.gt.f32.partialorder %v7067_v16, 0.0 }
 0x6df   : > { %v2135_v26 = vpop.permute.xlu1 %2134  ;;  %v2803_v52 = vsel %vm2723_vm10, %v2707_v58, %v4148_v12 }
 0x6e0   : > { %2174 = vst.msk [vmem:[#allocation2 + $0x48] sm:$0xff] %vm2164_vm5, %v2135_v26  ;;  %v2818_v41 = vpack.c.bf16 %v2803_v52, %v2802_v18  ;;  %5050 = vpow2.f32 %v2762_v22  ;;  %v2764_v47 = vmul.f32 1.442695, %v2743_v60 }
 0x6e1   : > { %v2635_v13 = vpop.permute.xlu0 %2634  ;;  %v2693_v54 = vld [vmem:[#allocation2 + $0x50] sm:$0xff] }
 0x6e2   : > { %2675 = vst.msk [vmem:[#allocation2 + $0x40] sm:$0xff] %vm2666_vm3, %v2635_v13  ;;  %4523 = vmatprep.mubr.msk.bf16.mxu1 %vm2842_vm15, %v2818_v41  ;;  %5052 = vpow2.f32 %v2764_v47  ;;  %v7083_v0 = vadd.f32 %v7026_v23, %v2693_v54 }
 0x6e3   : > { %4524 = vmatmul.mubr.msk.bf16.vlgmr.msra.gmra.mrb[32].mxu1 %vm2842_vm15, %v2819_v42  ;;  %v2637_v25 = vpop.permute.xlu1 %2636  ;;  %v2694_v29 = vld [vmem:[#allocation2 + $0x58] sm:$0xff] }
 0x6e4   : > { %2676 = vst.msk [vmem:[#allocation2 + $0x48] sm:$0xff] %vm2666_vm3, %v2637_v25  ;;  %v7087_v17 = vadd.f32 %v7026_v23, %v2694_v29  ;;  %v5047_v63 = vpop.eup %5046  ;;  %v2748_v40 = vmin.f32 %v7083_v0, 0.0 }
 0x6e5   : > { %v2145_v33 = vpop.permute.xlu0 %2144  ;;  %v5049_v2 = vpop.eup %5048  ;;  %v4154_v50 = vadd.f32 -1.0, %v5047_v63 }
 0x6e6   : > { %2179 = vst.msk [vmem:[#allocation2 + $0x70] sm:$0xff] %vm2164_vm5, %v2145_v33  ;;  %v2749_v27 = vmin.f32 %v7087_v17, 0.0  ;;  %v2774_v34 = vmul.f32 1.442695, %v2748_v40  ;;  %v4153_v8 = vadd.f32 -1.0, %v5049_v2  ;;  %vm2733_vm10 = vcmp.gt.f32.partialorder %v7087_v17, 0.0 }
 0x6e7   : > { %v2147_v49 = vpop.permute.xlu1 %2146  ;;  %v2809_v30 = vsel %vm2729_vm6, %v7055_v39, %v4154_v50  ;;  %vm2732_vm6 = vcmp.gt.f32.partialorder %v7083_v0, 0.0 }
 0x6e8   : > { %2180 = vst.msk [vmem:[#allocation2 + $0x78] sm:$0xff] %vm2164_vm5, %v2147_v49  ;;  %v2776_v6 = vmul.f32 1.442695, %v2749_v27 }
 0x6e9   : > { %v2141_v55 = vpop.permute.xlu0 %2140  ;;  %v2691_v46 = vld [vmem:[#allocation2 + $0x40] sm:$0xff] }
 0x6ea   : > { %v5051_v7 = vpop.eup %5050  ;;  %2177 = vst.msk [vmem:[#allocation2 + $0x60] sm:$0xff] %vm2164_vm5, %v2141_v55  ;;  %v7095_v59 = vadd.f32 %v7026_v23, %v2691_v46  ;;  %5054 = vpow2.f32 %v2776_v6 }
 0x6eb   : > { %v2143_v58 = vpop.permute.xlu1 %2142  ;;  %v4151_v4 = vadd.f32 -1.0, %v5051_v7  ;;  %v2692_v21 = vld [vmem:[#allocation2 + $0x48] sm:$0xff]  ;;  %5056 = vpow2.f32 %v2774_v34 }
 0x6ec   : > { %v5053_v36 = vpop.eup %5052  ;;  %2178 = vst.msk [vmem:[#allocation2 + $0x68] sm:$0xff] %vm2164_vm5, %v2143_v58  ;;  %v2715_v5 = vadd.f32 %v7026_v23, %v2692_v21  ;;  %v2746_v53 = vmin.f32 %v7095_v59, 0.0  ;;  %vm2728_vm5 = vcmp.gt.f32.partialorder %v7051_v32, 0.0 }
 0x6ed   : > { %v2643_v61 = vpop.permute.xlu0 %2642  ;;  %v4152_v44 = vadd.f32 -1.0, %v5053_v36  ;;  %v2806_v11 = vsel %vm2726_vm13, %v7063_v14, %v4151_v4  ;;  %v2808_v19 = vsel %vm2728_vm5, %v7051_v32, %v4153_v8 }
 0x6ee   : > { %2679 = vst.msk [vmem:[#allocation2 + $0x60] sm:$0xff] %vm2666_vm3, %v2643_v61  ;;  %v2747_v48 = vmin.f32 %v2715_v5, 0.0  ;;  %v2770_v62 = vmul.f32 1.442695, %v2746_v53  ;;  %v2821_v31 = vpack.c.bf16 %v2809_v30, %v2808_v19  ;;  %vm2731_vm13 = vcmp.gt.f32.partialorder %v2715_v5, 0.0 }
 0x6ef   : > { %v2645_v38 = vpop.permute.xlu1 %2644  ;;  %v2807_v35 = vsel %vm2727_vm11, %v7067_v16, %v4152_v44 }
 0x6f0   : > { %2680 = vst.msk [vmem:[#allocation2 + $0x68] sm:$0xff] %vm2666_vm3, %v2645_v38  ;;  %v2820_v37 = vpack.c.bf16 %v2807_v35, %v2806_v11  ;;  %5058 = vpow2.f32 %v2770_v62  ;;  %v2772_v10 = vmul.f32 1.442695, %v2747_v48 }
 0x6f1   : > { %v2647_v51 = vpop.permute.xlu0 %2646 }
 0x6f2   : > { %2681 = vst.msk [vmem:[#allocation2 + $0x70] sm:$0xff] %vm2666_vm3, %v2647_v51  ;;  %4527 = vmatprep.mubr.msk.bf16.mxu1 %vm2842_vm15, %v2820_v37  ;;  %5060 = vpow2.f32 %v2772_v10 }
 0x6f3   : > { %4528 = vmatmul.mubr.msk.bf16.gmra.mrb[36].mxu1 %vm2842_vm15, %v2821_v31  ;;  %v2649_v39 = vpop.permute.xlu1 %2648 }
 0x6f4   : > { %2682 = vst.msk [vmem:[#allocation2 + $0x78] sm:$0xff] %vm2666_vm3, %v2649_v39  ;;  %v5055_v3 = vpop.eup %5054  ;;  %vm2730_vm3 = vcmp.gt.f32.partialorder %v7095_v59, 0.0 }
 0x6f5   : > { %v2695_v57 = vld [vmem:[#allocation2 + $0x60] sm:$0xff]  ;;  %v5057_v43 = vpop.eup %5056  ;;  %v4158_v16 = vadd.f32 -1.0, %v5055_v3 }
 0x6f6   : > { %v2718_v14 = vadd.f32 %v7026_v23, %v2695_v57  ;;  %v4157_v26 = vadd.f32 -1.0, %v5057_v43 }
 0x6f7   : > { %v2696_v45 = vld [vmem:[#allocation2 + $0x68] sm:$0xff]  ;;  %v2813_v47 = vsel %vm2733_vm10, %v7087_v17, %v4158_v16 }
 0x6f8   : > { %v2719_v32 = vadd.f32 %v7026_v23, %v2696_v45  ;;  %v2750_v1 = vmin.f32 %v2718_v14, 0.0  ;;  %vm2734_vm11 = vcmp.gt.f32.partialorder %v2718_v14, 0.0 }
 0x6f9   : > { %v2697_v24 = vld [vmem:[#allocation2 + $0x70] sm:$0xff] }
 0x6fa   : > { %v5059_v15 = vpop.eup %5058  ;;  %v2751_v9 = vmin.f32 %v2719_v32, 0.0  ;;  %v2778_v28 = vmul.f32 1.442695, %v2750_v1  ;;  %v2720_v12 = vadd.f32 %v7026_v23, %v2697_v24  ;;  %vm2735_vm5 = vcmp.gt.f32.partialorder %v2719_v32, 0.0 }
 0x6fb   : > { %v4155_v20 = vadd.f32 -1.0, %v5059_v15  ;;  %v2698_v60 = vld [vmem:[#allocation2 + $0x78] sm:$0xff] }
 0x6fc   : > { %v5061_v22 = vpop.eup %5060  ;;  %5062 = vpow2.f32 %v2778_v28  ;;  %v2780_v18 = vmul.f32 1.442695, %v2751_v9  ;;  %v2721_v52 = vadd.f32 %v7026_v23, %v2698_v60  ;;  %v2752_v56 = vmin.f32 %v2720_v12, 0.0 }
 0x6fd   : > { %v4156_v41 = vadd.f32 -1.0, %v5061_v22  ;;  %v2810_v42 = vsel %vm2730_vm3, %v7095_v59, %v4155_v20  ;;  %v2812_v23 = vsel %vm2732_vm6, %v7083_v0, %v4157_v26  ;;  %vm2736_vm3 = vcmp.gt.f32.partialorder %v2720_v12, 0.0 }
 0x6fe   : > { %5064 = vpow2.f32 %v2780_v18  ;;  %v2753_v13 = vmin.f32 %v2721_v52, 0.0  ;;  %v2782_v25 = vmul.f32 1.442695, %v2752_v56  ;;  %v2823_v27 = vpack.c.bf16 %v2813_v47, %v2812_v23 }
 0x6ff   : > { %v2811_v54 = vsel %vm2731_vm13, %v2715_v5, %v4156_v41  ;;  %vm2737_vm10 = vcmp.gt.f32.partialorder %v2721_v52, 0.0 }
 0x700   : > { %v2822_v29 = vpack.c.bf16 %v2811_v54, %v2810_v42  ;;  %v2784_v33 = vmul.f32 1.442695, %v2753_v13  ;;  %5066 = vpow2.f32 %v2782_v25 }
 0x702   : > { %4531 = vmatprep.mubr.msk.bf16.mxu1 %vm2842_vm15, %v2822_v29  ;;  %5068 = vpow2.f32 %v2784_v33 }
 0x703   : > { %4532 = vmatmul.mubr.msk.bf16.gmra.mrb[40].mxu1 %vm2842_vm15, %v2823_v27 }
 0x706   : > { %v5063_v17 = vpop.eup %5062 }
 0x707   : > { %v4159_v63 = vadd.f32 -1.0, %v5063_v17  ;;  %v7749_v17 = vld [vmem:[#allocation45_spill] sm:$0xff] }
 0x708   : > { %v5065_v49 = vpop.eup %5064 }
 0x709   : > { %v4160_v40 = vadd.f32 -1.0, %v5065_v49  ;;  %v2814_v55 = vsel %vm2734_vm11, %v2718_v14, %v4159_v63  ;;  %v7750_v63 = vsub.s32 0, %v7749_v17 }
 0x70a   : > { %v5067_v2 = vpop.eup %5066 }
 0x70b   : > { %v2815_v46 = vsel %vm2735_vm5, %v2719_v32, %v4160_v40  ;;  %v4161_v0 = vadd.f32 -1.0, %v5067_v2 }
 0x70c   : > { %v5069_v6 = vpop.eup %5068  ;;  %v2824_v7 = vpack.c.bf16 %v2815_v46, %v2814_v55 }
 0x70d   : > { %v4162_v50 = vadd.f32 -1.0, %v5069_v6  ;;  %v2816_v59 = vsel %vm2736_vm3, %v2720_v12, %v4161_v0 }
 0x70e   : > { %4535 = vmatprep.mubr.msk.bf16.mxu1 %vm2842_vm15, %v2824_v7 }
 0x70f   : > { %v2817_v58 = vsel %vm2737_vm10, %v2721_v52, %v4162_v50  ;;  %v7767_v50 = vld [vmem:[#allocation62_spill] sm:$0xff] }
 0x710   : > { %v2825_v4 = vpack.c.bf16 %v2817_v58, %v2816_v59 }
 0x712   : > { %4536 = vmatmul.mubr.msk.bf16.gmra.mrb[44].mxu1 %vm2842_vm15, %v2825_v4 }
 0x7b6   : > { %v4525_v21 = vpop.f32.mrb[32].mxu1 }
 0x7b7   : > { %3077 = vperm.xlu1 %4729, %v4525_v21   ;;  %2992 = vrot.lane.b32.xlu0 %v4525_v21, %s5269_s12  ;;  %v2901_v34 = vpop.f32.mrb[33].mxu1 }
 0x7b8   : > { %v4526_v36 = vpop.f32.mrb[34].mxu1 }
 0x7b9   : > { %v2965_v8 = vpack.c.bf16 %v4526_v36, %v4525_v21  ;;  %v2904_v5 = vpop.f32.mrb[35].mxu1 }
 0x7ba   : > { %v2964_v53 = vpack.c.bf16 %v2904_v5, %v2901_v34 }
 0x7bb   : > { %2988 = vrot.lane.b32.xlu0 %v2901_v34, %s5269_s12  ;;  %2994 = vrot.lane.b32.xlu1 %v4526_v36, %s5269_s12 }
 0x7bc   : > { %4539 = vmatprep.subr.bf16.mxu0 %v2964_v53 }
 0x7bd   : > { %4540 = vmatpush3.bf16.msra.mxu0 %v2964_v53 }
 0x7be   : > { %4541 = vmatprep.subr.bf16.mxu0 %v2965_v8 }
 0x7bf   : > { %3069 = vperm.xlu0 %4730, %v2901_v34   ;;  %2990 = vrot.lane.b32.xlu1 %v2904_v5, %s5269_s12 }
 0x7c1   : > { %4542 = vmatpush3.bf16.msra.mxu0 %v2965_v8 }
 0x7c3   : > { %3073 = vperm.xlu1 %4729, %v2904_v5  }
 0x7c6   : > { %v4529_v61 = vpop.f32.mrb[36].mxu1 }
 0x7c7   : > { %3000 = vrot.lane.b32.xlu0 %v4529_v61, %s5269_s12  ;;  %v2917_v44 = vpop.f32.mrb[37].mxu1 }
 0x7c8   : > { %v4530_v30 = vpop.f32.mrb[38].mxu1 }
 0x7c9   : > { %v2967_v48 = vpack.c.bf16 %v4530_v30, %v4529_v61  ;;  %3002 = vrot.lane.b32.xlu1 %v4530_v30, %s5269_s12  ;;  %v2920_v62 = vpop.f32.mrb[39].mxu1 }
 0x7ca   : > { %v2966_v38 = vpack.c.bf16 %v2920_v62, %v2917_v44 }
 0x7cb   : > { %2996 = vrot.lane.b32.xlu0 %v2917_v44, %s5269_s12 }
 0x7cc   : > { %4543 = vmatprep.subr.bf16.mxu0 %v2966_v38 }
 0x7cd   : > { %2998 = vrot.lane.b32.xlu1 %v2920_v62, %s5269_s12  ;;  %4544 = vmatpush3.bf16.msra.mxu0 %v2966_v38 }
 0x7ce   : > { %4545 = vmatprep.subr.bf16.mxu0 %v2967_v48 }
 0x7d1   : > { %4546 = vmatpush3.bf16.msra.mxu0 %v2967_v48 }
 0x7d6   : > { %v4533_v11 = vpop.f32.mrb[40].mxu1 }
 0x7d7   : > { %3008 = vrot.lane.b32.xlu0 %v4533_v11, %s5269_s12  ;;  %v2933_v35 = vpop.f32.mrb[41].mxu1 }
 0x7d8   : > { %v4534_v37 = vpop.f32.mrb[42].mxu1 }
 0x7d9   : > { %v2969_v19 = vpack.c.bf16 %v4534_v37, %v4533_v11  ;;  %3010 = vrot.lane.b32.xlu1 %v4534_v37, %s5269_s12  ;;  %v2936_v10 = vpop.f32.mrb[43].mxu1 }
 0x7da   : > { %v2968_v51 = vpack.c.bf16 %v2936_v10, %v2933_v35 }
 0x7db   : > { %3004 = vrot.lane.b32.xlu0 %v2933_v35, %s5269_s12 }
 0x7dc   : > { %4547 = vmatprep.subr.bf16.mxu0 %v2968_v51 }
 0x7dd   : > { %3006 = vrot.lane.b32.xlu1 %v2936_v10, %s5269_s12  ;;  %4548 = vmatpush3.bf16.msra.mxu0 %v2968_v51 }
 0x7de   : > { %4549 = vmatprep.subr.bf16.mxu0 %v2969_v19 }
 0x7e1   : > { %3085 = vperm.xlu1 %4729, %v2917_v44   ;;  %4550 = vmatpush3.bf16.msra.mxu0 %v2969_v19 }
 0x7e5   : > { %3093 = vperm.xlu1 %4729, %v4529_v61   ;;  %v4537_v31 = vpop.f32.mrb[44].mxu1 }
 0x7e6   : > { %3016 = vrot.lane.b32.xlu0 %v4537_v31, %s5269_s12  ;;  %v2949_v39 = vpop.f32.mrb[45].mxu1 }
 0x7e7   : > { %v4538_v57 = vpop.f32.mrb[46].mxu1 }
 0x7e8   : > { %v2971_v14 = vpack.c.bf16 %v4538_v57, %v4537_v31  ;;  %v2952_v3 = vpop.f32.mrb[47].mxu1 }
 0x7e9   : > { %v2970_v45 = vpack.c.bf16 %v2952_v3, %v2949_v39  ;;  %3101 = vperm.xlu1 %4729, %v2933_v35  }
 0x7ea   : > { %3012 = vrot.lane.b32.xlu0 %v2949_v39, %s5269_s12 }
 0x7eb   : > { %4551 = vmatprep.subr.bf16.mxu0 %v2970_v45 }
 0x7ec   : > { %4552 = vmatpush3.bf16.msra.mxu0 %v2970_v45 }
 0x7ed   : > { %3109 = vperm.xlu1 %4729, %v4533_v11   ;;  %4553 = vmatprep.subr.bf16.mxu0 %v2971_v14 }
 0x7ee   : > { %3081 = vperm.xlu0 %4730, %v4526_v36  }
 0x7f0   : > { %4554 = vmatpush3.bf16.msra.mxu0 %v2971_v14 }
 0x7f1   : > { %3125 = vperm.xlu1 %4729, %v4537_v31  }
 0x7f2   : > { %3089 = vperm.xlu0 %4730, %v2920_v62  }
 0x7f5   : > { %3117 = vperm.xlu1 %4729, %v2949_v39  }
 0x7f6   : > { %3097 = vperm.xlu0 %4730, %v4530_v30  }
 0x7f9   : > { %3018 = vrot.lane.b32.xlu1 %v4538_v57, %s5269_s12 }
 0x7fa   : > { %3105 = vperm.xlu0 %4730, %v2936_v10  }
 0x7fd   : > { %3014 = vrot.lane.b32.xlu1 %v2952_v3, %s5269_s12 }
 0x7fe   : > { %3113 = vperm.xlu0 %4730, %v4534_v37  }
 0x802   : > { %3129 = vperm.xlu0 %4730, %v4538_v57  }
 0x806   : > { %3121 = vperm.xlu0 %4730, %v2952_v3  }
 0x829   : > { %v2993_v32 = vpop.permute.xlu0 %2992 }
 0x82d   : > { %v2989_v1 = vpop.permute.xlu0 %2988 }
 0x82e   : > { %3036 = vxpose.xlu1.b32.start [1/16] (narrow) %v2989_v1, 8 }
 0x836   : > { %v3078_v43 = vpop.permute.xlu1 %3077 }
 0x83a   : > { %v2995_v24 = vpop.permute.xlu1 %2994 }
 0x83e   : > { %v3070_v15 = vpop.permute.xlu0 %3069  ;;  %v2991_v16 = vpop.permute.xlu1 %2990 }
 0x83f   : > { %3037 = vxpose.xlu1.b32.cont [2/16] (narrow) %v2991_v16, 8  ;;  %v7757_v16 = vld [vmem:[#allocation55_spill] sm:$0xff] }
 0x842   : > { %v3074_v9 = vpop.permute.xlu1 %3073  ;;  %v3001_v28 = vpop.permute.xlu0 %3000 }
 0x843   : > { %3038 = vxpose.xlu1.b32.cont [3/16] (narrow) %v2993_v32, 8 }
 0x846   : > { %v3003_v12 = vpop.permute.xlu1 %3002  ;;  %v2997_v20 = vpop.permute.xlu0 %2996 }
 0x847   : > { %3039 = vxpose.xlu1.b32.cont [4/16] (narrow) %v2995_v24, 8 }
 0x84a   : > { %v2999_v60 = vpop.permute.xlu1 %2998  ;;  %v3009_v22 = vpop.permute.xlu0 %3008 }
 0x84b   : > { %3040 = vxpose.xlu1.b32.cont [5/16] (narrow) %v2997_v20, 8 }
 0x84e   : > { %v3011_v26 = vpop.permute.xlu1 %3010  ;;  %v3005_v18 = vpop.permute.xlu0 %3004 }
 0x84f   : > { %3041 = vxpose.xlu1.b32.cont [6/16] (narrow) %v2999_v60, 8 }
 0x852   : > { %v3007_v52 = vpop.permute.xlu1 %3006 }
 0x853   : > { %3042 = vxpose.xlu1.b32.cont [7/16] (narrow) %v3001_v28, 8 }
 0x857   : > { %3043 = vxpose.xlu1.b32.cont [8/16] (narrow) %v3003_v12, 8 }
 0x858   : > { %v3017_v56 = vpop.permute.xlu0 %3016 }
 0x85b   : > { %3044 = vxpose.xlu1.b32.cont [9/16] (narrow) %v3005_v18, 8 }
 0x85c   : > { %v3013_v42 = vpop.permute.xlu0 %3012 }
 0x85f   : > { %3045 = vxpose.xlu1.b32.cont [10/16] (narrow) %v3007_v52, 8 }
 0x860   : > { %v3086_v41 = vpop.permute.xlu1 %3085 }
 0x863   : > { %3046 = vxpose.xlu1.b32.cont [11/16] (narrow) %v3009_v22, 8  ;;  %v7759_v22 = vld [vmem:[#allocation54_spill] sm:$0xff] }
 0x864   : > { %v3094_v47 = vpop.permute.xlu1 %3093  ;;  %vm7760_vm3 = vcmp.gt.f32.partialorder %v7759_v22, 0.0 }
 0x867   : > { %3047 = vxpose.xlu1.b32.cont [12/16] (narrow) %v3011_v26, 8 }
 0x868   : > { %v3102_v13 = vpop.permute.xlu1 %3101 }
 0x86b   : > { %3048 = vxpose.xlu1.b32.cont [13/16] (narrow) %v3013_v42, 8 }
 0x86c   : > { %v7144_v54 = vpop.permute.xlu1 %3109 }
 0x86d   : > { %v3082_v0 = vpop.permute.xlu0 %3081 }
 0x870   : > { %v7146_v25 = vpop.permute.xlu1 %3125 }
 0x871   : > { %v3090_v61 = vpop.permute.xlu0 %3089 }
 0x874   : > { %v7148_v29 = vpop.permute.xlu1 %3117 }
 0x875   : > { %v3098_v51 = vpop.permute.xlu0 %3097 }
 0x878   : > { %v3019_v23 = vpop.permute.xlu1 %3018 }
 0x87c   : > { %v3015_v33 = vpop.permute.xlu1 %3014 }
 0x87d   : > { %3049 = vxpose.xlu1.b32.cont [14/16] (narrow) %v3015_v33, 8 }
 0x881   : > { %3050 = vxpose.xlu1.b32.cont [15/16] (narrow) %v3017_v56, 8  ;;  %v7761_v56 = vld [vmem:[#allocation61_spill] sm:$0xff] }
 0x885   : > { %3051 = vxpose.xlu1.b32.end [16/16] (narrow) %v3019_v23, 8 }
 0x8c9   : > { %v3052_v27 = vpop.trf.xlu1 }
 0x8ca   : > { %v7152_v49 = vrot.slane %v3052_v27, %v7750_v63  ;;  %v7763_v27 = vld [vmem:[#allocation60_spill] sm:$0xff] }
 0x8cc   : > { %v3136_v40 = vadd.f32 %v7152_v49, %v3070_v15  ;;  %v3137_v2 = vadd.f32 %v7152_v49, %v3074_v9  ;;  %v3138_v6 = vadd.f32 %v7152_v49, %v3078_v43  ;;  %v3139_v21 = vadd.f32 %v7152_v49, %v3082_v0  ;;  %v3106_v15 = vpop.permute.xlu0 %3105 }
 0x8cd   : > { %v3140_v53 = vadd.f32 %v7152_v49, %v3086_v41  ;;  %v3141_v38 = vadd.f32 %v7152_v49, %v3090_v61  ;;  %v3142_v10 = vadd.f32 %v7152_v49, %v3094_v47  ;;  %v3143_v3 = vadd.f32 %v7152_v49, %v3098_v51 }
 0x8ce   : > { %vm3152_vm13 = vcmp.gt.f32.partialorder %v3136_v40, 0.0  ;;  %v3168_v55 = vmul.f32 0.2, %v3136_v40  ;;  %v3169_v46 = vmul.f32 0.2, %v3137_v2  ;;  %vm3153_vm6 = vcmp.gt.f32.partialorder %v3137_v2, 0.0 }
 0x8cf   : > { %v3170_v4 = vmul.f32 0.2, %v3138_v6  ;;  %vm3154_vm11 = vcmp.gt.f32.partialorder %v3138_v6, 0.0  ;;  %v3171_v5 = vmul.f32 0.2, %v3139_v21  ;;  %vm3155_vm5 = vcmp.gt.f32.partialorder %v3139_v21, 0.0 }
 0x8d0   : > { %v3184_v7 = vsel %vm3152_vm13, %v3136_v40, %v3168_v55  ;;  %v3185_v58 = vsel %vm3153_vm6, %v3137_v2, %v3169_v46  ;;  %v3172_v62 = vmul.f32 0.2, %v3140_v53  ;;  %v3173_v19 = vmul.f32 0.2, %v3141_v38  ;;  %v3114_v60 = vpop.permute.xlu0 %3113  ;;  %v7765_v55 = vld [vmem:[#allocation64_spill] sm:$0xff] }
 0x8d1   : > { %v7159_v59 = vsel %vm465_vm2, %v3184_v7, -1e+30  ;;  %v7165_v36 = vsel %vm466_vm1, %v3185_v58, -1e+30  ;;  %v3186_v8 = vsel %vm3154_vm11, %v3138_v6, %v3170_v4  ;;  %v3187_v48 = vsel %vm3155_vm5, %v3139_v21, %v3171_v5 }
 0x8d2   : > { %3216 = vmax.xlane.f32.xlu0 %v7159_v59  ;;  %v7171_v30 = vsel %vm467_vm8, %v3186_v8, -1e+30  ;;  %vm3156_vm1 = vcmp.gt.f32.partialorder %v3140_v53, 0.0  ;;  %v7177_v35 = vsel %vm468_vm7, %v3187_v48, -1e+30  ;;  %vm3157_vm2 = vcmp.gt.f32.partialorder %v3141_v38, 0.0 }
 0x8d3   : > { %v3188_v37 = vsel %vm3156_vm1, %v3140_v53, %v3172_v62  ;;  %v3189_v57 = vsel %vm3157_vm2, %v3141_v38, %v3173_v19  ;;  %v3174_v14 = vmul.f32 0.2, %v3142_v10  ;;  %vm3158_vm7 = vcmp.gt.f32.partialorder %v3142_v10, 0.0  ;;  %v7772_v19 = vld [vmem:[#allocation70_spill] sm:$0xff] }
 0x8d4   : > { %v7183_v39 = vsel %vm469_vm0, %v3188_v37, -1e+30  ;;  %v7189_v32 = vsel %vm470_vm14, %v3189_v57, -1e+30  ;;  %v3175_v43 = vmul.f32 0.2, %v3143_v3  ;;  %v3144_v24 = vadd.f32 %v7152_v49, %v3102_v13  ;;  %v3130_v33 = vpop.permute.xlu0 %3129 }
 0x8d5   : > { %v3190_v1 = vsel %vm3158_vm7, %v3142_v10, %v3174_v14  ;;  %vm3159_vm8 = vcmp.gt.f32.partialorder %v3143_v3, 0.0  ;;  %vm7758_vm0 = vcmp.gt.f32.partialorder %v7757_v16, 0.0  ;;  %v3145_v20 = vadd.f32 %v7152_v49, %v3106_v15 }
 0x8d6   : > { %3218 = vmax.xlane.f32.xlu0 %v7165_v36  ;;  %v7195_v9 = vsel %vm7758_vm0, %v3190_v1, -1e+30  ;;  %v3191_v28 = vsel %vm3159_vm8, %v3143_v3, %v3175_v43  ;;  %v3176_v12 = vmul.f32 0.2, %v3144_v24  ;;  %vm3160_vm14 = vcmp.gt.f32.partialorder %v3144_v24, 0.0 }
 0x8d7   : > { %v7201_v26 = vsel %vm7760_vm3, %v3191_v28, -1e+30  ;;  %v3177_v52 = vmul.f32 0.2, %v3145_v20  ;;  %v3146_v41 = vadd.f32 %v7152_v49, %v7144_v54  ;;  %vm3161_vm10 = vcmp.gt.f32.partialorder %v3145_v20, 0.0 }
 0x8d8   : > { %v3192_v18 = vsel %vm3160_vm14, %v3144_v24, %v3176_v12  ;;  %vm7762_vm13 = vcmp.gt.f32.partialorder %v7761_v56, 0.0  ;;  %v3147_v23 = vadd.f32 %v7152_v49, %v3114_v60  ;;  %vm7764_vm11 = vcmp.gt.f32.partialorder %v7763_v27, 0.0  ;;  %v3122_v2 = vpop.permute.xlu0 %3121 }
 0x8d9   : > { %v7208_v47 = vsel %vm7762_vm13, %v3192_v18, -1e+30  ;;  %v3193_v13 = vsel %vm3161_vm10, %v3145_v20, %v3177_v52  ;;  %v3178_v42 = vmul.f32 0.2, %v3146_v41  ;;  %vm3162_vm6 = vcmp.gt.f32.partialorder %v3146_v41, 0.0 }
 0x8da   : > { %3220 = vmax.xlane.f32.xlu0 %v7171_v30  ;;  %v7214_v17 = vsel %vm7764_vm11, %v3193_v13, -1e+30  ;;  %v3179_v63 = vmul.f32 0.2, %v3147_v23  ;;  %v3148_v40 = vadd.f32 %v7152_v49, %v7148_v29  ;;  %vm3163_vm5 = vcmp.gt.f32.partialorder %v3147_v23, 0.0 }
 0x8db   : > { %v3194_v54 = vsel %vm3162_vm6, %v3146_v41, %v3178_v42  ;;  %vm7766_vm1 = vcmp.gt.f32.partialorder %v7765_v55, 0.0  ;;  %v3149_v0 = vadd.f32 %v7152_v49, %v3122_v2  ;;  %vm7768_vm7 = vcmp.gt.f32.partialorder %v7767_v50, 0.0 }
 0x8dc   : > { %v7221_v46 = vsel %vm7766_vm1, %v3194_v54, -1e+30  ;;  %v3195_v6 = vsel %vm3163_vm5, %v3147_v23, %v3179_v63  ;;  %v3180_v7 = vmul.f32 0.2, %v3148_v40  ;;  %vm3164_vm2 = vcmp.gt.f32.partialorder %v3148_v40, 0.0 }
 0x8dd   : > { %v7227_v58 = vsel %vm7768_vm7, %v3195_v6, -1e+30  ;;  %v3181_v4 = vmul.f32 0.2, %v3149_v0  ;;  %v3150_v21 = vadd.f32 %v7152_v49, %v7146_v25  ;;  %vm3165_vm8 = vcmp.gt.f32.partialorder %v3149_v0, 0.0 }
 0x8de   : > { %3222 = vmax.xlane.f32.xlu0 %v7177_v35  ;;  %v3196_v29 = vsel %vm3164_vm2, %v3148_v40, %v3180_v7  ;;  %v3151_v61 = vadd.f32 %v7152_v49, %v3130_v33  ;;  %vm3489_vm3 = vcmask 1048320  }
 0x8df   : > { %v7234_v8 = vsel %vm477_vm9, %v3196_v29, -1e+30  ;;  %v3197_v5 = vsel %vm3165_vm8, %v3149_v0, %v3181_v4  ;;  %v3182_v53 = vmul.f32 0.2, %v3150_v21  ;;  %vm3166_vm0 = vcmp.gt.f32.partialorder %v3150_v21, 0.0 }
 0x8e0   : > { %v7240_v48 = vsel %vm478_vm4, %v3197_v5, -1e+30  ;;  %v3183_v25 = vmul.f32 0.2, %v3151_v61  ;;  %vm3167_vm14 = vcmp.gt.f32.partialorder %v3151_v61, 0.0  ;;  %vm7773_vm9 = vcmp.gt.f32.partialorder %v7772_v19, 0.0 }
 0x8e1   : > { %v3198_v62 = vsel %vm3166_vm0, %v3150_v21, %v3182_v53  ;;  %vm3477_vm4 = vcmask 523520  }
 0x8e2   : > { %3224 = vmax.xlane.f32.xlu0 %v7183_v39  ;;  %v7245_v11 = vsel %vm479_vm12, %v3198_v62, -1e+30  ;;  %v3199_v37 = vsel %vm3167_vm14, %v3151_v61, %v3183_v25  ;;  %vm3483_vm12 = vcmask 785920  }
 0x8e3   : > { %v7250_v49 = vsel %vm7773_vm9, %v3199_v37, -1e+30 }
 0x8e6   : > { %3226 = vmax.xlane.f32.xlu0 %v7189_v32 }
 0x8ea   : > { %3228 = vmax.xlane.f32.xlu0 %v7195_v9 }
 0x8ee   : > { %3230 = vmax.xlane.f32.xlu0 %v7201_v26 }
 0x8f2   : > { %3232 = vmax.xlane.f32.xlu0 %v7208_v47 }
 0x8f6   : > { %3234 = vmax.xlane.f32.xlu0 %v7214_v17 }
 0x8fa   : > { %3236 = vmax.xlane.f32.xlu0 %v7221_v46 }
 0x8fe   : > { %3238 = vmax.xlane.f32.xlu0 %v7227_v58 }
 0x902   : > { %3240 = vmax.xlane.f32.xlu0 %v7234_v8 }
 0x906   : > { %3242 = vmax.xlane.f32.xlu0 %v7240_v48 }
 0x90a   : > { %3244 = vmax.xlane.f32.xlu0 %v7245_v11 }
 0x90e   : > { %3246 = vmax.xlane.f32.xlu0 %v7250_v49 }
 0x95f   : > { %v3217_v10 = vpop.xlane.xlu0 %3216 }
 0x960   : > { %v3248_v51 = vsub.f32 %v7159_v59, %v3217_v10 }
 0x962   : > { %v3264_v31 = vmul.f32 1.442695, %v3248_v51 }
 0x963   : > { %v3219_v57 = vpop.xlane.xlu0 %3218 }
 0x964   : > { %5070 = vpow2.f32 %v3264_v31  ;;  %v3249_v14 = vsub.f32 %v7165_v36, %v3219_v57 }
 0x966   : > { %v3266_v3 = vmul.f32 1.442695, %v3249_v14 }
 0x967   : > { %v3221_v45 = vpop.xlane.xlu0 %3220 }
 0x968   : > { %5072 = vpow2.f32 %v3266_v3  ;;  %v3250_v1 = vsub.f32 %v7171_v30, %v3221_v45 }
 0x96a   : > { %v3268_v43 = vmul.f32 1.442695, %v3250_v1 }
 0x96b   : > { %v3223_v24 = vpop.xlane.xlu0 %3222 }
 0x96c   : > { %5074 = vpow2.f32 %v3268_v43  ;;  %v3251_v15 = vsub.f32 %v7177_v35, %v3223_v24 }
 0x96e   : > { %v7257_v16 = vpop.eup %5070  ;;  %v3270_v28 = vmul.f32 1.442695, %v3251_v15 }
 0x96f   : > { %3296 = vadd.xlane.f32.xlu0 %v7257_v16  ;;  %v3225_v59 = vpop.xlane.xlu0 %3224 }
 0x970   : > { %5076 = vpow2.f32 %v3270_v28  ;;  %v3252_v12 = vsub.f32 %v7183_v39, %v3225_v59 }
 0x972   : > { %v7261_v36 = vpop.eup %5072  ;;  %v3272_v20 = vmul.f32 1.442695, %v3252_v12 }
 0x973   : > { %3298 = vadd.xlane.f32.xlu0 %v7261_v36  ;;  %v3227_v30 = vpop.xlane.xlu0 %3226 }
 0x974   : > { %5078 = vpow2.f32 %v3272_v20  ;;  %v3253_v60 = vsub.f32 %v7189_v32, %v3227_v30 }
 0x976   : > { %v7265_v22 = vpop.eup %5074  ;;  %v3274_v35 = vmul.f32 1.442695, %v3253_v60 }
 0x977   : > { %3300 = vadd.xlane.f32.xlu1 %v7265_v22  ;;  %v3229_v18 = vpop.xlane.xlu0 %3228 }
 0x978   : > { %5080 = vpow2.f32 %v3274_v35  ;;  %v3254_v52 = vsub.f32 %v7195_v9, %v3229_v18 }
 0x97a   : > { %v7269_v41 = vpop.eup %5076  ;;  %v3276_v39 = vmul.f32 1.442695, %v3254_v52 }
 0x97b   : > { %3302 = vadd.xlane.f32.xlu0 %v7269_v41  ;;  %v3231_v56 = vpop.xlane.xlu0 %3230 }
 0x97c   : > { %5082 = vpow2.f32 %v3276_v39  ;;  %v3255_v13 = vsub.f32 %v7201_v26, %v3231_v56 }
 0x97e   : > { %v7273_v42 = vpop.eup %5078  ;;  %v3278_v32 = vmul.f32 1.442695, %v3255_v13 }
 0x97f   : > { %3304 = vadd.xlane.f32.xlu0 %v7273_v42  ;;  %v3233_v23 = vpop.xlane.xlu0 %3232 }
 0x980   : > { %5084 = vpow2.f32 %v3278_v32  ;;  %v3256_v33 = vsub.f32 %v7208_v47, %v3233_v23 }
 0x982   : > { %v7277_v27 = vpop.eup %5080  ;;  %v3280_v9 = vmul.f32 1.442695, %v3256_v33 }
 0x983   : > { %3306 = vadd.xlane.f32.xlu0 %v7277_v27  ;;  %v3235_v54 = vpop.xlane.xlu0 %3234 }
 0x984   : > { %5086 = vpow2.f32 %v3280_v9  ;;  %v3257_v63 = vsub.f32 %v7214_v17, %v3235_v54 }
 0x986   : > { %v7281_v40 = vpop.eup %5082  ;;  %v3282_v26 = vmul.f32 1.442695, %v3257_v63 }
 0x987   : > { %3308 = vadd.xlane.f32.xlu0 %v7281_v40  ;;  %v3237_v2 = vpop.xlane.xlu0 %3236 }
 0x988   : > { %5088 = vpow2.f32 %v3282_v26  ;;  %v3258_v55 = vsub.f32 %v7221_v46, %v3237_v2 }
 0x98a   : > { %v7285_v6 = vpop.eup %5084  ;;  %v3284_v47 = vmul.f32 1.442695, %v3258_v55 }
 0x98b   : > { %3310 = vadd.xlane.f32.xlu0 %v7285_v6  ;;  %v3239_v7 = vpop.xlane.xlu0 %3238 }
 0x98c   : > { %5090 = vpow2.f32 %v3284_v47  ;;  %v3259_v0 = vsub.f32 %v7227_v58, %v3239_v7 }
 0x98e   : > { %v7289_v50 = vpop.eup %5086  ;;  %v3286_v17 = vmul.f32 1.442695, %v3259_v0 }
 0x98f   : > { %3312 = vadd.xlane.f32.xlu0 %v7289_v50  ;;  %v3241_v29 = vpop.xlane.xlu0 %3240 }
 0x990   : > { %5092 = vpow2.f32 %v3286_v17  ;;  %v3260_v4 = vsub.f32 %v7234_v8, %v3241_v29 }
 0x992   : > { %v7293_v21 = vpop.eup %5088  ;;  %v3288_v46 = vmul.f32 1.442695, %v3260_v4 }
 0x993   : > { %3314 = vadd.xlane.f32.xlu0 %v7293_v21  ;;  %v3243_v34 = vpop.xlane.xlu0 %3242 }
 0x994   : > { %5094 = vpow2.f32 %v3288_v46  ;;  %v3261_v5 = vsub.f32 %v7240_v48, %v3243_v34 }
 0x996   : > { %v7297_v53 = vpop.eup %5090  ;;  %v3290_v58 = vmul.f32 1.442695, %v3261_v5 }
 0x997   : > { %3316 = vadd.xlane.f32.xlu0 %v7297_v53  ;;  %v3245_v61 = vpop.xlane.xlu0 %3244 }
 0x998   : > { %5096 = vpow2.f32 %v3290_v58  ;;  %v3262_v44 = vsub.f32 %v7245_v11, %v3245_v61 }
 0x99a   : > { %v7301_v62 = vpop.eup %5092  ;;  %v3292_v8 = vmul.f32 1.442695, %v3262_v44 }
 0x99b   : > { %3318 = vadd.xlane.f32.xlu0 %v7301_v62  ;;  %v3247_v25 = vpop.xlane.xlu0 %3246 }
 0x99c   : > { %5098 = vpow2.f32 %v3292_v8  ;;  %v3263_v38 = vsub.f32 %v7250_v49, %v3247_v25  ;;  %v4742_v8 = vld [vmem:[#allocation7 + $0x40] sm:$0xff]  }
 0x99d   : > { %v4743_v25 = vld [vmem:[#allocation7] sm:$0xff]   ;;  %4320 = vmatprep.subr.bf16.mxu1 %v4742_v8 }
 0x99e   : > { %v7305_v37 = vpop.eup %5094  ;;  %v3294_v48 = vmul.f32 1.442695, %v3263_v38  ;;  %v4744_v38 = vld [vmem:[#allocation7 + $0x48] sm:$0xff]   ;;  %4321 = vmatpush3.bf16.msra.mxu1 %v4743_v25 }
 0x99f   : > { %3320 = vadd.xlane.f32.xlu0 %v7305_v37  ;;  %4322 = vmatprep.subr.bf16.mxu1 %v4744_v38 }
 0x9a0   : > { %5100 = vpow2.f32 %v3294_v48  ;;  %v4745_v48 = vld [vmem:[#allocation7 + $0x8] sm:$0xff]  }
 0x9a2   : > { %v7308_v19 = vpop.eup %5096  ;;  %4323 = vmatpush3.bf16.msra.mxu1 %v4745_v48 }
 0x9a3   : > { %3322 = vadd.xlane.f32.xlu1 %v7308_v19 }
 0x9a6   : > { %v7311_v11 = vpop.eup %5098 }
 0x9a7   : > { %3324 = vadd.xlane.f32.xlu0 %v7311_v11 }
 0x9aa   : > { %v7314_v10 = vpop.eup %5100 }
 0x9ab   : > { %3326 = vadd.xlane.f32.xlu1 %v7314_v10 }
 0x9fc   : > { %v3297_v51 = vpop.xlane.xlu0 %3296 }
 0x9fd   : > { %5102 = vrcp.f32 %v3297_v51  ;;  %v4748_v51 = vld [vmem:[#allocation7 + $0x58] sm:$0xff]  }
 0xa00   : > { %v3299_v49 = vpop.xlane.xlu0 %3298 }
 0xa01   : > { %5104 = vrcp.f32 %v3299_v49  ;;  %v7336_v49 = vld [vmem:[%s7464_s5] ss:$0 sm:$0xff] }
 0xa04   : > { %v3301_v31 = vpop.xlane.xlu1 %3300 }
 0xa05   : > { %5106 = vrcp.f32 %v3301_v31 }
 0xa07   : > { %v5103_v14 = vpop.eup %5102 }
 0xa08   : > { %v3303_v57 = vpop.xlane.xlu0 %3302  ;;  %v3344_v1 = vmul.f32 %v5103_v14, %v7257_v16 }
 0xa09   : > { %5108 = vrcp.f32 %v3303_v57 }
 0xa0b   : > { %v5105_v3 = vpop.eup %5104 }
 0xa0c   : > { %v3305_v45 = vpop.xlane.xlu0 %3304  ;;  %v3345_v43 = vmul.f32 %v5105_v3, %v7261_v36 }
 0xa0d   : > { %5110 = vrcp.f32 %v3305_v45 }
 0xa0e   : > { %v3360_v24 = vpack.c.bf16 %v3345_v43, %v3344_v1  ;;  %v4750_v43 = vld [vmem:[#allocation7 + $0x60] sm:$0xff]  }
 0xa0f   : > { %v5107_v28 = vpop.eup %5106 }
 0xa10   : > { %4555 = vmatprep.mubr.bf16.mxu0 %v3360_v24  ;;  %v3307_v15 = vpop.xlane.xlu0 %3306  ;;  %v3346_v12 = vmul.f32 %v5107_v28, %v7265_v22  ;;  %v4751_v24 = vld [vmem:[#allocation7 + $0x20] sm:$0xff]   ;;  %v4752_v28 = vld [vmem:[#allocation7 + $0x68] sm:$0xff]  }
 0xa11   : > { %5112 = vrcp.f32 %v3307_v15 }
 0xa13   : > { %v5109_v59 = vpop.eup %5108 }
 0xa14   : > { %v3347_v20 = vmul.f32 %v5109_v59, %v7269_v41  ;;  %v3309_v30 = vpop.xlane.xlu0 %3308  ;;  %v4753_v59 = vld [vmem:[#allocation7 + $0x28] sm:$0xff]  }
 0xa15   : > { %5114 = vrcp.f32 %v3309_v30  ;;  %v4756_v30 = vld [vmem:[#allocation7 + $0x78] sm:$0xff]  }
 0xa16   : > { %v3361_v60 = vpack.c.bf16 %v3347_v20, %v3346_v12  ;;  %v4754_v12 = vld [vmem:[#allocation7 + $0x70] sm:$0xff]  }
 0xa17   : > { %v5111_v18 = vpop.eup %5110  ;;  %v4755_v20 = vld [vmem:[#allocation7 + $0x30] sm:$0xff]  }
 0xa18   : > { %v3311_v35 = vpop.xlane.xlu0 %3310  ;;  %4556 = vmatmul.mubr.bf16.vlgmr.msra.gmra.mrb[48].mxu0 %v3361_v60  ;;  %v3348_v52 = vmul.f32 %v5111_v18, %v7273_v42 }
 0xa19   : > { %5116 = vrcp.f32 %v3311_v35 }
 0xa1b   : > { %v5113_v16 = vpop.eup %5112 }
 0xa1c   : > { %v3313_v36 = vpop.xlane.xlu0 %3312  ;;  %v3349_v39 = vmul.f32 %v5113_v16, %v7277_v27 }
 0xa1d   : > { %5118 = vrcp.f32 %v3313_v36 }
 0xa1e   : > { %v3362_v56 = vpack.c.bf16 %v3349_v39, %v3348_v52  ;;  %v4757_v52 = vld [vmem:[#allocation7 + $0x38] sm:$0xff]  }
 0xa1f   : > { %v5115_v22 = vpop.eup %5114 }
 0xa20   : > { %v3315_v13 = vpop.xlane.xlu0 %3314  ;;  %4559 = vmatprep.mubr.bf16.mxu0 %v3362_v56  ;;  %v3350_v23 = vmul.f32 %v5115_v22, %v7281_v40  ;;  %v4758_v22 = vld [vmem:[#allocation7 + $0xc0] sm:$0xff]  }
 0xa21   : > { %5120 = vrcp.f32 %v3315_v13  ;;  %4342 = vmatprep.subr.bf16.mxu0 %v4758_v22 }
 0xa23   : > { %v5117_v41 = vpop.eup %5116 }
 0xa24   : > { %v3317_v32 = vpop.xlane.xlu0 %3316  ;;  %v3351_v33 = vmul.f32 %v5117_v41, %v7285_v6  ;;  %v4759_v41 = vld [vmem:[#allocation7 + $0x80] sm:$0xff]  }
 0xa25   : > { %5122 = vrcp.f32 %v3317_v32  ;;  %4343 = vmatpush3.bf16.msra.mxu0 %v4759_v41  ;;  %v4760_v32 = vld [vmem:[#allocation7 + $0xc8] sm:$0xff]  }
 0xa26   : > { %v3363_v9 = vpack.c.bf16 %v3351_v33, %v3350_v23  ;;  %v4761_v23 = vld [vmem:[#allocation7 + $0x88] sm:$0xff]   ;;  %v4762_v33 = vld [vmem:[#allocation7 + $0xd0] sm:$0xff]   ;;  %4344 = vmatprep.subr.bf16.mxu0 %v4760_v32  ;;  %v4174_v32 = vld [vmem:[%s7466_s7] ss:$0 sm:$0xff] }
 0xa27   : > { %v5119_v63 = vpop.eup %5118 }
 0xa28   : > { %v3319_v54 = vpop.xlane.xlu0 %3318  ;;  %4560 = vmatmul.mubr.bf16.gmra.mrb[52].mxu0 %v3363_v9  ;;  %v3352_v26 = vmul.f32 %v5119_v63, %v7289_v50  ;;  %v4763_v9 = vld [vmem:[#allocation7 + $0x90] sm:$0xff]  }
 0xa29   : > { %5124 = vrcp.f32 %v3319_v54  ;;  %4345 = vmatpush3.bf16.msra.mxu0 %v4761_v23  ;;  %v4764_v54 = vld [vmem:[#allocation7 + $0xd8] sm:$0xff]  }
 0xa2a   : > { %4346 = vmatprep.subr.bf16.mxu0 %v4762_v33 }
 0xa2b   : > { %v5121_v42 = vpop.eup %5120 }
 0xa2c   : > { %v3321_v27 = vpop.xlane.xlu0 %3320  ;;  %v3353_v2 = vmul.f32 %v5121_v42, %v7293_v21 }
 0xa2d   : > { %5126 = vrcp.f32 %v3321_v27  ;;  %4347 = vmatpush3.bf16.msra.mxu0 %v4763_v9 }
 0xa2e   : > { %v3364_v55 = vpack.c.bf16 %v3353_v2, %v3352_v26  ;;  %4348 = vmatprep.subr.bf16.mxu0 %v4764_v54 }
 0xa2f   : > { %v5123_v7 = vpop.eup %5122 }
 0xa30   : > { %v3323_v47 = vpop.xlane.xlu1 %3322  ;;  %4563 = vmatprep.mubr.bf16.mxu0 %v3364_v55  ;;  %v3354_v0 = vmul.f32 %v5123_v7, %v7297_v53  ;;  %v4765_v55 = vld [vmem:[#allocation7 + $0x98] sm:$0xff]  }
 0xa31   : > { %5128 = vrcp.f32 %v3323_v47  ;;  %4349 = vmatpush3.bf16.msra.mxu0 %v4765_v55 }
 0xa33   : > { %v5125_v40 = vpop.eup %5124 }
 0xa34   : > { %v3325_v6 = vpop.xlane.xlu0 %3324  ;;  %v3355_v17 = vmul.f32 %v5125_v40, %v7301_v62  ;;  %v4766_v40 = vld [vmem:[#allocation7 + $0xe0] sm:$0xff]  }
 0xa35   : > { %5130 = vrcp.f32 %v3325_v6  ;;  %v4767_v6 = vld [vmem:[#allocation7 + $0xa0] sm:$0xff]   ;;  %4350 = vmatprep.subr.bf16.mxu0 %v4766_v40 }
 0xa36   : > { %v3365_v29 = vpack.c.bf16 %v3355_v17, %v3354_v0  ;;  %4351 = vmatpush3.bf16.msra.mxu0 %v4767_v6  ;;  %v4768_v0 = vld [vmem:[#allocation7 + $0xe8] sm:$0xff]   ;;  %v4208_v6 = vld [vmem:[%s7468_s9] ss:$0 sm:$0xff] }
 0xa37   : > { %v5127_v46 = vpop.eup %5126  ;;  %v4769_v17 = vld [vmem:[#allocation7 + $0xa8] sm:$0xff]   ;;  %4352 = vmatprep.subr.bf16.mxu0 %v4768_v0 }
 0xa38   : > { %v3327_v4 = vpop.xlane.xlu1 %3326  ;;  %4564 = vmatmul.mubr.bf16.gmra.mrb[56].mxu0 %v3365_v29  ;;  %v3356_v21 = vmul.f32 %v5127_v46, %v7305_v37  ;;  %v4746_v37 = vld [vmem:[#allocation7 + $0x50] sm:$0xff]   ;;  %v4772_v46 = vld [vmem:[#allocation7 + $0xf8] sm:$0xff]  }
 0xa39   : > { %5132 = vrcp.f32 %v3327_v4  ;;  %4324 = vmatprep.subr.bf16.mxu1 %v4746_v37  ;;  %v4770_v29 = vld [vmem:[#allocation7 + $0xf0] sm:$0xff]  }
 0xa3a   : > { %4353 = vmatpush3.bf16.msra.mxu0 %v4769_v17  ;;  %v4771_v4 = vld [vmem:[#allocation7 + $0xb0] sm:$0xff]  }
 0xa3b   : > { %v5129_v50 = vpop.eup %5128  ;;  %4354 = vmatprep.subr.bf16.mxu0 %v4770_v29 }
 0xa3c   : > { %v3357_v34 = vmul.f32 %v5129_v50, %v7308_v19  ;;  %v4747_v19 = vld [vmem:[#allocation7 + $0x10] sm:$0xff]  }
 0xa3d   : > { %4325 = vmatpush3.bf16.msra.mxu1 %v4747_v19 }
 0xa3e   : > { %v3366_v5 = vpack.c.bf16 %v3357_v34, %v3356_v21  ;;  %4326 = vmatprep.subr.bf16.mxu1 %v4748_v51  ;;  %4355 = vmatpush3.bf16.msra.mxu0 %v4771_v4 }
 0xa3f   : > { %v5131_v58 = vpop.eup %5130  ;;  %4356 = vmatprep.subr.bf16.mxu0 %v4772_v46 }
 0xa40   : > { %4567 = vmatprep.mubr.bf16.mxu0 %v3366_v5  ;;  %v3358_v44 = vmul.f32 %v5131_v58, %v7311_v11 }
 0xa43   : > { %v5133_v61 = vpop.eup %5132 }
 0xa44   : > { %v3359_v53 = vmul.f32 %v5133_v61, %v7314_v10  ;;  %v4749_v10 = vld [vmem:[#allocation7 + $0x18] sm:$0xff]  }
 0xa45   : > { %4327 = vmatpush3.bf16.msra.mxu1 %v4749_v10  ;;  %v4773_v61 = vld [vmem:[#allocation7 + $0xb8] sm:$0xff]  }
 0xa46   : > { %v3367_v62 = vpack.c.bf16 %v3359_v53, %v3358_v44  ;;  %4328 = vmatprep.subr.bf16.mxu1 %v4750_v43  ;;  %4357 = vmatpush3.bf16.msra.mxu0 %v4773_v61 }
 0xa48   : > { %4568 = vmatmul.mubr.bf16.gmra.mrb[60].mxu0 %v3367_v62 }
 0xa49   : > { %4329 = vmatpush3.bf16.msra.mxu1 %v4751_v24 }
 0xa4a   : > { %4330 = vmatprep.subr.bf16.mxu1 %v4752_v28 }
 0xa4d   : > { %4331 = vmatpush3.bf16.msra.mxu1 %v4753_v59 }
 0xa4e   : > { %4332 = vmatprep.subr.bf16.mxu1 %v4754_v12  ;;  %v4774_v12 = vld [vmem:[%s7467_s8] sm:$0xff]  }
 0xa51   : > { %4333 = vmatpush3.bf16.msra.mxu1 %v4755_v20  ;;  %v5282_v20 = vmov 0.0  }
 0xa52   : > { %4334 = vmatprep.subr.bf16.mxu1 %v4756_v30  ;;  %v4775_v30 = vld [vmem:[%s7467_s8 + $0x8] sm:$0xff]  }
 0xa55   : > { %4335 = vmatpush3.bf16.msra.mxu1 %v4757_v52  ;;  %v4781_v52 = vld [vmem:[%s7467_s8 + $0x38] sm:$0xff]  }
 0xa56   : > { %4571 = vmatprep.subr.bf16.mxu1 %v5282_v20 }
 0xaeb   : > { %v4557_v11 = vpop.f32.mrb[48].mxu0 }
 0xaec   : > { %v3418_v31 = vadd.f32 %v4557_v11, %v7336_v49  ;;  %v3409_v57 = vpop.f32.mrb[49].mxu0 }
 0xaed   : > { %v3410_v14 = vadd.f32 %v7336_v49, %v3409_v57  ;;  %v4558_v3 = vpop.f32.mrb[50].mxu0 }
 0xaee   : > { %v3421_v45 = vadd.f32 %v4558_v3, %v7336_v49  ;;  %3480 = vrot.lane.b32.xlu0 %v3418_v31, %s5280_s29  ;;  %v3412_v1 = vpop.f32.mrb[51].mxu0 }
 0xaef   : > { %3472 = vst.msk [vmem:[#allocation3] sm:$0xff] %vm2842_vm15, %v3410_v14  ;;  %v3413_v15 = vadd.f32 %v7336_v49, %v3412_v1 }
 0xaf0   : > { %3486 = vrot.lane.b32.xlu1 %v3421_v45, %s5269_s12 }
 0xaf4   : > { %3474 = vrot.lane.b32.xlu1 %v3413_v15, %s5281_s27 }
 0xafb   : > { %v4561_v60 = vpop.f32.mrb[52].mxu0 }
 0xafc   : > { %v3434_v35 = vadd.f32 %v4561_v60, %v7336_v49  ;;  %v3425_v18 = vpop.f32.mrb[53].mxu0  ;;  %v4776_v60 = vld [vmem:[%s7467_s8 + $0x10] sm:$0xff]  }
 0xafd   : > { %v3426_v16 = vadd.f32 %v7336_v49, %v3425_v18  ;;  %v4562_v36 = vpop.f32.mrb[54].mxu0  ;;  %v4778_v18 = vld [vmem:[%s7467_s8 + $0x20] sm:$0xff]  }
 0xafe   : > { %v3428_v39 = vpop.f32.mrb[55].mxu0  ;;  %3498 = vrot.lane.b32.xlu1 %v3434_v35, %s5280_s29  ;;  %v3437_v13 = vadd.f32 %v4562_v36, %v7336_v49  ;;  %v4777_v35 = vld [vmem:[%s7467_s8 + $0x18] sm:$0xff]   ;;  %v4780_v36 = vld [vmem:[%s7467_s8 + $0x30] sm:$0xff]  }
 0xaff   : > { %3491 = vst.msk [vmem:[#allocation3 + $0x8] sm:$0xff] %vm2842_vm15, %v3426_v16  ;;  %v3429_v56 = vadd.f32 %v7336_v49, %v3428_v39  ;;  %v4779_v16 = vld [vmem:[%s7467_s8 + $0x28] sm:$0xff]  }
 0xb01   : > { %3493 = vrot.lane.b32.xlu0 %v3429_v56, %s5281_s27 }
 0xb02   : > { %3503 = vrot.lane.b32.xlu1 %v3437_v13, %s5269_s12 }
 0xb0b   : > { %v4565_v63 = vpop.f32.mrb[56].mxu0 }
 0xb0c   : > { %v3450_v42 = vadd.f32 %v4565_v63, %v7336_v49  ;;  %v3441_v27 = vpop.f32.mrb[57].mxu0 }
 0xb0d   : > { %v3442_v26 = vadd.f32 %v7336_v49, %v3441_v27  ;;  %v4566_v2 = vpop.f32.mrb[58].mxu0 }
 0xb0e   : > { %v3444_v47 = vpop.f32.mrb[59].mxu0  ;;  %3514 = vrot.lane.b32.xlu0 %v3450_v42, %s5280_s29  ;;  %v3453_v8 = vadd.f32 %v4566_v2, %v7336_v49 }
 0xb0f   : > { %3507 = vst.msk [vmem:[#allocation3 + $0x10] sm:$0xff] %vm2842_vm15, %v3442_v26  ;;  %v3445_v7 = vadd.f32 %v7336_v49, %v3444_v47 }
 0xb12   : > { %3509 = vrot.lane.b32.xlu0 %v3445_v7, %s5281_s27 }
 0xb1b   : > { %v4569_v50 = vpop.f32.mrb[60].mxu0 }
 0xb1c   : > { %v3466_v21 = vadd.f32 %v4569_v50, %v7336_v49  ;;  %v3457_v34 = vpop.f32.mrb[61].mxu0 }
 0xb1d   : > { %v3458_v5 = vadd.f32 %v7336_v49, %v3457_v34  ;;  %v4570_v58 = vpop.f32.mrb[62].mxu0 }
 0xb1e   : > { %v3460_v44 = vpop.f32.mrb[63].mxu0  ;;  %3530 = vrot.lane.b32.xlu1 %v3466_v21, %s5280_s29  ;;  %v3469_v62 = vadd.f32 %v4570_v58, %v7336_v49  ;;  %s4010_s29 = scalar_lea.sflag [#allocation6], %s397_s24 }
 0xb1f   : > { %3523 = vst.msk [vmem:[#allocation3 + $0x18] sm:$0xff] %vm2842_vm15, %v3458_v5  ;;  %v3461_v53 = vadd.f32 %v7336_v49, %v3460_v44  ;;  %vm5283_vm15 = vmmov 0  }
 0xb21   : > { %3525 = vrot.lane.b32.xlu0 %v3461_v53, %s5281_s27  ;;  %s5284_s27 = smov [#allocation9]  }
 0xb22   : > { %3535 = vrot.lane.b32.xlu1 %v3469_v62, %s5269_s12 }
 0xb25   : > { %3519 = vrot.lane.b32.xlu0 %v3453_v8, %s5269_s12  ;;  %s5196_s12 = sshll.u32 %s5284_s27, 4  ;;  %s5197_s12 = int_to_ptr.vmem [resolvable:$false] %s5196_s12 }
 0xb26   : > { %s5198_s15 = scalar_lea.vmem %s5197_s12, 256  ;;  %p5199_p7 = scmp.lt.s32.totalorder %s7419_s18, %s5197_s12 }
 0xb27   : > { %p5200_p8 = scmp.lt.s32.totalorder %s5198_s15, %s5192_s17 }
 0xb29   : > { %p5201_p11 = por %p5200_p8, %p5199_p7 }
 0xb2b   : > { %p5202_p13 = pnand %p5201_p11, %p5195_p4 }
 0xb60   : > { %v3481_v48 = vpop.permute.xlu0 %3480 }
 0xb62   : > { %v3487_v25 = vpop.permute.xlu1 %3486 }
 0xb66   : > { %v3475_v38 = vpop.permute.xlu1 %3474 }
 0xb67   : > { %3478 = vst.msk [vmem:[#allocation3] sm:$0xff] %vm3477_vm4, %v3475_v38 }
 0xb68   : > { %3484 = vst.msk [vmem:[#allocation3] sm:$0xff] %vm3483_vm12, %v3481_v48 }
 0xb69   : > { %3490 = vst.msk [vmem:[#allocation3] sm:$0xff] %vm3489_vm3, %v3487_v25 }
 0xb70   : > { %v3499_v37 = vpop.permute.xlu1 %3498  ;;  %v3539_v49 = vld [vmem:[#allocation3] sm:$0xff] }
 0xb71   : > { %v3543_v31 = vpack.c.bf16 %v3539_v49, %v3539_v49 }
 0xb73   : > { %v3494_v19 = vpop.permute.xlu0 %3493 }
 0xb74   : > { %3496 = vst.msk [vmem:[#allocation3 + $0x8] sm:$0xff] %vm3477_vm4, %v3494_v19  ;;  %v3504_v51 = vpop.permute.xlu1 %3503 }
 0xb75   : > { %3501 = vst.msk [vmem:[#allocation3 + $0x8] sm:$0xff] %vm3483_vm12, %v3499_v37 }
 0xb76   : > { %3506 = vst.msk [vmem:[#allocation3 + $0x8] sm:$0xff] %vm3489_vm3, %v3504_v51 }
 0xb7d   : > { %v3540_v11 = vld [vmem:[#allocation3 + $0x8] sm:$0xff] }
 0xb7e   : > { %v3544_v10 = vpack.c.bf16 %v3540_v11, %v3540_v11 }
 0xb80   : > { %v3515_v57 = vpop.permute.xlu0 %3514  ;;  %3842 = vmatprep.mubr.bf16.mxu1 %v3544_v10 }
 0xb81   : > { %3843 = vmatmul.mubr.bf16.vlgmr.msra.gmra.mrb[48].mxu1 %v3543_v31 }
 0xb82   : > { %4572 = vmatpush3.bf16.msra.mxu1 %v4774_v12  ;;  %4587 = vmatprep.mubr.msk.bf16.mxu1 %vm5283_vm15, %v5282_v20 }
 0xb83   : > { %4573 = vmatprep.subr.bf16.mxu1 %v5282_v20 }
 0xb84   : > { %v3510_v14 = vpop.permute.xlu0 %3509 }
 0xb85   : > { %3512 = vst.msk [vmem:[#allocation3 + $0x10] sm:$0xff] %vm3477_vm4, %v3510_v14 }
 0xb86   : > { %3517 = vst.msk [vmem:[#allocation3 + $0x10] sm:$0xff] %vm3483_vm12, %v3515_v57  ;;  %4574 = vmatpush3.bf16.msra.mxu1 %v4775_v30 }
 0xb87   : > { %4575 = vmatprep.subr.bf16.mxu1 %v5282_v20 }
 0xb8a   : > { %4576 = vmatpush3.bf16.msra.mxu1 %v4776_v60 }
 0xb8b   : > { %4577 = vmatprep.subr.bf16.mxu1 %v5282_v20 }
 0xb8e   : > { %4578 = vmatpush3.bf16.msra.mxu1 %v4777_v35 }
 0xb8f   : > { %4579 = vmatprep.subr.bf16.mxu1 %v5282_v20 }
 0xb90   : > { %v3531_v3 = vpop.permute.xlu1 %3530 }
 0xb92   : > { %4580 = vmatpush3.bf16.msra.mxu1 %v4778_v18 }
 0xb93   : > { %v3526_v45 = vpop.permute.xlu0 %3525  ;;  %4581 = vmatprep.subr.bf16.mxu1 %v5282_v20 }
 0xb94   : > { %3528 = vst.msk [vmem:[#allocation3 + $0x18] sm:$0xff] %vm3477_vm4, %v3526_v45  ;;  %v3536_v1 = vpop.permute.xlu1 %3535 }
 0xb95   : > { %3533 = vst.msk [vmem:[#allocation3 + $0x18] sm:$0xff] %vm3483_vm12, %v3531_v3 }
 0xb96   : > { %3538 = vst.msk [vmem:[#allocation3 + $0x18] sm:$0xff] %vm3489_vm3, %v3536_v1  ;;  %4582 = vmatpush3.bf16.msra.mxu1 %v4779_v16 }
 0xb97   : > { %v3520_v43 = vpop.permute.xlu0 %3519  ;;  %4583 = vmatprep.subr.bf16.mxu1 %v5282_v20 }
 0xb98   : > { %3522 = vst.msk [vmem:[#allocation3 + $0x10] sm:$0xff] %vm3489_vm3, %v3520_v43 }
 0xb9a   : > { %4584 = vmatpush3.bf16.msra.mxu1 %v4780_v36 }
 0xb9b   : > { %4585 = vmatprep.subr.bf16.mxu1 %v5282_v20 }
 0xb9d   : > { %v3542_v24 = vld [vmem:[#allocation3 + $0x18] sm:$0xff] }
 0xb9e   : > { %v3546_v15 = vpack.c.bf16 %v3542_v24, %v3542_v24  ;;  %4586 = vmatpush3.bf16.msra.mxu1 %v4781_v52 }
 0xb9f   : > { %v3541_v28 = vld [vmem:[#allocation3 + $0x10] sm:$0xff] }
 0xba0   : > { %3882 = vmatprep.mubr.bf16.mxu0 %v3546_v15  ;;  %v3545_v59 = vpack.c.bf16 %v3541_v28, %v3541_v28 }
 0xba2   : > { %3883 = vmatmul.mubr.bf16.vlgmr.msra.gmra.mrb[64].mxu0 %v3545_v59 }
 0xc54   : > { %v4336_v39 = vpop.f32.mrb[48].mxu1 }
 0xc55   : > { %v4337_v56 = vpop.f32.mrb[49].mxu1 }
 0xc56   : > { %v4338_v13 = vadd.f32 %v4337_v56, %v4336_v39  ;;  %v4339_v22 = vpop.f32.mrb[50].mxu1 }
 0xc57   : > { %v4340_v41 = vpop.f32.mrb[51].mxu1 }
 0xc58   : > { %v3845_v9 = vadd.f32 %v4338_v13, %v4174_v32 }
 0xc75   : > { %v4358_v23 = vpop.f32.mrb[64].mxu0 }
 0xc76   : > { %v4359_v33 = vpop.f32.mrb[65].mxu0 }
 0xc77   : > { %v4360_v54 = vadd.f32 %v4359_v33, %v4358_v23  ;;  %v4361_v63 = vpop.f32.mrb[66].mxu0 }
 0xc78   : > { %v4362_v42 = vpop.f32.mrb[67].mxu0 }
 0xc79   : > { %v3885_v27 = vadd.f32 %v4360_v54, %v3845_v9 }
 0xc7b   : > { %v3891_v26 = vmin.f32 %v3885_v27, 0.0  ;;  %vm3890_vm10 = vcmp.gt.f32.partialorder %v3885_v27, 0.0 }
 0xc7d   : > { %v3892_v2 = vmul.f32 1.442695, %v3891_v26 }
 0xc7f   : > { %5134 = vpow2.f32 %v3892_v2 }
 0xc89   : > { %v5135_v55 = vpop.eup %5134 }
 0xc8a   : > { %v4207_v47 = vadd.f32 -1.0, %v5135_v55 }
 0xc8c   : > { %v3895_v7 = vsel %vm3890_vm10, %v3885_v27, %v4207_v47 }
 0xc8d   : > { %v3896_v40 = vpack.c.bf16 %v3895_v7, %v3895_v7 }
 0xc8f   : > { %4588 = vmatmul.mubr.bf16.vlgmr.msra.gmra.mrb[52].mxu1 %v3896_v40 }
 0xd62   : > { %v4002_v0 = vpop.f32.mrb[52].mxu1 }
 0xd63   : > { %v4003_v17 = vadd.f32 %v4208_v6, %v4002_v0  ;;  %v4589_v29 = vpop.f32.mrb[53].mxu1 }
 0xd64   : > { %v4005_v4 = vpop.f32.mrb[54].mxu1 }
 0xd65   : > { %4008 = vst [vmem:[%s399_s22] sm:$0xff] %v4003_v17  ;;  %v4590_v46 = vpop.f32.mrb[55].mxu1 }
 0xd66   : > { %5205 = shalt.err (!%p5202_p13)
}
 0xd67   : > { %s5206_s19 = scalar_lea.hbm %s7417_s26, 128  ;;  %s5210_s30 = scalar_lea.hbm %s7469_s10, 256 }
 0xd68   : > { %p5207_p5 = scmp.ne.s32.totalorder %s7417_s26, %s5206_s19  ;;  %p5211_p9 = scmp.lt.u32.totalorder %s7417_s26, %s7469_s10 }
 0xd69   : > { %p5212_p10 = scmp.lt.u32.totalorder %s5210_s30, %s5206_s19  ;;  %p5214_p1 = scmp.lt.u32.totalorder %s5206_s19, %s7417_s26 }
 0xd6a   : > { %p5208_p0 = pnand %p5207_p5, %p7774_p2 }
 0xd6b   : > { %p5213_p12 = por %p5212_p10, %p5211_p9 }
 0xd6c   : > { %p5209_p6 = pneg %p5208_p0 }
 0xd6d   : > { %p5215_p3 = por %p5214_p1, %p5213_p12 }
 0xd6f   : > { %p5216_p4 = pnand %p5215_p3, %p5209_p6 }
 0xd71   : > { %5219 = shalt.err (!%p5216_p4)
}
 0xd72   : > { %4599 = dma.vmem_to_hbm [thread:$0]  (%p7774_p2), %s7419_s18, 128, %s7417_s26, %s4010_s29  }
 0xd73 PF: > { %s7775_s22 = sld [smem:[#allocation16_spill]]  ;;  %p4616_p7 = scmp.ge.s32.totalorder %s5262_s16, 2 }
 0xd74   : > { %s4035_s20 = sand.u32 1, %s5250_s13  }
 0xd75   : > { %s4036_s21 = scalar_lea.sflag [#allocation6], %s4035_s20 }
 0xd79   : > { %p7776_p8 = scmp.ne.s32.totalorder %s7775_s22, 0 }
 0xd7b   : > { %p4609_p11 = pnand %p4616_p7, %p7776_p8 }
 0xd7d   : > { %5245 = dma.done.wait (!%p4609_p11), %s4036_s21, 128  }
 0xd7e   : > { %5247 = vsyncadd (!%p4609_p11), %s4036_s21, 4294967168  ;;  %s7777_s16 = sld [smem:[#allocation14_spill]]  ;;  %s7778_s17 = sld [smem:[#allocation13_spill]] }
 0xd7f   : > { %s7779_s15 = sld [smem:[#allocation15_spill]]  ;;  %s7780_s13 = smov %s5254_s14 }
 0xd84   : > { %p22_p13 = scmp.ge.s32.totalorder %s7777_s16, 4   ;;  %s7781_s14 = smov %s7778_s17 }
 0xd86   :  { %24 = sbr.rel (!%p22_p13) target bundleno = 5 (0x5), region = 107 }
 0xd8d   :  { %4041 = vsyncpa [#allocation5], 1 }
 0xd8e   :  { %4043 = vsyncpa [#allocation5 + $0x1], 1 }
 0xd8f   :  { %4044 = vsyncpa [#allocation8], 1 }
 0xd90   :  { %4045 = vsyncpa [#allocation6], 1 }
 0xd91   :  { %4047 = vsyncpa [#allocation6 + $0x1], 1 }

</bundles_post_ra>
